<compile_context>
chip_gen: v6e
topology: v6e:2x2x1
jax: 0.10.0
libtpu: 0.0.40
codegen_flags: <defaults>
</compile_context>

<pallas_src>
import jax
import jax.numpy as jnp
from jax.experimental import pallas as pl
from jax.experimental.pallas import tpu as pltpu


_SQRT_HALF = 0.7071067811865476


# ------------------------------ activations ----------------------------------

def _gelu_erf(x):
    """Exact (erf) GELU, matching torch.nn.functional.gelu default."""
    xf = x.astype(jnp.float32)
    return (0.5 * xf * (1.0 + jax.lax.erf(xf * _SQRT_HALF))).astype(x.dtype)


def _gelu_tanh(x):
    """Tanh-approximate GELU (single EUP transcendental per element)."""
    return jax.nn.gelu(x, approximate=True)


# ----------------------------- Pallas kernels ---------------------------------

def _make_resident_kernel(gelu_fn, ew_dtype):
    """Fast path: all weights VMEM-resident, grid = (row tiles,). No scratch."""
    def kernel(x_ref, w1a_ref, b1a_ref, w1g_ref, b1g_ref, w2_ref, b2_ref, o_ref):
        x = x_ref[...]                                            # (TM, D) bf16
        a = jnp.dot(x, w1a_ref[...], preferred_element_type=jnp.float32) + b1a_ref[...]
        g = jnp.dot(x, w1g_ref[...], preferred_element_type=jnp.float32) + b1g_ref[...]
        # GEGLU elementwise math (width gate pre-folded into W2).
        y = a.astype(ew_dtype) * gelu_fn(g.astype(ew_dtype))
        out = jnp.dot(y.astype(w2_ref.dtype), w2_ref[...],
                      preferred_element_type=jnp.float32)
        o_ref[...] = (out + b2_ref[...]).astype(o_ref.dtype)
    return kernel


def _make_streaming_kernel(gelu_fn, ew_dtype):
    """Fallback: inner dimension chunked over a reduction grid axis with an f32
    accumulator, for when the weights do not fit the VMEM budget (v7x sizes)."""
    def kernel(x_ref, w1a_ref, b1a_ref, w1g_ref, b1g_ref, w2_ref, b2_ref,
               o_ref, acc_ref):
        k = pl.program_id(1)

        @pl.when(k == 0)
        def _():
            # Seed the accumulator with b2 -> no final (TM, dim_out) add needed.
            acc_ref[...] = jnp.broadcast_to(b2_ref[...], acc_ref.shape)

        x = x_ref[...]                                            # (TM, D) bf16
        a = jnp.dot(x, w1a_ref[...], preferred_element_type=jnp.float32) + b1a_ref[...]
        g = jnp.dot(x, w1g_ref[...], preferred_element_type=jnp.float32) + b1g_ref[...]
        y = a.astype(ew_dtype) * gelu_fn(g.astype(ew_dtype))
        acc_ref[...] += jnp.dot(y.astype(w2_ref.dtype), w2_ref[...],
                                preferred_element_type=jnp.float32)

        @pl.when(k == pl.num_programs(1) - 1)
        def _():
            o_ref[...] = acc_ref[...].astype(o_ref.dtype)
    return kernel


# ------------------------------- wrapper --------------------------------------

def _round_up(x, m):
    return ((x + m - 1) // m) * m


def _pick_vmem_limit():
    """Generation-aware VMEM scoped limit (leave compiler-scratch headroom)."""
    try:
        cap = int(pltpu.get_tpu_info().vmem_capacity_bytes)
    except Exception:
        cap = 64 * 1024 * 1024          # conservative (v7x-sized) fallback
    if cap >= 96 * 1024 * 1024:         # v5e / v6e (128 MiB physical)
        return 100 * 1024 * 1024
    return max(cap - 10 * 1024 * 1024, 32 * 1024 * 1024)   # v7x (64 MiB)


def gated_feed_forward(x, w1a, b1a, w1g, b1g, w2, b2, *,
                       tm=256, tk_inner=512, out_dtype=None,
                       elementwise_dtype=jnp.float32,
                       approximate_gelu=False,
                       force_streaming=False):
    """x: (B, S, D) (bf16 recommended).  Returns (B, S, dim_out).

    elementwise_dtype: f32 by default (v5e-safe).
    TODO(synk): pass elementwise_dtype=jnp.bfloat16 on v6e/v7x if accuracy allows.
    approximate_gelu:  False -> exact erf (torch default); True -> tanh EUP path.
    """
    B, S, D = x.shape
    M = B * S
    inner = w1a.shape[1]
    dim_out = w2.shape[1]
    out_dtype = x.dtype if out_dtype is None else out_dtype

    vmem_limit = _pick_vmem_limit()
    gelu_fn = _gelu_tanh if approximate_gelu else _gelu_erf

    # Row tile: MXU-height friendly, bf16-sublane friendly (multiple of 16) for
    # ragged M; padded rows are sliced off below (wasted work, not a bug).
    tm = min(tm, _round_up(M, 16))
    m_pad = _round_up(M, tm)

    x2 = x.reshape(M, D)
    if m_pad != M:
        x2 = jnp.pad(x2, ((0, m_pad - M), (0, 0)))

    # ---- resident-vs-streaming decision (per perf review) ----
    itemsize_w = jnp.dtype(w1a.dtype).itemsize
    weight_bytes = (2 * D * inner + inner * dim_out) * itemsize_w
    x_tile_bytes = tm * D * jnp.dtype(x.dtype).itemsize
    o_tile_bytes = tm * dim_out * jnp.dtype(out_dtype).itemsize
    work_bytes = 3 * tm * inner * 4            # a, g, y temporaries (f32 worst case)
    needed = 2 * (weight_bytes + x_tile_bytes + o_tile_bytes) + work_bytes + (4 << 20)
    resident = (not force_streaming) and (needed <= vmem_limit)

    # TODO(synk): on v7x use pltpu.CORE_PARALLEL on the row axis (or a core_map
    # split) so both TensorCores are used when m_pad//tm >= 2.
    # TODO(synk): add an optional dim_out grid axis (tiled W2/acc/out) for
    # multi-thousand dim_out on v7x.

    if resident:
        grid = (m_pad // tm,)
        out2 = pl.pallas_call(
            _make_resident_kernel(gelu_fn, elementwise_dtype),
            out_shape=jax.ShapeDtypeStruct((m_pad, dim_out), out_dtype),
            grid_spec=pltpu.PrefetchScalarGridSpec(
                num_scalar_prefetch=0,
                grid=grid,
                in_specs=[
                    pl.BlockSpec((tm, D),          lambda i: (i, 0)),  # x rows
                    pl.BlockSpec((D, inner),       lambda i: (0, 0)),  # W1 value half
                    pl.BlockSpec((1, inner),       lambda i: (0, 0)),  # b1 value half
                    pl.BlockSpec((D, inner),       lambda i: (0, 0)),  # W1 gate half
                    pl.BlockSpec((1, inner),       lambda i: (0, 0)),  # b1 gate half
                    pl.BlockSpec((inner, dim_out), lambda i: (0, 0)),  # W2 (gate folded)
                    pl.BlockSpec((1, dim_out),     lambda i: (0, 0)),  # b2
                ],
                out_specs=pl.BlockSpec((tm, dim_out), lambda i: (i, 0)),
            ),
            compiler_params=pltpu.CompilerParams(
                dimension_semantics=("parallel",),
                vmem_limit_bytes=vmem_limit,
            ),
        )(x2, w1a, b1a, w1g, b1g, w2, b2)
    else:
        tk = min(tk_inner, inner)
        assert inner % tk == 0, "inner_dim must be divisible by tk_inner"
        grid = (m_pad // tm, inner // tk)
        # TODO(synk): pipeline_mode=pl.Buffered(3) on the weight BlockSpecs if
        # profiling shows exposed weight DMA at k-step boundaries on v5e.
        out2 = pl.pallas_call(
            _make_streaming_kernel(gelu_fn, elementwise_dtype),
            out_shape=jax.ShapeDtypeStruct((m_pad, dim_out), out_dtype),
            grid_spec=pltpu.PrefetchScalarGridSpec(
                num_scalar_prefetch=0,
                grid=grid,
                in_specs=[
                    pl.BlockSpec((tm, D),       lambda i, k: (i, 0)),  # x rows
                    pl.BlockSpec((D, tk),       lambda i, k: (0, k)),  # W1 value chunk
                    pl.BlockSpec((1, tk),       lambda i, k: (0, k)),  # b1 value chunk
                    pl.BlockSpec((D, tk),       lambda i, k: (0, k)),  # W1 gate chunk
                    pl.BlockSpec((1, tk),       lambda i, k: (0, k)),  # b1 gate chunk
                    pl.BlockSpec((tk, dim_out), lambda i, k: (k, 0)),  # W2 chunk
                    pl.BlockSpec((1, dim_out),  lambda i, k: (0, 0)),  # b2
                ],
                out_specs=pl.BlockSpec((tm, dim_out), lambda i, k: (i, 0)),
                scratch_shapes=[pltpu.VMEM((tm, dim_out), jnp.float32)],
            ),
            compiler_params=pltpu.CompilerParams(
                dimension_semantics=("parallel", "arbitrary"),
                vmem_limit_bytes=vmem_limit,
            ),
        )(x2, w1a, b1a, w1g, b1g, w2, b2)

    if m_pad != M:
        out2 = out2[:M]
    return out2.reshape(B, S, dim_out)


# ------------------------------ glue / params --------------------------------

def hard_concrete(log_a, gamma=-0.1, zeta=1.1):
    """Deterministic (eval-mode) hard-concrete gate in [0, 1]."""
    s = jax.nn.sigmoid(log_a)
    s_bar = s * (zeta - gamma) + gamma
    return jnp.clip(s_bar, 0.0, 1.0)


def init_params(key, dim, dim_out, inner_dim, gate_width):
    k1, k2, k3, k4, k5 = jax.random.split(key, 5)
    # Stored transposed relative to nn.Linear.weight so the kernel computes x @ W.
    w1 = jax.random.normal(k1, (dim, 2 * inner_dim), jnp.float32) * 0.02
    b1 = jax.random.normal(k2, (1, 2 * inner_dim), jnp.float32) * 0.01
    w2 = jax.random.normal(k3, (inner_dim, dim_out), jnp.float32) * 0.02
    b2 = jax.random.normal(k4, (1, dim_out), jnp.float32) * 0.01
    gate_f = jax.random.normal(k5, (1, inner_dim // gate_width), jnp.float32)
    return w1, b1, w2, b2, gate_f


def prepare_params(w1, b1, w2, b2, gate_f, gate_width, param_dtype=jnp.bfloat16):
    """Split W1 into value/gate halves, fold the static width gate into W2,
    and cast matmul operands to bf16 (biases stay f32).  Eval-mode only."""
    inner = w2.shape[0]
    gate_vec = jnp.repeat(hard_concrete(gate_f), gate_width, axis=1)   # (1, inner)

    w1a, w1g = w1[:, :inner], w1[:, inner:]
    b1a, b1g = b1[:, :inner], b1[:, inner:]
    # (y * gate) @ W2 == y @ (gate[:, None] * W2) — exact for the static eval gate.
    w2_folded = gate_vec.reshape(inner, 1) * w2

    return (w1a.astype(param_dtype), b1a.astype(jnp.float32),
            w1g.astype(param_dtype), b1g.astype(jnp.float32),
            w2_folded.astype(param_dtype), b2.astype(jnp.float32))


def reference(x, w1a, b1a, w1g, b1g, w2f, b2, approximate=False):
    """Pure-JAX reference of the same math (same bf16 roundings as the kernel)."""
    B, S, D = x.shape
    x2 = x.reshape(B * S, D).astype(jnp.float32)
    a = x2 @ w1a.astype(jnp.float32) + b1a
    g = x2 @ w1g.astype(jnp.float32) + b1g
    y = a * jax.nn.gelu(g, approximate=approximate)
    y = y.astype(jnp.bfloat16).astype(jnp.float32)    # mirror kernel cast before W2
    out = y @ w2f.astype(jnp.float32) + b2
    return out.reshape(B, S, w2f.shape[1])


# ----------------------------------- main -------------------------------------

if __name__ == "__main__":
    # Small but TPU-shaped config: dim_out multiple of 128 (lane-dense stores),
    # M = B*S = 256 so the full tm=256 row tile is exercised.
    B, S, dim = 2, 128, 128
    mult, gate_width = 4, 32
    inner_dim = dim * mult          # 512
    dim_out = dim                   # 128

    key = jax.random.PRNGKey(0)
    kx, kp = jax.random.split(key)
    x = jax.random.normal(kx, (B, S, dim), jnp.float32).astype(jnp.bfloat16)

    w1, b1, w2, b2, gate_f = init_params(kp, dim, dim_out, inner_dim, gate_width)
    params = prepare_params(w1, b1, w2, b2, gate_f, gate_width)

    # 1) Resident-weights fast path (default): bf16 output, exact erf GELU.
    out_res = gated_feed_forward(x, *params, tm=256)
    out_res = jax.block_until_ready(out_res)
    assert out_res.shape == (B, S, dim_out)
    ref = reference(x, *params, approximate=False)
    ref_bf = ref.astype(jnp.bfloat16).astype(jnp.float32)
    err1 = float(jnp.max(jnp.abs(out_res.astype(jnp.float32) - ref_bf)))
    assert err1 < 1e-2, f"resident-path mismatch, max_abs_err={err1}"

    # 2) Streaming / reduction fallback path (exercises acc init/finalize):
    #    force the (rows, inner-chunk) grid with 2 inner chunks, f32 output.
    out_stream = gated_feed_forward(x, *params, tm=256, tk_inner=256,
                                    out_dtype=jnp.float32, force_streaming=True)
    out_stream = jax.block_until_ready(out_stream)
    err2 = float(jnp.max(jnp.abs(out_stream - ref)))
    assert jnp.allclose(out_stream, ref, atol=2e-3, rtol=2e-3), \
        f"streaming-path mismatch, max_abs_err={err2}"

    # 3) Optional EUP tanh-approx GELU performance knob (checked vs. tanh ref).
    out_tanh = gated_feed_forward(x, *params, tm=256, out_dtype=jnp.float32,
                                  approximate_gelu=True)
    out_tanh = jax.block_until_ready(out_tanh)
    ref_tanh = reference(x, *params, approximate=True)
    err3 = float(jnp.max(jnp.abs(out_tanh - ref_tanh)))
    assert jnp.allclose(out_tanh, ref_tanh, atol=2e-3, rtol=2e-3), \
        f"tanh-gelu-path mismatch, max_abs_err={err3}"

    print("KERNEL_OK")
</pallas_src>

<mosaic_0001>
module attributes {stable_mosaic.version = 11 : i64} {
  func.func @kernel(%arg0: i32, %arg1: memref<256x128xbf16, #tpu.memory_space<vmem>>, %arg2: memref<128x512xbf16, #tpu.memory_space<vmem>>, %arg3: memref<1x512xf32, #tpu.memory_space<vmem>>, %arg4: memref<128x512xbf16, #tpu.memory_space<vmem>>, %arg5: memref<1x512xf32, #tpu.memory_space<vmem>>, %arg6: memref<512x128xbf16, #tpu.memory_space<vmem>>, %arg7: memref<1x128xf32, #tpu.memory_space<vmem>>, %arg8: memref<256x128xbf16, #tpu.memory_space<vmem>>) attributes {dimension_semantics = [#tpu.dimension_semantics<parallel>], iteration_bounds = array<i64: 1>, scalar_prefetch = 0 : i64, scratch_operands = 0 : i64, tpu.core_type = #tpu.core_type<tc>, window_params = [{transform_indices = @transform_0, window_bounds = array<i64: 256, 128>}, {pipeline_mode = #tpu.pipeline_mode<synchronous>, transform_indices = @transform_1, window_bounds = array<i64: 128, 512>}, {pipeline_mode = #tpu.pipeline_mode<synchronous>, transform_indices = @transform_2, window_bounds = array<i64: 1, 512>}, {pipeline_mode = #tpu.pipeline_mode<synchronous>, transform_indices = @transform_3, window_bounds = array<i64: 128, 512>}, {pipeline_mode = #tpu.pipeline_mode<synchronous>, transform_indices = @transform_4, window_bounds = array<i64: 1, 512>}, {pipeline_mode = #tpu.pipeline_mode<synchronous>, transform_indices = @transform_5, window_bounds = array<i64: 512, 128>}, {pipeline_mode = #tpu.pipeline_mode<synchronous>, transform_indices = @transform_6, window_bounds = array<i64: 1, 128>}, {transform_indices = @transform_7, window_bounds = array<i64: 256, 128>}]} {
    %c0 = arith.constant 0 : index
    %c0_0 = arith.constant 0 : index
    %0 = vector.load %arg1[%c0, %c0_0] : memref<256x128xbf16, #tpu.memory_space<vmem>>, vector<256x128xbf16>
    %c0_1 = arith.constant 0 : index
    %c0_2 = arith.constant 0 : index
    %1 = vector.load %arg2[%c0_1, %c0_2] : memref<128x512xbf16, #tpu.memory_space<vmem>>, vector<128x512xbf16>
    %cst = arith.constant dense<0.000000e+00> : vector<256x512xf32>
    %2 = tpu.matmul %0, %1, %cst {dimension_numbers = #tpu.dot_dimension_numbers<[1], [0], [0], [1], [0, 0, 1, 1], [], []>} : vector<256x128xbf16>, vector<128x512xbf16>, vector<256x512xf32> -> vector<256x512xf32>
    %c0_3 = arith.constant 0 : index
    %c0_4 = arith.constant 0 : index
    %3 = vector.load %arg3[%c0_3, %c0_4] : memref<1x512xf32, #tpu.memory_space<vmem>>, vector<1x512xf32>
    %4 = vector.broadcast %3 : vector<1x512xf32> to vector<256x512xf32>
    %5 = arith.addf %2, %4 : vector<256x512xf32>
    %c0_5 = arith.constant 0 : index
    %c0_6 = arith.constant 0 : index
    %6 = vector.load %arg4[%c0_5, %c0_6] : memref<128x512xbf16, #tpu.memory_space<vmem>>, vector<128x512xbf16>
    %cst_7 = arith.constant dense<0.000000e+00> : vector<256x512xf32>
    %7 = tpu.matmul %0, %6, %cst_7 {dimension_numbers = #tpu.dot_dimension_numbers<[1], [0], [0], [1], [0, 0, 1, 1], [], []>} : vector<256x128xbf16>, vector<128x512xbf16>, vector<256x512xf32> -> vector<256x512xf32>
    %c0_8 = arith.constant 0 : index
    %c0_9 = arith.constant 0 : index
    %8 = vector.load %arg5[%c0_8, %c0_9] : memref<1x512xf32, #tpu.memory_space<vmem>>, vector<1x512xf32>
    %9 = vector.broadcast %8 : vector<1x512xf32> to vector<256x512xf32>
    %10 = arith.addf %7, %9 : vector<256x512xf32>
    %cst_10 = arith.constant 5.000000e-01 : f32
    %11 = vector.broadcast %cst_10 : f32 to vector<256x512xf32>
    %12 = arith.mulf %11, %10 : vector<256x512xf32>
    %cst_11 = arith.constant 0.707106769 : f32
    %13 = vector.broadcast %cst_11 : f32 to vector<256x512xf32>
    %14 = arith.mulf %10, %13 : vector<256x512xf32>
    %15 = math.erf %14 : vector<256x512xf32>
    %cst_12 = arith.constant 1.000000e+00 : f32
    %16 = vector.broadcast %cst_12 : f32 to vector<256x512xf32>
    %17 = arith.addf %16, %15 : vector<256x512xf32>
    %18 = arith.mulf %12, %17 : vector<256x512xf32>
    %19 = arith.mulf %5, %18 : vector<256x512xf32>
    %20 = arith.truncf %19 : vector<256x512xf32> to vector<256x512xbf16>
    %c0_13 = arith.constant 0 : index
    %c0_14 = arith.constant 0 : index
    %21 = vector.load %arg6[%c0_13, %c0_14] : memref<512x128xbf16, #tpu.memory_space<vmem>>, vector<512x128xbf16>
    %cst_15 = arith.constant dense<0.000000e+00> : vector<256x128xf32>
    %22 = tpu.matmul %20, %21, %cst_15 {dimension_numbers = #tpu.dot_dimension_numbers<[1], [0], [0], [1], [0, 0, 1, 1], [], []>} : vector<256x512xbf16>, vector<512x128xbf16>, vector<256x128xf32> -> vector<256x128xf32>
    %c0_16 = arith.constant 0 : index
    %c0_17 = arith.constant 0 : index
    %23 = vector.load %arg7[%c0_16, %c0_17] : memref<1x128xf32, #tpu.memory_space<vmem>>, vector<1x128xf32>
    %24 = vector.broadcast %23 : vector<1x128xf32> to vector<256x128xf32>
    %25 = arith.addf %22, %24 : vector<256x128xf32>
    %26 = arith.truncf %25 : vector<256x128xf32> to vector<256x128xbf16>
    %c0_18 = arith.constant 0 : index
    %c0_19 = arith.constant 0 : index
    %27 = vector.load %arg8[%c0_18, %c0_19] : memref<256x128xbf16, #tpu.memory_space<vmem>>, vector<256x128xbf16>
    tpu.vector_store %arg8[%c0_18, %c0_19], %26 {strides = array<i32>} : memref<256x128xbf16, #tpu.memory_space<vmem>>, vector<256x128xbf16>,
    return
  }
  func.func @transform_0(%arg0: i32) -> (i32, i32) {
    %c0_i32 = arith.constant 0 : i32
    %c0_i32_0 = arith.constant 0 : i32
    return %arg0, %c0_i32 : i32, i32
  }
  func.func @transform_1(%arg0: i32) -> (i32, i32) {
    %c0_i32 = arith.constant 0 : i32
    %c0_i32_0 = arith.constant 0 : i32
    %c0_i32_1 = arith.constant 0 : i32
    return %c0_i32, %c0_i32_0 : i32, i32
  }
  func.func @transform_2(%arg0: i32) -> (i32, i32) {
    %c0_i32 = arith.constant 0 : i32
    %c0_i32_0 = arith.constant 0 : i32
    %c0_i32_1 = arith.constant 0 : i32
    return %c0_i32, %c0_i32_0 : i32, i32
  }
  func.func @transform_3(%arg0: i32) -> (i32, i32) {
    %c0_i32 = arith.constant 0 : i32
    %c0_i32_0 = arith.constant 0 : i32
    %c0_i32_1 = arith.constant 0 : i32
    return %c0_i32, %c0_i32_0 : i32, i32
  }
  func.func @transform_4(%arg0: i32) -> (i32, i32) {
    %c0_i32 = arith.constant 0 : i32
    %c0_i32_0 = arith.constant 0 : i32
    %c0_i32_1 = arith.constant 0 : i32
    return %c0_i32, %c0_i32_0 : i32, i32
  }
  func.func @transform_5(%arg0: i32) -> (i32, i32) {
    %c0_i32 = arith.constant 0 : i32
    %c0_i32_0 = arith.constant 0 : i32
    %c0_i32_1 = arith.constant 0 : i32
    return %c0_i32, %c0_i32_0 : i32, i32
  }
  func.func @transform_6(%arg0: i32) -> (i32, i32) {
    %c0_i32 = arith.constant 0 : i32
    %c0_i32_0 = arith.constant 0 : i32
    %c0_i32_1 = arith.constant 0 : i32
    return %c0_i32, %c0_i32_0 : i32, i32
  }
  func.func @transform_7(%arg0: i32) -> (i32, i32) {
    %c0_i32 = arith.constant 0 : i32
    %c0_i32_0 = arith.constant 0 : i32
    return %arg0, %c0_i32 : i32, i32
  }
}

</mosaic_0001>

<bundles_post_ra>
// kernel: tpu_custom_call.1
= control target key start
LH: loop header
LB: loop body
LE: loop exit
PB: predicated region body
PF: predicated region fallthrough
CT: control target
= control target key end

     0   :  { %12 = vsyncpa [#allocation3], 0  ;;  %s6283_s0 = inlined_call_operand.hbm [shape: bf16[256,128], index: 0, kind: input, shape index: {}]   ;;  %s6284_s1 = inlined_call_operand.hbm [shape: bf16[128,512], index: 1, kind: input, shape index: {}]   ;;  %s6285_s2 = inlined_call_operand.hbm [shape: f32[1,512], index: 2, kind: input, shape index: {}]   ;;  %s6286_s3 = inlined_call_operand.hbm [shape: bf16[128,512], index: 3, kind: input, shape index: {}]   ;;  %s6287_s4 = inlined_call_operand.vmem [shape: f32[1,512], index: 4, kind: input, shape index: {}]   ;;  %s6288_s5 = inlined_call_operand.hbm [shape: bf16[512,128], index: 5, kind: input, shape index: {}]   ;;  %s6289_s6 = inlined_call_operand.vmem [shape: f32[1,128], index: 6, kind: input, shape index: {}]   ;;  %s6290_s7 = inlined_call_operand.hbm [shape: bf16[256,128], index: 7, kind: output, shape index: {}]  }
   0x1   :  { %13 = vsyncpa [#allocation6], 0 }
   0x2   :  { %14 = vsyncpa [#allocation9], 0 }
   0x3   :  { %15 = vsyncpa [#allocation4], 0  ;;  %s4053_s24 = smov [#allocation5]  }
   0x4   :  { %s33_s25 = sshll.u32 %s4053_s24, 4  ;;  %s34_s25 = int_to_ptr.vmem [resolvable:$true] %s33_s25 }
   0x5   :  { %s3933_s26 = scalar_lea.vmem %s34_s25, 4096  ;;  %p3938_p1 = scmp.lt.s32.totalorder %s34_s25, %s34_s25 }
   0x6   :  { %p3934_p0 = scmp.ne.s32.totalorder %s34_s25, %s3933_s26  ;;  %p3939_p2 = scmp.lt.s32.totalorder %s3933_s26, %s3933_s26 }
   0x8   :  { %p3940_p3 = por %p3939_p2, %p3938_p1 }
   0xa   :  { %p3941_p4 = pnand %p3940_p3, %p3934_p0 }
   0xc   :  { %3944 = shalt.err (!%p3941_p4)
}
   0xd   :  { %s4054_s27 = smov 256   ;;  %s4055_s28 = smov 16  }
   0xe   :  { %39 = dma.hbm_to_vmem [thread:$0]  %s6284_s1, 4096, %s34_s25, [#allocation6], %s4054_s27, %s4054_s27, %s4055_s28  }
   0xf   :  { %s4056_s8 = smov [#allocation8]   ;;  %s4057_s10 = smov [#allocation2]  }
  0x10   :  { %s55_s9 = sshll.u32 %s4056_s8, 4  ;;  %s21_s11 = sshll.u32 %s4057_s10, 4  ;;  %s56_s9 = int_to_ptr.vmem [resolvable:$true] %s55_s9  ;;  %s22_s11 = int_to_ptr.vmem [resolvable:$true] %s21_s11 }
  0x11   :  { %s3953_s12 = scalar_lea.vmem %s56_s9, 4096  ;;  %p3958_p6 = scmp.lt.s32.totalorder %s56_s9, %s56_s9 }
  0x12   :  { %p3954_p5 = scmp.ne.s32.totalorder %s56_s9, %s3953_s12  ;;  %p3959_p7 = scmp.lt.s32.totalorder %s3953_s12, %s3953_s12 }
  0x14   :  { %p3960_p8 = por %p3959_p7, %p3958_p6 }
  0x16   :  { %p3961_p9 = pnand %p3960_p8, %p3954_p5 }
  0x18   :  { %3964 = shalt.err (!%p3961_p9)
}
  0x19   :  { %61 = dma.hbm_to_vmem [thread:$0]  %s6286_s3, 4096, %s56_s9, [#allocation9], %s4054_s27, %s4054_s27, %s4055_s28  }
  0x1a   :  { %s3973_s15 = scalar_lea.vmem %s22_s11, 2048  ;;  %p3978_p11 = scmp.lt.s32.totalorder %s22_s11, %s22_s11 }
  0x1b   :  { %p3974_p10 = scmp.ne.s32.totalorder %s22_s11, %s3973_s15  ;;  %p3979_p12 = scmp.lt.s32.totalorder %s3973_s15, %s3973_s15 }
  0x1d   :  { %p3980_p13 = por %p3979_p12, %p3978_p11 }
  0x1f   :  { %p3981_p0 = pnand %p3980_p13, %p3974_p10 }
  0x21   :  { %3984 = shalt.err (!%p3981_p0)
}
  0x22   :  { %s4058_s1 = smov 64   ;;  %s4059_s16 = smov 4  }
  0x23   :  { %27 = dma.hbm_to_vmem [thread:$0]  %s6283_s0, 2048, %s22_s11, [#allocation3], %s4058_s1, %s4058_s1, %s4059_s16  }
  0x24   :  { %s4060_s19 = smov [#allocation7]   ;;  %s4061_s3 = smov [#allocation10]  }
  0x25   :  { %s46_s20 = sshll.u32 %s4060_s19, 4  ;;  %s69_s21 = sshll.u32 %s4061_s3, 4  ;;  %s47_s20 = int_to_ptr.vmem [resolvable:$true] %s46_s20  ;;  %s70_s21 = int_to_ptr.vmem [resolvable:$true] %s69_s21 }
  0x26   :  { %s3993_s22 = scalar_lea.vmem %s47_s20, 64  ;;  %p3998_p2 = scmp.lt.s32.totalorder %s47_s20, %s47_s20 }
  0x27   :  { %p3994_p1 = scmp.ne.s32.totalorder %s47_s20, %s3993_s22  ;;  %p3999_p3 = scmp.lt.s32.totalorder %s3993_s22, %s3993_s22 }
  0x29   :  { %p4000_p4 = por %p3999_p3, %p3998_p2 }
  0x2b   :  { %p4001_p5 = pnand %p4000_p4, %p3994_p1 }
  0x2d   :  { %4004 = shalt.err (!%p4001_p5)
}
  0x2e   :  { %49 = dma.hbm_to_vmem [thread:$0]  %s6285_s2, 64, %s47_s20, [#allocation6]  }
  0x2f   :  { %s4013_s25 = scalar_lea.vmem %s70_s21, 4096  ;;  %p4018_p7 = scmp.lt.s32.totalorder %s70_s21, %s70_s21 }
  0x30   :  { %p4014_p6 = scmp.ne.s32.totalorder %s70_s21, %s4013_s25  ;;  %p4019_p8 = scmp.lt.s32.totalorder %s4013_s25, %s4013_s25 }
  0x32   :  { %p4020_p9 = por %p4019_p8, %p4018_p7 }
  0x34   :  { %p4021_p10 = pnand %p4020_p9, %p4014_p6 }
  0x36   :  { %4024 = shalt.err (!%p4021_p10)
}
  0x37   :  { %75 = dma.hbm_to_vmem [thread:$0]  %s6288_s5, 4096, %s70_s21, [#allocation9], %s4058_s1, %s4058_s1, %s4059_s16  }
  0x38   :  { %4045 = dma.done.wait [#allocation3], 2048  }
  0x39   :  { %4046 = vsyncadd [#allocation3], 4294965248 }
  0x3a   :  { %4047 = dma.done.wait [#allocation6], 4160  }
  0x3b   :  { %4048 = vsyncadd [#allocation6], 4294963136 }
  0x3c   :  { %4049 = dma.done.wait [#allocation9], 8192  }
  0x3d   :  { %4050 = vsyncadd [#allocation9], 4294959104  ;;  %v4062_v0 = vmov 0   ;;  %v3525_v1 = vld [vmem:[#allocation5 + $0xe4] ss:$16 sps:$4 sm:$0xff]   ;;  %v4133_v44 = vld [vmem:[#allocation2 + $0x8] sm:$0xff]  }
  0x3e   :  { %468 = vmatprep.mubr.bf16.mxu0 %v4062_v0  ;;  %661 = vmatprep.mubr.bf16.mxu1 %v4062_v0  ;;  %v3527_v2 = vld [vmem:[#allocation5 + $0xec] ss:$16 sps:$4 sm:$0xff]   ;;  %v3529_v3 = vld [vmem:[#allocation5 + $0xe0] ss:$16 sps:$4 sm:$0xff]   ;;  %v3530_v4 = vld [vmem:[#allocation5 + $0xe8] ss:$16 sps:$4 sm:$0xff]  }
  0x3f   :  { %436 = vmatprep.subr.bf16.mxu0 %v3525_v1  ;;  %629 = vmatprep.subr.bf16.mxu1 %v3527_v2  ;;  %v3531_v5 = vld [vmem:[#allocation5 + $0xc4] ss:$16 sps:$4 sm:$0xff]   ;;  %v3533_v6 = vld [vmem:[#allocation5 + $0xcc] ss:$16 sps:$4 sm:$0xff]   ;;  %v3535_v7 = vld [vmem:[#allocation5 + $0xc0] ss:$16 sps:$4 sm:$0xff]  }
  0x40   :  { %437 = vmatpush1.bf16.msra.mxu0 %v3529_v3  ;;  %630 = vmatpush1.bf16.msra.mxu1 %v3530_v4  ;;  %v3536_v8 = vld [vmem:[#allocation5 + $0xc8] ss:$16 sps:$4 sm:$0xff]   ;;  %v3537_v9 = vld [vmem:[#allocation5 + $0xa4] ss:$16 sps:$4 sm:$0xff]   ;;  %v3539_v10 = vld [vmem:[#allocation5 + $0xac] ss:$16 sps:$4 sm:$0xff]  }
  0x41   :  { %438 = vmatprep.subr.bf16.mxu0 %v3531_v5  ;;  %631 = vmatprep.subr.bf16.mxu1 %v3533_v6  ;;  %v3541_v11 = vld [vmem:[#allocation5 + $0xa0] ss:$16 sps:$4 sm:$0xff]   ;;  %v3542_v12 = vld [vmem:[#allocation5 + $0xa8] ss:$16 sps:$4 sm:$0xff]   ;;  %v3543_v13 = vld [vmem:[#allocation5 + $0x84] ss:$16 sps:$4 sm:$0xff]  }
  0x42   :  { %v3545_v14 = vld [vmem:[#allocation5 + $0x8c] ss:$16 sps:$4 sm:$0xff]   ;;  %v3547_v15 = vld [vmem:[#allocation5 + $0x80] ss:$16 sps:$4 sm:$0xff]   ;;  %v3548_v16 = vld [vmem:[#allocation5 + $0x88] ss:$16 sps:$4 sm:$0xff]  }
  0x43   :  { %v3549_v17 = vld [vmem:[#allocation5 + $0x64] ss:$16 sps:$4 sm:$0xff]   ;;  %v3551_v18 = vld [vmem:[#allocation5 + $0x6c] ss:$16 sps:$4 sm:$0xff]   ;;  %v3553_v19 = vld [vmem:[#allocation5 + $0x60] ss:$16 sps:$4 sm:$0xff]  }
  0x44   :  { %439 = vmatpush1.bf16.msra.mxu0 %v3535_v7  ;;  %632 = vmatpush1.bf16.msra.mxu1 %v3536_v8  ;;  %v3554_v20 = vld [vmem:[#allocation5 + $0x68] ss:$16 sps:$4 sm:$0xff]   ;;  %v3555_v21 = vld [vmem:[#allocation5 + $0x44] ss:$16 sps:$4 sm:$0xff]   ;;  %v3557_v22 = vld [vmem:[#allocation5 + $0x4c] ss:$16 sps:$4 sm:$0xff]  }
  0x45   :  { %440 = vmatprep.subr.bf16.mxu0 %v3537_v9  ;;  %633 = vmatprep.subr.bf16.mxu1 %v3539_v10  ;;  %v3559_v23 = vld [vmem:[#allocation5 + $0x40] ss:$16 sps:$4 sm:$0xff]   ;;  %v3560_v24 = vld [vmem:[#allocation5 + $0x48] ss:$16 sps:$4 sm:$0xff]   ;;  %v3561_v25 = vld [vmem:[#allocation5 + $0x24] ss:$16 sps:$4 sm:$0xff]  }
  0x46   :  { %v3563_v26 = vld [vmem:[#allocation5 + $0x2c] ss:$16 sps:$4 sm:$0xff]   ;;  %v3565_v27 = vld [vmem:[#allocation5 + $0x20] ss:$16 sps:$4 sm:$0xff]   ;;  %v3566_v28 = vld [vmem:[#allocation5 + $0x28] ss:$16 sps:$4 sm:$0xff]  }
  0x47   :  { %v3567_v29 = vld [vmem:[#allocation5 + $0x4] ss:$16 sps:$4 sm:$0xff]   ;;  %v3569_v30 = vld [vmem:[#allocation5 + $0xc] ss:$16 sps:$4 sm:$0xff]   ;;  %v3571_v31 = vld [vmem:[#allocation5] ss:$16 sps:$4 sm:$0xff]  }
  0x48   :  { %441 = vmatpush1.bf16.msra.mxu0 %v3541_v11  ;;  %634 = vmatpush1.bf16.msra.mxu1 %v3542_v12  ;;  %v3572_v32 = vld [vmem:[#allocation5 + $0x8] ss:$16 sps:$4 sm:$0xff]   ;;  %v3579_v34 = vld [vmem:[#allocation8 + $0xec] ss:$16 sps:$4 sm:$0xff]   ;;  %v3574_v36 = vld [vmem:[#allocation8 + $0xe0] ss:$16 sps:$4 sm:$0xff]  }
  0x49   :  { %442 = vmatprep.subr.bf16.mxu0 %v3543_v13  ;;  %635 = vmatprep.subr.bf16.mxu1 %v3545_v14  ;;  %v3576_v33 = vld [vmem:[#allocation8 + $0xe4] ss:$16 sps:$4 sm:$0xff]   ;;  %v4127_v35 = vld [vmem:[#allocation2] sm:$0xff]   ;;  %v3577_v37 = vld [vmem:[#allocation8 + $0xe8] ss:$16 sps:$4 sm:$0xff]  }
  0x4a   :  { %v3584_v38 = vld [vmem:[#allocation8 + $0xc4] ss:$16 sps:$4 sm:$0xff]   ;;  %v3587_v39 = vld [vmem:[#allocation8 + $0xcc] ss:$16 sps:$4 sm:$0xff]   ;;  %v3582_v40 = vld [vmem:[#allocation8 + $0xc0] ss:$16 sps:$4 sm:$0xff]  }
  0x4b   :  { %v3585_v41 = vld [vmem:[#allocation8 + $0xc8] ss:$16 sps:$4 sm:$0xff]   ;;  %v3592_v42 = vld [vmem:[#allocation8 + $0xa4] ss:$16 sps:$4 sm:$0xff]   ;;  %v3595_v43 = vld [vmem:[#allocation8 + $0xac] ss:$16 sps:$4 sm:$0xff]  }
  0x4c   :  { %443 = vmatpush1.bf16.msra.mxu0 %v3547_v15  ;;  %636 = vmatpush1.bf16.msra.mxu1 %v3548_v16  ;;  %v3590_v45 = vld [vmem:[#allocation8 + $0xa0] ss:$16 sps:$4 sm:$0xff]   ;;  %v3593_v46 = vld [vmem:[#allocation8 + $0xa8] ss:$16 sps:$4 sm:$0xff]   ;;  %v3600_v47 = vld [vmem:[#allocation8 + $0x84] ss:$16 sps:$4 sm:$0xff]  }
  0x4d   :  { %444 = vmatprep.subr.bf16.mxu0 %v3549_v17  ;;  %637 = vmatprep.subr.bf16.mxu1 %v3551_v18  ;;  %v3603_v48 = vld [vmem:[#allocation8 + $0x8c] ss:$16 sps:$4 sm:$0xff]   ;;  %v3598_v49 = vld [vmem:[#allocation8 + $0x80] ss:$16 sps:$4 sm:$0xff]   ;;  %v3601_v51 = vld [vmem:[#allocation8 + $0x88] ss:$16 sps:$4 sm:$0xff]  }
  0x4e   :  { %v4139_v50 = vld [vmem:[#allocation2 + $0x10] sm:$0xff]   ;;  %v3608_v52 = vld [vmem:[#allocation8 + $0x64] ss:$16 sps:$4 sm:$0xff]   ;;  %v3609_v55 = vld [vmem:[#allocation8 + $0x68] ss:$16 sps:$4 sm:$0xff]  }
  0x4f   :  { %v3611_v53 = vld [vmem:[#allocation8 + $0x6c] ss:$16 sps:$4 sm:$0xff]   ;;  %v3606_v54 = vld [vmem:[#allocation8 + $0x60] ss:$16 sps:$4 sm:$0xff]   ;;  %v3616_v56 = vld [vmem:[#allocation8 + $0x44] ss:$16 sps:$4 sm:$0xff]  }
  0x50   :  { %445 = vmatpush1.bf16.msra.mxu0 %v3553_v19  ;;  %638 = vmatpush1.bf16.msra.mxu1 %v3554_v20  ;;  %v3619_v57 = vld [vmem:[#allocation8 + $0x4c] ss:$16 sps:$4 sm:$0xff]   ;;  %v3614_v58 = vld [vmem:[#allocation8 + $0x40] ss:$16 sps:$4 sm:$0xff]   ;;  %v3617_v59 = vld [vmem:[#allocation8 + $0x48] ss:$16 sps:$4 sm:$0xff]  }
  0x51   :  { %446 = vmatprep.subr.bf16.mxu0 %v3555_v21  ;;  %639 = vmatprep.subr.bf16.mxu1 %v3557_v22  ;;  %v3624_v60 = vld [vmem:[#allocation8 + $0x24] ss:$16 sps:$4 sm:$0xff]   ;;  %v3627_v61 = vld [vmem:[#allocation8 + $0x2c] ss:$16 sps:$4 sm:$0xff]   ;;  %v3622_v63 = vld [vmem:[#allocation8 + $0x20] ss:$16 sps:$4 sm:$0xff]  }
  0x52   :  { %v4145_v62 = vld [vmem:[#allocation2 + $0x18] sm:$0xff]   ;;  %v3635_v3 = vld [vmem:[#allocation8 + $0xc] ss:$16 sps:$4 sm:$0xff]   ;;  %v3630_v4 = vld [vmem:[#allocation8] ss:$16 sps:$4 sm:$0xff]  }
  0x53   :  { %v3625_v1 = vld [vmem:[#allocation8 + $0x28] ss:$16 sps:$4 sm:$0xff]   ;;  %v3632_v2 = vld [vmem:[#allocation8 + $0x4] ss:$16 sps:$4 sm:$0xff]   ;;  %v4151_v6 = vld [vmem:[#allocation2 + $0x20] sm:$0xff]  }
  0x54   :  { %447 = vmatpush1.bf16.msra.mxu0 %v3559_v23  ;;  %640 = vmatpush1.bf16.msra.mxu1 %v3560_v24  ;;  %v3633_v5 = vld [vmem:[#allocation8 + $0x8] ss:$16 sps:$4 sm:$0xff]   ;;  %v4163_v8 = vld [vmem:[#allocation2 + $0x30] sm:$0xff]   ;;  %v4175_v10 = vld [vmem:[#allocation2 + $0x40] sm:$0xff]  }
  0x55   :  { %448 = vmatprep.subr.bf16.mxu0 %v3561_v25  ;;  %641 = vmatprep.subr.bf16.mxu1 %v3563_v26  ;;  %v4157_v7 = vld [vmem:[#allocation2 + $0x28] sm:$0xff]   ;;  %v4169_v9 = vld [vmem:[#allocation2 + $0x38] sm:$0xff]   ;;  %v4187_v12 = vld [vmem:[#allocation2 + $0x50] sm:$0xff]  }
  0x56   :  { %v4181_v11 = vld [vmem:[#allocation2 + $0x48] sm:$0xff]   ;;  %v4193_v13 = vld [vmem:[#allocation2 + $0x58] sm:$0xff]   ;;  %v4199_v14 = vld [vmem:[#allocation2 + $0x60] sm:$0xff]  }
  0x57   :  { %v3637_v15 = vld [vmem:[#allocation10 + $0x78] sm:$0xff]   ;;  %v4205_v16 = vld [vmem:[#allocation2 + $0x68] sm:$0xff]   ;;  %v4211_v18 = vld [vmem:[#allocation2 + $0x70] sm:$0xff]  }
  0x58   :  { %449 = vmatpush1.bf16.msra.mxu0 %v3565_v27  ;;  %642 = vmatpush1.bf16.msra.mxu1 %v3566_v28  ;;  %v3639_v17 = vld [vmem:[#allocation10 + $0xf8] sm:$0xff]   ;;  %v3641_v22 = vld [vmem:[#allocation10 + $0x70] sm:$0xff]   ;;  %v3645_v26 = vld [vmem:[#allocation10 + $0x68] sm:$0xff]  }
  0x59   :  { %450 = vmatprep.subr.bf16.mxu0 %v3567_v29  ;;  %643 = vmatprep.subr.bf16.mxu1 %v3569_v30  ;;  %v4217_v19 = vld [vmem:[#allocation2 + $0x78] sm:$0xff]   ;;  %v3647_v27 = vld [vmem:[#allocation10 + $0xe8] sm:$0xff]   ;;  %v3649_v30 = vld [vmem:[#allocation10 + $0x60] sm:$0xff]  }
  0x5a   :  { %v3638_v20 = vld [vmem:[#allocation10 + $0x38] sm:$0xff]   ;;  %v3643_v23 = vld [vmem:[#allocation10 + $0xf0] sm:$0xff]   ;;  %v3646_v28 = vld [vmem:[#allocation10 + $0x28] sm:$0xff]  }
  0x5b   :  { %v3640_v21 = vld [vmem:[#allocation10 + $0xb8] sm:$0xff]   ;;  %v3642_v24 = vld [vmem:[#allocation10 + $0x30] sm:$0xff]   ;;  %v3648_v29 = vld [vmem:[#allocation10 + $0xa8] sm:$0xff]  }
  0x5c   :  { %451 = vmatpush1.bf16.msra.mxu0 %v3571_v31  ;;  %644 = vmatpush1.bf16.msra.mxu1 %v3572_v32  ;;  %v3644_v25 = vld [vmem:[#allocation10 + $0xb0] sm:$0xff]   ;;  %v3650_v31 = vld [vmem:[#allocation10 + $0x20] sm:$0xff]  }
  0x5d   :  { %1036 = vmatprep.subr.bf16.mxu0 %v3576_v33  ;;  %1229 = vmatprep.subr.bf16.mxu1 %v3579_v34  ;;  %v3651_v32 = vld [vmem:[#allocation10 + $0xe0] sm:$0xff]   ;;  %v3653_v34 = vld [vmem:[#allocation10 + $0x58] sm:$0xff]  }
  0x5e   :  { %v3652_v33 = vld [vmem:[#allocation10 + $0xa0] sm:$0xff]  }
  0x5f   :  { %469 = vmatmul.mubr.bf16.vlgmr.msra.gmra.mxu0 %v4127_v35  ;;  %662 = vmatmul.mubr.bf16.vlgmr.msra.gmra.mxu1 %v4127_v35 }
  0x60   :  { %1037 = vmatpush1.bf16.msra.mxu0 %v3574_v36  ;;  %1230 = vmatpush1.bf16.msra.mxu1 %v3577_v37  ;;  %v3655_v36 = vld [vmem:[#allocation10 + $0xd8] sm:$0xff]  }
  0x61   :  { %478 = vmatprep.mubr.bf16.mxu0 %v4062_v0  ;;  %671 = vmatprep.mubr.bf16.mxu1 %v4062_v0  ;;  %v3656_v37 = vld [vmem:[#allocation10 + $0x98] sm:$0xff]  }
  0x62   :  { %1038 = vmatprep.subr.bf16.mxu0 %v3584_v38  ;;  %1231 = vmatprep.subr.bf16.mxu1 %v3587_v39  ;;  %v3657_v38 = vld [vmem:[#allocation10 + $0x50] sm:$0xff]  }
  0x63   :  { %v3658_v39 = vld [vmem:[#allocation10 + $0x10] sm:$0xff]  }
  0x64   :  { %1039 = vmatpush1.bf16.msra.mxu0 %v3582_v40  ;;  %1232 = vmatpush1.bf16.msra.mxu1 %v3585_v41  ;;  %v3659_v40 = vld [vmem:[#allocation10 + $0xd0] sm:$0xff]  }
  0x65   :  { %1040 = vmatprep.subr.bf16.mxu0 %v3592_v42  ;;  %1233 = vmatprep.subr.bf16.mxu1 %v3595_v43  ;;  %v3660_v41 = vld [vmem:[#allocation10 + $0x90] sm:$0xff]  }
  0x67   :  { %479 = vmatmul.mubr.bf16.gmra.mxu0 %v4133_v44  ;;  %672 = vmatmul.mubr.bf16.gmra.mxu1 %v4133_v44 }
  0x68   :  { %488 = vmatprep.mubr.bf16.mxu0 %v4062_v0  ;;  %681 = vmatprep.mubr.bf16.mxu1 %v4062_v0 }
  0x69   :  { %1041 = vmatpush1.bf16.msra.mxu0 %v3590_v45  ;;  %1234 = vmatpush1.bf16.msra.mxu1 %v3593_v46 }
  0x6a   :  { %1042 = vmatprep.subr.bf16.mxu0 %v3600_v47  ;;  %1235 = vmatprep.subr.bf16.mxu1 %v3603_v48 }
  0x6d   :  { %1043 = vmatpush1.bf16.msra.mxu0 %v3598_v49  ;;  %1236 = vmatpush1.bf16.msra.mxu1 %v3601_v51 }
  0x6e   :  { %1044 = vmatprep.subr.bf16.mxu0 %v3608_v52  ;;  %1237 = vmatprep.subr.bf16.mxu1 %v3611_v53 }
  0x6f   :  { %489 = vmatmul.mubr.bf16.gmra.mxu0 %v4139_v50  ;;  %682 = vmatmul.mubr.bf16.gmra.mxu1 %v4139_v50 }
  0x70   :  { %498 = vmatprep.mubr.bf16.mxu0 %v4062_v0  ;;  %691 = vmatprep.mubr.bf16.mxu1 %v4062_v0 }
  0x71   :  { %1045 = vmatpush1.bf16.msra.mxu0 %v3606_v54  ;;  %1238 = vmatpush1.bf16.msra.mxu1 %v3609_v55 }
  0x72   :  { %1046 = vmatprep.subr.bf16.mxu0 %v3616_v56  ;;  %1239 = vmatprep.subr.bf16.mxu1 %v3619_v57 }
  0x75   :  { %1047 = vmatpush1.bf16.msra.mxu0 %v3614_v58  ;;  %1240 = vmatpush1.bf16.msra.mxu1 %v3617_v59 }
  0x76   :  { %1048 = vmatprep.subr.bf16.mxu0 %v3624_v60  ;;  %1241 = vmatprep.subr.bf16.mxu1 %v3627_v61 }
  0x77   :  { %499 = vmatmul.mubr.bf16.gmra.mxu0 %v4145_v62  ;;  %692 = vmatmul.mubr.bf16.gmra.mxu1 %v4145_v62 }
  0x78   :  { %508 = vmatprep.mubr.bf16.mxu0 %v4062_v0  ;;  %701 = vmatprep.mubr.bf16.mxu1 %v4062_v0 }
  0x79   :  { %1049 = vmatpush1.bf16.msra.mxu0 %v3622_v63  ;;  %1242 = vmatpush1.bf16.msra.mxu1 %v3625_v1 }
  0x7a   :  { %1050 = vmatprep.subr.bf16.mxu0 %v3632_v2  ;;  %1243 = vmatprep.subr.bf16.mxu1 %v3635_v3 }
  0x7d   :  { %1051 = vmatpush1.bf16.msra.mxu0 %v3630_v4  ;;  %1244 = vmatpush1.bf16.msra.mxu1 %v3633_v5  ;;  %v3661_v5 = vld [vmem:[#allocation10 + $0x48] sm:$0xff]  }
  0x7e   :  { %3290 = vmatprep.subr.bf16.mxu0 %v3637_v15  ;;  %3402 = vmatprep.subr.bf16.mxu1 %v3639_v17 }
  0x7f   :  { %509 = vmatmul.mubr.bf16.gmra.mxu0 %v4151_v6  ;;  %702 = vmatmul.mubr.bf16.gmra.mxu1 %v4151_v6 }
  0x80   :  { %518 = vmatprep.mubr.bf16.mxu0 %v4062_v0  ;;  %711 = vmatprep.mubr.bf16.mxu1 %v4062_v0 }
  0x87   :  { %519 = vmatmul.mubr.bf16.gmra.mxu0 %v4157_v7  ;;  %712 = vmatmul.mubr.bf16.gmra.mxu1 %v4157_v7 }
  0x88   :  { %528 = vmatprep.mubr.bf16.mxu0 %v4062_v0  ;;  %721 = vmatprep.mubr.bf16.mxu1 %v4062_v0 }
  0x8f   :  { %529 = vmatmul.mubr.bf16.gmra.mxu0 %v4163_v8  ;;  %722 = vmatmul.mubr.bf16.gmra.mxu1 %v4163_v8 }
  0x90   :  { %538 = vmatprep.mubr.bf16.mxu0 %v4062_v0  ;;  %731 = vmatprep.mubr.bf16.mxu1 %v4062_v0 }
  0x97   :  { %539 = vmatmul.mubr.bf16.gmra.mxu0 %v4169_v9  ;;  %732 = vmatmul.mubr.bf16.gmra.mxu1 %v4169_v9 }
  0x98   :  { %548 = vmatprep.mubr.bf16.mxu0 %v4062_v0  ;;  %741 = vmatprep.mubr.bf16.mxu1 %v4062_v0 }
  0x9f   :  { %549 = vmatmul.mubr.bf16.gmra.mxu0 %v4175_v10  ;;  %742 = vmatmul.mubr.bf16.gmra.mxu1 %v4175_v10 }
  0xa0   :  { %558 = vmatprep.mubr.bf16.mxu0 %v4062_v0  ;;  %751 = vmatprep.mubr.bf16.mxu1 %v4062_v0 }
  0xa7   :  { %559 = vmatmul.mubr.bf16.gmra.mxu0 %v4181_v11  ;;  %752 = vmatmul.mubr.bf16.gmra.mxu1 %v4181_v11 }
  0xa8   :  { %568 = vmatprep.mubr.bf16.mxu0 %v4062_v0  ;;  %761 = vmatprep.mubr.bf16.mxu1 %v4062_v0 }
  0xaf   :  { %569 = vmatmul.mubr.bf16.gmra.mxu0 %v4187_v12  ;;  %762 = vmatmul.mubr.bf16.gmra.mxu1 %v4187_v12 }
  0xb0   :  { %578 = vmatprep.mubr.bf16.mxu0 %v4062_v0  ;;  %771 = vmatprep.mubr.bf16.mxu1 %v4062_v0 }
  0xb7   :  { %579 = vmatmul.mubr.bf16.gmra.mxu0 %v4193_v13  ;;  %772 = vmatmul.mubr.bf16.gmra.mxu1 %v4193_v13 }
  0xb8   :  { %588 = vmatprep.mubr.bf16.mxu0 %v4062_v0  ;;  %781 = vmatprep.mubr.bf16.mxu1 %v4062_v0 }
  0xbf   :  { %589 = vmatmul.mubr.bf16.gmra.mxu0 %v4199_v14  ;;  %782 = vmatmul.mubr.bf16.gmra.mxu1 %v4199_v14 }
  0xc0   :  { %598 = vmatprep.mubr.bf16.mxu0 %v4062_v0  ;;  %791 = vmatprep.mubr.bf16.mxu1 %v4062_v0 }
  0xc7   :  { %599 = vmatmul.mubr.bf16.gmra.mxu0 %v4205_v16  ;;  %792 = vmatmul.mubr.bf16.gmra.mxu1 %v4205_v16 }
  0xc8   :  { %608 = vmatprep.mubr.bf16.mxu0 %v4062_v0  ;;  %801 = vmatprep.mubr.bf16.mxu1 %v4062_v0 }
  0xcf   :  { %609 = vmatmul.mubr.bf16.gmra.mxu0 %v4211_v18  ;;  %802 = vmatmul.mubr.bf16.gmra.mxu1 %v4211_v18 }
  0xd0   :  { %618 = vmatprep.mubr.bf16.mxu0 %v4062_v0  ;;  %811 = vmatprep.mubr.bf16.mxu1 %v4062_v0 }
  0xd7   :  { %619 = vmatmul.mubr.bf16.gmra.mxu0 %v4217_v19  ;;  %812 = vmatmul.mubr.bf16.gmra.mxu1 %v4217_v19 }
  0xd8   :  { %1068 = vmatprep.mubr.bf16.mxu0 %v4062_v0  ;;  %1261 = vmatprep.mubr.bf16.mxu1 %v4062_v0 }
  0xdf   :  { %1069 = vmatmul.mubr.bf16.vlgmr.msra.gmra.mxu0 %v4127_v35  ;;  %1262 = vmatmul.mubr.bf16.vlgmr.msra.gmra.mxu1 %v4127_v35  ;;  %v3654_v35 = vld [vmem:[#allocation10 + $0x18] sm:$0xff]  }
  0xe0   :  { %1078 = vmatprep.mubr.bf16.mxu0 %v4062_v0  ;;  %1271 = vmatprep.mubr.bf16.mxu1 %v4062_v0 }
  0xe1   :  { %3291 = vmatpush3.bf16.msra.mxu0 %v3638_v20  ;;  %3403 = vmatpush3.bf16.msra.mxu1 %v3640_v21 }
  0xe2   :  { %3292 = vmatprep.subr.bf16.mxu0 %v3641_v22  ;;  %3404 = vmatprep.subr.bf16.mxu1 %v3643_v23 }
  0xe5   :  { %3293 = vmatpush3.bf16.msra.mxu0 %v3642_v24  ;;  %3405 = vmatpush3.bf16.msra.mxu1 %v3644_v25  ;;  %v3665_v25 = vld [vmem:[#allocation10 + $0x40] sm:$0xff]  }
  0xe6   :  { %3294 = vmatprep.subr.bf16.mxu0 %v3645_v26  ;;  %3406 = vmatprep.subr.bf16.mxu1 %v3647_v27  ;;  %v3666_v26 = vld [vmem:[#allocation10] sm:$0xff]  }
  0xe7   :  { %1079 = vmatmul.mubr.bf16.gmra.mxu0 %v4133_v44  ;;  %1272 = vmatmul.mubr.bf16.gmra.mxu1 %v4133_v44 }
  0xe8   :  { %1088 = vmatprep.mubr.bf16.mxu0 %v4062_v0  ;;  %1281 = vmatprep.mubr.bf16.mxu1 %v4062_v0 }
  0xe9   :  { %3295 = vmatpush3.bf16.msra.mxu0 %v3646_v28  ;;  %3407 = vmatpush3.bf16.msra.mxu1 %v3648_v29 }
  0xea   :  { %3296 = vmatprep.subr.bf16.mxu0 %v3649_v30  ;;  %3408 = vmatprep.subr.bf16.mxu1 %v3651_v32 }
  0xed   :  { %3297 = vmatpush3.bf16.msra.mxu0 %v3650_v31  ;;  %3409 = vmatpush3.bf16.msra.mxu1 %v3652_v33  ;;  %v3668_v31 = vld [vmem:[#allocation10 + $0x80] sm:$0xff]  }
  0xee   :  { %3298 = vmatprep.subr.bf16.mxu0 %v3653_v34  ;;  %3410 = vmatprep.subr.bf16.mxu1 %v3655_v36 }
  0xef   :  { %1089 = vmatmul.mubr.bf16.gmra.mxu0 %v4139_v50  ;;  %1282 = vmatmul.mubr.bf16.gmra.mxu1 %v4139_v50 }
  0xf0   :  { %1098 = vmatprep.mubr.bf16.mxu0 %v4062_v0  ;;  %1291 = vmatprep.mubr.bf16.mxu1 %v4062_v0 }
  0xf1   :  { %3299 = vmatpush3.bf16.msra.mxu0 %v3654_v35  ;;  %3411 = vmatpush3.bf16.msra.mxu1 %v3656_v37 }
  0xf2   :  { %3300 = vmatprep.subr.bf16.mxu0 %v3657_v38  ;;  %3412 = vmatprep.subr.bf16.mxu1 %v3659_v40 }
  0xf5   :  { %3301 = vmatpush3.bf16.msra.mxu0 %v3658_v39  ;;  %3413 = vmatpush3.bf16.msra.mxu1 %v3660_v41 }
  0xf6   :  { %3302 = vmatprep.subr.bf16.mxu0 %v3661_v5 }
  0xf7   :  { %1099 = vmatmul.mubr.bf16.gmra.mxu0 %v4145_v62  ;;  %1292 = vmatmul.mubr.bf16.gmra.mxu1 %v4145_v62 }
  0xf8   :  { %1108 = vmatprep.mubr.bf16.mxu0 %v4062_v0  ;;  %1301 = vmatprep.mubr.bf16.mxu1 %v4062_v0 }
  0xff   :  { %1109 = vmatmul.mubr.bf16.gmra.mxu0 %v4151_v6  ;;  %1302 = vmatmul.mubr.bf16.gmra.mxu1 %v4151_v6  ;;  %v3662_v6 = vld [vmem:[#allocation10 + $0x8] sm:$0xff]  }
 0x100   :  { %1118 = vmatprep.mubr.bf16.mxu0 %v4062_v0  ;;  %1311 = vmatprep.mubr.bf16.mxu1 %v4062_v0 }
 0x101   :  { %3303 = vmatpush3.bf16.msra.mxu0 %v3662_v6 }
 0x102   :  { %3304 = vmatprep.subr.bf16.mxu0 %v3665_v25 }
 0x105   :  { %3305 = vmatpush3.bf16.msra.mxu0 %v3666_v26 }
 0x107   :  { %1119 = vmatmul.mubr.bf16.gmra.mxu0 %v4157_v7  ;;  %1312 = vmatmul.mubr.bf16.gmra.mxu1 %v4157_v7 }
 0x108   :  { %1128 = vmatprep.mubr.bf16.mxu0 %v4062_v0  ;;  %1321 = vmatprep.mubr.bf16.mxu1 %v4062_v0 }
 0x10f   :  { %1129 = vmatmul.mubr.bf16.gmra.mxu0 %v4163_v8  ;;  %1322 = vmatmul.mubr.bf16.gmra.mxu1 %v4163_v8 }
 0x110   :  { %1138 = vmatprep.mubr.bf16.mxu0 %v4062_v0  ;;  %1331 = vmatprep.mubr.bf16.mxu1 %v4062_v0 }
 0x117   :  { %1139 = vmatmul.mubr.bf16.gmra.mxu0 %v4169_v9  ;;  %1332 = vmatmul.mubr.bf16.gmra.mxu1 %v4169_v9  ;;  %v3663_v9 = vld [vmem:[#allocation10 + $0xc8] sm:$0xff]  }
 0x118   :  { %1148 = vmatprep.mubr.bf16.mxu0 %v4062_v0  ;;  %1341 = vmatprep.mubr.bf16.mxu1 %v4062_v0 }
 0x119   :  { %3414 = vmatprep.subr.bf16.mxu1 %v3663_v9 }
 0x11f   :  { %v4255_v42 = vpop.f32.mrf.mxu0  ;;  %v4257_v43 = vpop.f32.mrf.mxu1  ;;  %1149 = vmatmul.mubr.bf16.gmra.mxu0 %v4175_v10  ;;  %1342 = vmatmul.mubr.bf16.gmra.mxu1 %v4175_v10  ;;  %v3664_v10 = vld [vmem:[#allocation10 + $0x88] sm:$0xff]  }
 0x120   :  { %1158 = vmatprep.mubr.bf16.mxu0 %v4062_v0  ;;  %1351 = vmatprep.mubr.bf16.mxu1 %v4062_v0 }
 0x121   :  { %v4263_v44 = vpop.f32.mrf.mxu0  ;;  %v4265_v45 = vpop.f32.mrf.mxu1  ;;  %3415 = vmatpush3.bf16.msra.mxu1 %v3664_v10 }
 0x123   :  { %v4267_v46 = vpop.f32.mrf.mxu0  ;;  %v4269_v47 = vpop.f32.mrf.mxu1 }
 0x125   :  { %v4271_v48 = vpop.f32.mrf.mxu0  ;;  %v4273_v49 = vpop.f32.mrf.mxu1 }
 0x127   :  { %v4275_v50 = vpop.f32.mrf.mxu0  ;;  %v4277_v51 = vpop.f32.mrf.mxu1  ;;  %1159 = vmatmul.mubr.bf16.gmra.mxu0 %v4181_v11  ;;  %1352 = vmatmul.mubr.bf16.gmra.mxu1 %v4181_v11 }
 0x128   :  { %1168 = vmatprep.mubr.bf16.mxu0 %v4062_v0  ;;  %1361 = vmatprep.mubr.bf16.mxu1 %v4062_v0 }
 0x129   :  { %v4283_v52 = vpop.f32.mrf.mxu0  ;;  %v4285_v53 = vpop.f32.mrf.mxu1 }
 0x12b   :  { %v4287_v54 = vpop.f32.mrf.mxu0  ;;  %v4289_v55 = vpop.f32.mrf.mxu1 }
 0x12d   :  { %v4291_v56 = vpop.f32.mrf.mxu0  ;;  %v4293_v57 = vpop.f32.mrf.mxu1 }
 0x12f   :  { %v4295_v58 = vpop.f32.mrf.mxu0  ;;  %v4297_v59 = vpop.f32.mrf.mxu1  ;;  %1169 = vmatmul.mubr.bf16.gmra.mxu0 %v4187_v12  ;;  %1362 = vmatmul.mubr.bf16.gmra.mxu1 %v4187_v12 }
 0x130   :  { %1178 = vmatprep.mubr.bf16.mxu0 %v4062_v0  ;;  %1371 = vmatprep.mubr.bf16.mxu1 %v4062_v0 }
 0x131   :  { %v4303_v60 = vpop.f32.mrf.mxu0  ;;  %v4305_v61 = vpop.f32.mrf.mxu1 }
 0x133   :  { %v4307_v62 = vpop.f32.mrf.mxu0  ;;  %v4309_v63 = vpop.f32.mrf.mxu1 }
 0x135   :  { %v4311_v1 = vpop.f32.mrf.mxu0  ;;  %v4313_v2 = vpop.f32.mrf.mxu1 }
 0x137   :  { %v4315_v3 = vpop.f32.mrf.mxu0  ;;  %v4317_v4 = vpop.f32.mrf.mxu1  ;;  %1179 = vmatmul.mubr.bf16.gmra.mxu0 %v4193_v13  ;;  %1372 = vmatmul.mubr.bf16.gmra.mxu1 %v4193_v13 }
 0x138   :  { %1188 = vmatprep.mubr.bf16.mxu0 %v4062_v0  ;;  %1381 = vmatprep.mubr.bf16.mxu1 %v4062_v0 }
 0x139   :  { %v4323_v7 = vpop.f32.mrf.mxu0  ;;  %v4325_v8 = vpop.f32.mrf.mxu1 }
 0x13b   :  { %v4327_v11 = vpop.f32.mrf.mxu0  ;;  %v4329_v12 = vpop.f32.mrf.mxu1 }
 0x13d   :  { %v4331_v13 = vpop.f32.mrf.mxu0  ;;  %v4333_v15 = vpop.f32.mrf.mxu1 }
 0x13f   :  { %v4335_v17 = vpop.f32.mrf.mxu0  ;;  %v4337_v20 = vpop.f32.mrf.mxu1  ;;  %1189 = vmatmul.mubr.bf16.gmra.mxu0 %v4199_v14  ;;  %1382 = vmatmul.mubr.bf16.gmra.mxu1 %v4199_v14  ;;  %v3667_v14 = vld [vmem:[#allocation10 + $0xc0] sm:$0xff]  }
 0x140   :  { %1198 = vmatprep.mubr.bf16.mxu0 %v4062_v0  ;;  %1391 = vmatprep.mubr.bf16.mxu1 %v4062_v0 }
 0x141   :  { %v4343_v21 = vpop.f32.mrf.mxu0  ;;  %v4345_v22 = vpop.f32.mrf.mxu1  ;;  %3416 = vmatprep.subr.bf16.mxu1 %v3667_v14 }
 0x142   :  { %3417 = vmatpush3.bf16.msra.mxu1 %v3668_v31 }
 0x143   :  { %v4347_v23 = vpop.f32.mrf.mxu0  ;;  %v4349_v24 = vpop.f32.mrf.mxu1 }
 0x145   :  { %v4351_v27 = vpop.f32.mrf.mxu0  ;;  %v4353_v28 = vpop.f32.mrf.mxu1 }
 0x147   :  { %v4355_v29 = vpop.f32.mrf.mxu0  ;;  %v4357_v30 = vpop.f32.mrf.mxu1  ;;  %1199 = vmatmul.mubr.bf16.gmra.mxu0 %v4205_v16  ;;  %1392 = vmatmul.mubr.bf16.gmra.mxu1 %v4205_v16 }
 0x148   :  { %1208 = vmatprep.mubr.bf16.mxu0 %v4062_v0  ;;  %1401 = vmatprep.mubr.bf16.mxu1 %v4062_v0 }
 0x149   :  { %v4363_v32 = vpop.f32.mrf.mxu0  ;;  %v4365_v33 = vpop.f32.mrf.mxu1 }
 0x14b   :  { %v4367_v34 = vpop.f32.mrf.mxu0  ;;  %v4369_v35 = vpop.f32.mrf.mxu1 }
 0x14d   :  { %v4371_v36 = vpop.f32.mrf.mxu0  ;;  %v4373_v37 = vpop.f32.mrf.mxu1 }
 0x14e   :  { %6300 = vst [vmem:[#allocation16_spill] sm:$0xff] %v4373_v37 }
 0x14f   :  { %v4375_v16 = vpop.f32.mrf.mxu0  ;;  %v4377_v38 = vpop.f32.mrf.mxu1  ;;  %1209 = vmatmul.mubr.bf16.gmra.mxu0 %v4211_v18  ;;  %1402 = vmatmul.mubr.bf16.gmra.mxu1 %v4211_v18 }
 0x150   :  { %6301 = vst [vmem:[#allocation17_spill] sm:$0xff] %v4375_v16  ;;  %6302 = vst [vmem:[#allocation18_spill] sm:$0xff] %v4377_v38  ;;  %1218 = vmatprep.mubr.bf16.mxu0 %v4062_v0  ;;  %1411 = vmatprep.mubr.bf16.mxu1 %v4062_v0 }
 0x151   :  { %v4383_v39 = vpop.f32.mrf.mxu0  ;;  %v4385_v40 = vpop.f32.mrf.mxu1 }
 0x152   :  { %6303 = vst [vmem:[#allocation19_spill] sm:$0xff] %v4383_v39  ;;  %6304 = vst [vmem:[#allocation20_spill] sm:$0xff] %v4385_v40 }
 0x153   :  { %v4387_v41 = vpop.f32.mrf.mxu0  ;;  %v4389_v5 = vpop.f32.mrf.mxu1 }
 0x154   :  { %6305 = vst [vmem:[#allocation21_spill] sm:$0xff] %v4387_v41  ;;  %6306 = vst [vmem:[#allocation22_spill] sm:$0xff] %v4389_v5 }
 0x155   :  { %v4391_v6 = vpop.f32.mrf.mxu0  ;;  %v4393_v9 = vpop.f32.mrf.mxu1 }
 0x156   :  { %6307 = vst [vmem:[#allocation23_spill] sm:$0xff] %v4391_v6  ;;  %6308 = vst [vmem:[#allocation24_spill] sm:$0xff] %v4393_v9 }
 0x157   :  { %v4395_v10 = vpop.f32.mrf.mxu0  ;;  %v4397_v25 = vpop.f32.mrf.mxu1  ;;  %1219 = vmatmul.mubr.bf16.gmra.mxu0 %v4217_v19  ;;  %1412 = vmatmul.mubr.bf16.gmra.mxu1 %v4217_v19 }
 0x158   :  { %6309 = vst [vmem:[#allocation25_spill] sm:$0xff] %v4395_v10  ;;  %6310 = vst [vmem:[#allocation26_spill] sm:$0xff] %v4397_v25 }
 0x159   :  { %v4401_v0 = vpop.f32.mrf.mxu0  ;;  %v4403_v18 = vpop.f32.mrf.mxu1 }
 0x15a   :  { %6311 = vst [vmem:[#allocation27_spill] sm:$0xff] %v4401_v0  ;;  %6312 = vst [vmem:[#allocation28_spill] sm:$0xff] %v4403_v18 }
 0x15b   :  { %v4405_v26 = vpop.f32.mrf.mxu0  ;;  %v4407_v14 = vpop.f32.mrf.mxu1 }
 0x15c   :  { %6313 = vst [vmem:[#allocation29_spill] sm:$0xff] %v4405_v26  ;;  %6314 = vst [vmem:[#allocation30_spill] sm:$0xff] %v4407_v14 }
 0x15d   :  { %v4409_v31 = vpop.f32.mrf.mxu0  ;;  %v4411_v6 = vpop.f32.mrf.mxu1 }
 0x15e   :  { %6315 = vst [vmem:[#allocation31_spill] sm:$0xff] %v4409_v31  ;;  %6316 = vst [vmem:[#allocation32_spill] sm:$0xff] %v4411_v6 }
 0x15f   :  { %v4413_v9 = vpop.f32.mrf.mxu0  ;;  %v4415_v10 = vpop.f32.mrf.mxu1 }
 0x160   :  { %6317 = vst [vmem:[#allocation33_spill] sm:$0xff] %v4413_v9  ;;  %6318 = vst [vmem:[#allocation34_spill] sm:$0xff] %v4415_v10 }
 0x161   :  { %v4417_v25 = vpop.f32.mrf.mxu0  ;;  %v4419_v5 = vpop.f32.mrf.mxu1 }
 0x162   :  { %6319 = vst [vmem:[#allocation35_spill] sm:$0xff] %v4417_v25  ;;  %6320 = vst [vmem:[#allocation36_spill] sm:$0xff] %v4419_v5 }
 0x163   :  { %v4421_v19 = vpop.f32.mrf.mxu0  ;;  %v4423_v0 = vpop.f32.mrf.mxu1 }
 0x164   :  { %6321 = vst [vmem:[#allocation37_spill] sm:$0xff] %v4421_v19  ;;  %6322 = vst [vmem:[#allocation38_spill] sm:$0xff] %v4423_v0 }
 0x165   :  { %v4425_v18 = vpop.f32.mrf.mxu0  ;;  %v4427_v26 = vpop.f32.mrf.mxu1 }
 0x166   :  { %6323 = vst [vmem:[#allocation39_spill] sm:$0xff] %v4425_v18  ;;  %6324 = vst [vmem:[#allocation40_spill] sm:$0xff] %v4427_v26 }
 0x167   :  { %v4429_v14 = vpop.f32.mrf.mxu0  ;;  %v4431_v31 = vpop.f32.mrf.mxu1 }
 0x168   :  { %6325 = vst [vmem:[#allocation41_spill] sm:$0xff] %v4429_v14  ;;  %6326 = vst [vmem:[#allocation42_spill] sm:$0xff] %v4431_v31 }
 0x169   :  { %v4433_v6 = vpop.f32.mrf.mxu0  ;;  %v4435_v9 = vpop.f32.mrf.mxu1 }
 0x16a   :  { %6327 = vst [vmem:[#allocation43_spill] sm:$0xff] %v4433_v6  ;;  %6328 = vst [vmem:[#allocation44_spill] sm:$0xff] %v4435_v9 }
 0x16b   :  { %v4437_v10 = vpop.f32.mrf.mxu0  ;;  %v4439_v25 = vpop.f32.mrf.mxu1 }
 0x16c   :  { %6329 = vst [vmem:[#allocation45_spill] sm:$0xff] %v4437_v10  ;;  %6330 = vst [vmem:[#allocation46_spill] sm:$0xff] %v4439_v25  ;;  %v160_v25 = vlaneseq }
 0x16d   :  { %v4441_v5 = vpop.f32.mrf.mxu0  ;;  %v4443_v19 = vpop.f32.mrf.mxu1 }
 0x16e   :  { %6331 = vst [vmem:[#allocation47_spill] sm:$0xff] %v4441_v5  ;;  %6332 = vst [vmem:[#allocation48_spill] sm:$0xff] %v4443_v19 }
 0x16f   :  { %v4445_v0 = vpop.f32.mrf.mxu0  ;;  %v4447_v18 = vpop.f32.mrf.mxu1 }
 0x170   :  { %6333 = vst [vmem:[#allocation49_spill] sm:$0xff] %v4445_v0  ;;  %6334 = vst [vmem:[#allocation50_spill] sm:$0xff] %v4447_v18 }
 0x171   :  { %v4449_v26 = vpop.f32.mrf.mxu0  ;;  %v4451_v14 = vpop.f32.mrf.mxu1 }
 0x172   :  { %6335 = vst [vmem:[#allocation51_spill] sm:$0xff] %v4449_v26  ;;  %6336 = vst [vmem:[#allocation52_spill] sm:$0xff] %v4451_v14  ;;  %v161_v26 = vshrl.u32 %v160_v25, 7 }
 0x173   :  { %v4453_v31 = vpop.f32.mrf.mxu0  ;;  %v4455_v6 = vpop.f32.mrf.mxu1 }
 0x174   :  { %6337 = vst [vmem:[#allocation53_spill] sm:$0xff] %v4453_v31  ;;  %6338 = vst [vmem:[#allocation54_spill] sm:$0xff] %v4455_v6  ;;  %v166_v39 = vsub.s32 1, %v161_v26 }
 0x175   :  { %v4457_v9 = vpop.f32.mrf.mxu0  ;;  %v4459_v10 = vpop.f32.mrf.mxu1 }
 0x176   :  { %6339 = vst [vmem:[#allocation55_spill] sm:$0xff] %v4457_v9  ;;  %6340 = vst [vmem:[#allocation56_spill] sm:$0xff] %v4459_v10  ;;  %v162_v9 = vsub.s32 0, %v161_v26  ;;  %v170_v10 = vsub.s32 2, %v161_v26 }
 0x177   :  { %v4461_v5 = vpop.f32.mrf.mxu0  ;;  %v4463_v19 = vpop.f32.mrf.mxu1 }
 0x178   :  { %6341 = vst [vmem:[#allocation57_spill] sm:$0xff] %v4461_v5  ;;  %6342 = vst [vmem:[#allocation58_spill] sm:$0xff] %v4463_v19  ;;  %v158_v19 = vld [vmem:[#allocation7] sm:$0xf] }
 0x179   :  { %v4465_v0 = vpop.f32.mrf.mxu0  ;;  %v4467_v18 = vpop.f32.mrf.mxu1 }
 0x17a   :  { %6343 = vst [vmem:[#allocation59_spill] sm:$0xff] %v4465_v0  ;;  %6344 = vst [vmem:[#allocation60_spill] sm:$0xff] %v4467_v18  ;;  %v174_v0 = vsub.s32 3, %v161_v26  ;;  %v4493_v18 = vrot.slane %v158_v19, %v166_v39  ;;  %v854_v26 = vld [vmem:[%s6287_s4] sm:$0xf] }
 0x17b   :  { %v4469_v41 = vpop.f32.mrf.mxu0  ;;  %v4471_v14 = vpop.f32.mrf.mxu1  ;;  %v4516_v16 = vrot.slane %v854_v26, %v162_v9  ;;  %v4518_v37 = vrot.slane %v854_v26, %v170_v10 }
 0x17c   :  { %6345 = vst [vmem:[#allocation61_spill] sm:$0xff] %v4469_v41  ;;  %6346 = vst [vmem:[#allocation62_spill] sm:$0xff] %v4471_v14  ;;  %v4485_v41 = vrot.slane %v158_v19, %v162_v9  ;;  %v4487_v14 = vrot.slane %v158_v19, %v170_v10 }
 0x17d   :  { %v4473_v31 = vpop.f32.mrf.mxu0  ;;  %v4475_v6 = vpop.f32.mrf.mxu1  ;;  %6357 = vst [vmem:[#allocation73_spill] sm:$0xff] %v4493_v18 }
 0x17e   :  { %6347 = vst [vmem:[#allocation63_spill] sm:$0xff] %v4473_v31  ;;  %6348 = vst [vmem:[#allocation64_spill] sm:$0xff] %v4475_v6  ;;  %v4538_v9 = vadd.f32 %v4269_v47, %v4487_v14  ;;  %v4558_v47 = vadd.f32 %v4277_v51, %v4487_v14  ;;  %v4578_v51 = vadd.f32 %v4291_v56, %v4493_v18 }
 0x17f   :  { %v4477_v40 = vpop.f32.mrf.mxu0  ;;  %v4479_v5 = vpop.f32.mrf.mxu1  ;;  %6353 = vst [vmem:[#allocation69_spill] sm:$0xff] %v4485_v41  ;;  %6354 = vst [vmem:[#allocation70_spill] sm:$0xff] %v4487_v14  ;;  %v4598_v56 = vadd.f32 %v4303_v60, %v4493_v18 }
 0x180   :  { %6349 = vst [vmem:[#allocation65_spill] sm:$0xff] %v4477_v40  ;;  %6350 = vst [vmem:[#allocation66_spill] sm:$0xff] %v4479_v5  ;;  %v4495_v40 = vrot.slane %v158_v19, %v174_v0 }
 0x181   :  { %v4481_v38 = vpop.f32.mrf.mxu0  ;;  %v4483_v25 = vpop.f32.mrf.mxu1  ;;  %6367 = vst [vmem:[#allocation83_spill] sm:$0xff] %v4578_v51  ;;  %6369 = vst [vmem:[#allocation85_spill] sm:$0xff] %v4598_v56 }
 0x182   :  { %6351 = vst [vmem:[#allocation67_spill] sm:$0xff] %v4481_v38  ;;  %6352 = vst [vmem:[#allocation68_spill] sm:$0xff] %v4483_v25  ;;  %v4506_v25 = vadd.f32 %v4255_v42, %v4485_v41  ;;  %v4526_v42 = vadd.f32 %v4265_v45, %v4495_v40  ;;  %v4546_v45 = vadd.f32 %v4273_v49, %v4495_v40 }
 0x183   :  { %v4489_v31 = vpop.f32.mrf.mxu0  ;;  %v4491_v6 = vpop.f32.mrf.mxu1  ;;  %6358 = vst [vmem:[#allocation74_spill] sm:$0xff] %v4495_v40  ;;  %v4566_v49 = vadd.f32 %v4285_v53, %v4495_v40  ;;  %v4618_v60 = vadd.f32 %v4313_v2, %v4495_v40  ;;  %v4638_v2 = vadd.f32 %v4325_v8, %v4495_v40 }
 0x184   :  { %6355 = vst [vmem:[#allocation71_spill] sm:$0xff] %v4489_v31  ;;  %6356 = vst [vmem:[#allocation72_spill] sm:$0xff] %v4491_v6  ;;  %v4510_v31 = vadd.f32 %v4257_v43, %v4487_v14  ;;  %v4530_v43 = vrot.slane %v854_v26, %v174_v0  ;;  %v4570_v0 = vadd.f32 %v4287_v54, %v4485_v41 }
 0x185   :  { %v4500_v5 = vpop.f32.mrf.mxu0  ;;  %v4502_v38 = vpop.f32.mrf.mxu1  ;;  %6360 = vst [vmem:[#allocation76_spill] sm:$0xff] %v4506_v25  ;;  %6362 = vst [vmem:[#allocation78_spill] sm:$0xff] %v4526_v42  ;;  %v4528_v25 = vrot.slane %v854_v26, %v166_v39  ;;  %v4590_v54 = vadd.f32 %v4295_v58, %v4485_v41  ;;  %v4610_v58 = vadd.f32 %v4309_v63, %v4487_v14 }
 0x186   :  { %6359 = vst [vmem:[#allocation75_spill] sm:$0xff] %v4500_v5  ;;  %6361 = vst [vmem:[#allocation77_spill] sm:$0xff] %v4510_v31  ;;  %v4522_v5 = vadd.f32 %v4263_v44, %v4493_v18  ;;  %v4534_v31 = vadd.f32 %v4267_v46, %v4485_v41  ;;  %v4542_v44 = vadd.f32 %v4271_v48, %v4493_v18 }
 0x187   :  { %v4512_v6 = vpop.f32.mrf.mxu0  ;;  %v4514_v19 = vpop.f32.mrf.mxu1  ;;  %6364 = vst [vmem:[#allocation80_spill] sm:$0xff] %v4546_v45  ;;  %v4554_v46 = vadd.f32 %v4275_v50, %v4485_v41  ;;  %v4562_v48 = vadd.f32 %v4283_v52, %v4493_v18  ;;  %6366 = vst [vmem:[#allocation82_spill] sm:$0xff] %v4566_v49  ;;  %v4574_v50 = vadd.f32 %v4289_v55, %v4487_v14 }
 0x188   :  { %6363 = vst [vmem:[#allocation79_spill] sm:$0xff] %v4542_v44  ;;  %v4582_v52 = vadd.f32 %v4293_v57, %v4495_v40  ;;  %v4594_v55 = vadd.f32 %v4297_v59, %v4487_v14  ;;  %v4602_v57 = vadd.f32 %v4305_v61, %v4495_v40  ;;  %6372 = vst [vmem:[#allocation88_spill] sm:$0xff] %v4610_v58 }
 0x189   :  { %v4548_v39 = vpop.f32.mrf.mxu0  ;;  %v4550_v10 = vpop.f32.mrf.mxu1  ;;  %6365 = vst [vmem:[#allocation81_spill] sm:$0xff] %v4562_v48  ;;  %v4614_v59 = vadd.f32 %v4311_v1, %v4493_v18  ;;  %6374 = vst [vmem:[#allocation90_spill] sm:$0xff] %v4618_v60  ;;  %v4630_v63 = vadd.f32 %v4317_v4, %v4487_v14  ;;  %v4634_v1 = vadd.f32 %v4323_v7, %v4493_v18 }
 0x18a   :  { %6368 = vst [vmem:[#allocation84_spill] sm:$0xff] %v4582_v52  ;;  %6370 = vst [vmem:[#allocation86_spill] sm:$0xff] %v4602_v57  ;;  %v4606_v52 = vadd.f32 %v4307_v62, %v4485_v41  ;;  %v4626_v62 = vadd.f32 %v4315_v3, %v4485_v41  ;;  %v4642_v60 = vadd.f32 %v4327_v11, %v4485_v41 }
 0x18b   :  { %v4584_v26 = vpop.f32.mrf.mxu0  ;;  %v4586_v53 = vpop.f32.mrf.mxu1  ;;  %6373 = vst [vmem:[#allocation89_spill] sm:$0xff] %v4614_v59  ;;  %6376 = vst [vmem:[#allocation92_spill] sm:$0xff] %v4630_v63  ;;  %v4646_v3 = vadd.f32 %v4329_v12, %v4487_v14  ;;  %v4650_v4 = vadd.f32 %v4331_v13, %v4493_v18  ;;  %v4654_v7 = vadd.f32 %v4333_v15, %v4495_v40 }
 0x18c   :  { %6371 = vst [vmem:[#allocation87_spill] sm:$0xff] %v4606_v52  ;;  %6375 = vst [vmem:[#allocation91_spill] sm:$0xff] %v4626_v62  ;;  %v4662_v11 = vadd.f32 %v4335_v17, %v4485_v41  ;;  %v4666_v12 = vadd.f32 %v4337_v20, %v4487_v14  ;;  %v4670_v13 = vadd.f32 %v4343_v21, %v4493_v18 }
 0x18d   :  { %v4620_v56 = vpop.f32.mrf.mxu0  ;;  %v4622_v61 = vpop.f32.mrf.mxu1  ;;  %6377 = vst [vmem:[#allocation93_spill] sm:$0xff] %v4634_v1  ;;  %6378 = vst [vmem:[#allocation94_spill] sm:$0xff] %v4638_v2  ;;  %v4674_v15 = vadd.f32 %v4345_v22, %v4495_v40  ;;  %v4682_v17 = vadd.f32 %v4349_v24, %v4487_v14  ;;  %v4686_v20 = vadd.f32 %v4351_v27, %v4493_v18  ;;  %v6410_v2 = vld [vmem:[#allocation22_spill] sm:$0xff] }
 0x18e   :  { %6379 = vst [vmem:[#allocation95_spill] sm:$0xff] %v4642_v60  ;;  %6380 = vst [vmem:[#allocation96_spill] sm:$0xff] %v4646_v3  ;;  %v4690_v21 = vadd.f32 %v4353_v28, %v4495_v40  ;;  %v4702_v24 = vadd.f32 %v4357_v30, %v4487_v14  ;;  %v4706_v27 = vadd.f32 %v4363_v32, %v4493_v18 }
 0x18f   :  { %6381 = vst [vmem:[#allocation97_spill] sm:$0xff] %v4650_v4  ;;  %6382 = vst [vmem:[#allocation98_spill] sm:$0xff] %v4654_v7  ;;  %v4656_v1 = vpop.f32.mrf.mxu0  ;;  %v4658_v8 = vpop.f32.mrf.mxu1  ;;  %v4678_v7 = vadd.f32 %v4347_v23, %v4485_v41  ;;  %v4698_v23 = vadd.f32 %v4355_v29, %v4485_v41  ;;  %v4710_v28 = vadd.f32 %v4365_v33, %v4495_v40 }
 0x190   :  { %6383 = vst [vmem:[#allocation99_spill] sm:$0xff] %v4662_v11  ;;  %6384 = vst [vmem:[#allocation100_spill] sm:$0xff] %v4666_v12  ;;  %v4718_v29 = vadd.f32 %v4369_v35, %v4487_v14  ;;  %v4722_v30 = vadd.f32 %v4371_v36, %v4493_v18 }
 0x191   :  { %6385 = vst [vmem:[#allocation101_spill] sm:$0xff] %v4670_v13  ;;  %6386 = vst [vmem:[#allocation102_spill] sm:$0xff] %v4674_v15  ;;  %v4692_v13 = vpop.f32.mrf.mxu0  ;;  %v4694_v22 = vpop.f32.mrf.mxu1  ;;  %v6398_v15 = vld [vmem:[#allocation16_spill] sm:$0xff] }
 0x192   :  { %6387 = vst [vmem:[#allocation103_spill] sm:$0xff] %v4678_v7  ;;  %6388 = vst [vmem:[#allocation104_spill] sm:$0xff] %v4682_v17  ;;  %v4726_v32 = vadd.f32 %v6398_v15, %v4495_v40 }
 0x193   :  { %6389 = vst [vmem:[#allocation105_spill] sm:$0xff] %v4686_v20  ;;  %6390 = vst [vmem:[#allocation106_spill] sm:$0xff] %v4690_v21  ;;  %v4714_v21 = vadd.f32 %v4367_v34, %v4485_v41  ;;  %v4730_v33 = vpop.f32.mrf.mxu1  ;;  %v6402_v20 = vld [vmem:[#allocation18_spill] sm:$0xff] }
 0x194   :  { %6391 = vst [vmem:[#allocation107_spill] sm:$0xff] %v4698_v23  ;;  %6392 = vst [vmem:[#allocation108_spill] sm:$0xff] %v4702_v24  ;;  %v4738_v35 = vadd.f32 %v6402_v20, %v4487_v14  ;;  %v6426_v24 = vld [vmem:[#allocation30_spill] sm:$0xff] }
 0x195   :  { %6393 = vst [vmem:[#allocation109_spill] sm:$0xff] %v4706_v27  ;;  %6394 = vst [vmem:[#allocation110_spill] sm:$0xff] %v4710_v28  ;;  %v4728_v27 = vpop.f32.mrf.mxu0  ;;  %v6400_v28 = vld [vmem:[#allocation17_spill] sm:$0xff] }
 0x196   :  { %6395 = vst [vmem:[#allocation111_spill] sm:$0xff] %v4714_v21  ;;  %6396 = vst [vmem:[#allocation112_spill] sm:$0xff] %v4718_v29  ;;  %v4734_v34 = vadd.f32 %v6400_v28, %v4485_v41  ;;  %v6404_v29 = vld [vmem:[#allocation19_spill] sm:$0xff]  ;;  %v4754_v28 = vadd.f32 %v6410_v2, %v4487_v14 }
 0x197   :  { %6397 = vst [vmem:[#allocation113_spill] sm:$0xff] %v4722_v30  ;;  %6399 = vst [vmem:[#allocation16_spill] sm:$0xff] %v4726_v32  ;;  %v4742_v36 = vadd.f32 %v6404_v29, %v4493_v18  ;;  %v6406_v30 = vld [vmem:[#allocation20_spill] sm:$0xff]  ;;  %v6408_v32 = vld [vmem:[#allocation21_spill] sm:$0xff] }
 0x198   :  { %6401 = vst [vmem:[#allocation17_spill] sm:$0xff] %v4734_v34  ;;  %6403 = vst [vmem:[#allocation18_spill] sm:$0xff] %v4738_v35  ;;  %v4746_v15 = vadd.f32 %v6406_v30, %v4495_v40  ;;  %v4750_v21 = vadd.f32 %v6408_v32, %v4485_v41  ;;  %v6412_v34 = vld [vmem:[#allocation23_spill] sm:$0xff]  ;;  %v6414_v35 = vld [vmem:[#allocation24_spill] sm:$0xff]  ;;  %v4766_v30 = vpop.f32.mrf.mxu1 }
 0x199   :  { %6405 = vst [vmem:[#allocation19_spill] sm:$0xff] %v4742_v36  ;;  %6411 = vst [vmem:[#allocation22_spill] sm:$0xff] %v4754_v28  ;;  %v4758_v20 = vadd.f32 %v6412_v34, %v4493_v18  ;;  %v4762_v29 = vadd.f32 %v6414_v35, %v4495_v40  ;;  %v4764_v36 = vpop.f32.mrf.mxu0  ;;  %v6420_v28 = vld [vmem:[#allocation27_spill] sm:$0xff] }
 0x19a   :  { %6407 = vst [vmem:[#allocation20_spill] sm:$0xff] %v4746_v15  ;;  %6409 = vst [vmem:[#allocation21_spill] sm:$0xff] %v4750_v21  ;;  %v6416_v15 = vld [vmem:[#allocation25_spill] sm:$0xff]  ;;  %v6418_v21 = vld [vmem:[#allocation26_spill] sm:$0xff]  ;;  %v4778_v34 = vadd.f32 %v6420_v28, %v4493_v18 }
 0x19b   :  { %6413 = vst [vmem:[#allocation23_spill] sm:$0xff] %v4758_v20  ;;  %6415 = vst [vmem:[#allocation24_spill] sm:$0xff] %v4762_v29  ;;  %v4770_v32 = vadd.f32 %v6416_v15, %v4485_v41  ;;  %v4774_v2 = vadd.f32 %v6418_v21, %v4487_v14  ;;  %v6422_v20 = vld [vmem:[#allocation28_spill] sm:$0xff]  ;;  %v6424_v29 = vld [vmem:[#allocation29_spill] sm:$0xff]  ;;  %v4790_v15 = vadd.f32 %v6426_v24, %v4487_v14 }
 0x19c   :  { %6421 = vst [vmem:[#allocation27_spill] sm:$0xff] %v4778_v34  ;;  %v4782_v35 = vadd.f32 %v6422_v20, %v4495_v40  ;;  %v4786_v4 = vadd.f32 %v6424_v29, %v4485_v41  ;;  %v4800_v34 = vpop.f32.mrf.mxu0  ;;  %v4802_v20 = vpop.f32.mrf.mxu1 }
 0x19d   :  { %6417 = vst [vmem:[#allocation25_spill] sm:$0xff] %v4770_v32  ;;  %6419 = vst [vmem:[#allocation26_spill] sm:$0xff] %v4774_v2  ;;  %v6428_v32 = vld [vmem:[#allocation31_spill] sm:$0xff]  ;;  %v6430_v2 = vld [vmem:[#allocation32_spill] sm:$0xff] }
 0x19e   :  { %6423 = vst [vmem:[#allocation28_spill] sm:$0xff] %v4782_v35  ;;  %6425 = vst [vmem:[#allocation29_spill] sm:$0xff] %v4786_v4  ;;  %v4794_v21 = vadd.f32 %v6428_v32, %v4493_v18  ;;  %v4798_v28 = vadd.f32 %v6430_v2, %v4495_v40  ;;  %v6433_v35 = vld [vmem:[#allocation33_spill] sm:$0xff]  ;;  %v6435_v4 = vld [vmem:[#allocation34_spill] sm:$0xff] }
 0x19f   :  { %6427 = vst [vmem:[#allocation30_spill] sm:$0xff] %v4790_v15  ;;  %6432 = vst [vmem:[#allocation114_spill] sm:$0xff] %v4802_v20  ;;  %v4806_v29 = vadd.f32 %v6433_v35, %v4485_v41  ;;  %v4810_v24 = vadd.f32 %v6435_v4, %v4487_v14  ;;  %v6437_v15 = vld [vmem:[#allocation35_spill] sm:$0xff]  ;;  %v6443_v20 = vld [vmem:[#allocation38_spill] sm:$0xff] }
 0x1a0   :  { %6429 = vst [vmem:[#allocation31_spill] sm:$0xff] %v4794_v21  ;;  %6431 = vst [vmem:[#allocation32_spill] sm:$0xff] %v4798_v28  ;;  %v4814_v32 = vadd.f32 %v6437_v15, %v4493_v18  ;;  %v6439_v21 = vld [vmem:[#allocation36_spill] sm:$0xff]  ;;  %v6441_v28 = vld [vmem:[#allocation37_spill] sm:$0xff]  ;;  %v4826_v35 = vadd.f32 %v6443_v20, %v4487_v14 }
 0x1a1   :  { %6434 = vst [vmem:[#allocation33_spill] sm:$0xff] %v4806_v29  ;;  %6436 = vst [vmem:[#allocation34_spill] sm:$0xff] %v4810_v24  ;;  %v4818_v2 = vadd.f32 %v6439_v21, %v4495_v40  ;;  %v4822_v23 = vadd.f32 %v6441_v28, %v4485_v41  ;;  %v6445_v29 = vld [vmem:[#allocation39_spill] sm:$0xff]  ;;  %v6447_v24 = vld [vmem:[#allocation40_spill] sm:$0xff]  ;;  %v4838_v21 = vpop.f32.mrf.mxu1 }
 0x1a2   :  { %6438 = vst [vmem:[#allocation35_spill] sm:$0xff] %v4814_v32  ;;  %6444 = vst [vmem:[#allocation38_spill] sm:$0xff] %v4826_v35  ;;  %v4830_v4 = vadd.f32 %v6445_v29, %v4493_v18  ;;  %v4834_v15 = vadd.f32 %v6447_v24, %v4495_v40  ;;  %v4836_v32 = vpop.f32.mrf.mxu0  ;;  %v6455_v35 = vld [vmem:[#allocation43_spill] sm:$0xff] }
 0x1a3   :  { %6440 = vst [vmem:[#allocation36_spill] sm:$0xff] %v4818_v2  ;;  %6442 = vst [vmem:[#allocation37_spill] sm:$0xff] %v4822_v23  ;;  %v6451_v2 = vld [vmem:[#allocation41_spill] sm:$0xff]  ;;  %v6453_v23 = vld [vmem:[#allocation42_spill] sm:$0xff]  ;;  %v4850_v29 = vadd.f32 %v6455_v35, %v4493_v18 }
 0x1a4   :  { %6446 = vst [vmem:[#allocation39_spill] sm:$0xff] %v4830_v4  ;;  %6448 = vst [vmem:[#allocation40_spill] sm:$0xff] %v4834_v15  ;;  %v4842_v28 = vadd.f32 %v6451_v2, %v4485_v41  ;;  %v4846_v20 = vadd.f32 %v6453_v23, %v4487_v14  ;;  %v6457_v4 = vld [vmem:[#allocation44_spill] sm:$0xff] }
 0x1a5   :  { %6449 = vst [vmem:[#allocation115_spill] sm:$0xff] %v4836_v32  ;;  %6450 = vst [vmem:[#allocation116_spill] sm:$0xff] %v4838_v21  ;;  %v4854_v24 = vadd.f32 %v6457_v4, %v4495_v40  ;;  %v6459_v32 = vld [vmem:[#allocation45_spill] sm:$0xff]  ;;  %v6461_v21 = vld [vmem:[#allocation46_spill] sm:$0xff]  ;;  %v4874_v4 = vpop.f32.mrf.mxu1 }
 0x1a6   :  { %6452 = vst [vmem:[#allocation41_spill] sm:$0xff] %v4842_v28  ;;  %6454 = vst [vmem:[#allocation42_spill] sm:$0xff] %v4846_v20  ;;  %v4858_v15 = vadd.f32 %v6459_v32, %v4485_v41  ;;  %v4862_v2 = vadd.f32 %v6461_v21, %v4487_v14  ;;  %v6463_v28 = vld [vmem:[#allocation47_spill] sm:$0xff]  ;;  %v6465_v20 = vld [vmem:[#allocation48_spill] sm:$0xff] }
 0x1a7   :  { %6456 = vst [vmem:[#allocation43_spill] sm:$0xff] %v4850_v29  ;;  %6458 = vst [vmem:[#allocation44_spill] sm:$0xff] %v4854_v24  ;;  %v4866_v23 = vadd.f32 %v6463_v28, %v4493_v18  ;;  %v4870_v35 = vadd.f32 %v6465_v20, %v4495_v40  ;;  %v4872_v29 = vpop.f32.mrf.mxu0  ;;  %v6469_v24 = vld [vmem:[#allocation49_spill] sm:$0xff] }
 0x1a8   :  { %6460 = vst [vmem:[#allocation45_spill] sm:$0xff] %v4858_v15  ;;  %6462 = vst [vmem:[#allocation46_spill] sm:$0xff] %v4862_v2  ;;  %v4878_v32 = vadd.f32 %v6469_v24, %v4485_v41  ;;  %v6471_v15 = vld [vmem:[#allocation50_spill] sm:$0xff]  ;;  %v6473_v2 = vld [vmem:[#allocation51_spill] sm:$0xff] }
 0x1a9   :  { %6464 = vst [vmem:[#allocation47_spill] sm:$0xff] %v4866_v23  ;;  %6466 = vst [vmem:[#allocation48_spill] sm:$0xff] %v4870_v35  ;;  %v4882_v21 = vadd.f32 %v6471_v15, %v4487_v14  ;;  %v4886_v28 = vadd.f32 %v6473_v2, %v4493_v18  ;;  %v6475_v23 = vld [vmem:[#allocation52_spill] sm:$0xff] }
 0x1aa   :  { %6467 = vst [vmem:[#allocation117_spill] sm:$0xff] %v4872_v29  ;;  %6468 = vst [vmem:[#allocation118_spill] sm:$0xff] %v4874_v4  ;;  %v4890_v20 = vadd.f32 %v6475_v23, %v4495_v40  ;;  %v6477_v29 = vld [vmem:[#allocation53_spill] sm:$0xff]  ;;  %v6479_v4 = vld [vmem:[#allocation54_spill] sm:$0xff]  ;;  %v4910_v23 = vpop.f32.mrf.mxu1 }
 0x1ab   :  { %6470 = vst [vmem:[#allocation49_spill] sm:$0xff] %v4878_v32  ;;  %6472 = vst [vmem:[#allocation50_spill] sm:$0xff] %v4882_v21  ;;  %v4894_v35 = vadd.f32 %v6477_v29, %v4485_v41  ;;  %v4898_v24 = vadd.f32 %v6479_v4, %v4487_v14  ;;  %v6481_v32 = vld [vmem:[#allocation55_spill] sm:$0xff]  ;;  %v6483_v21 = vld [vmem:[#allocation56_spill] sm:$0xff] }
 0x1ac   :  { %6474 = vst [vmem:[#allocation51_spill] sm:$0xff] %v4886_v28  ;;  %6476 = vst [vmem:[#allocation52_spill] sm:$0xff] %v4890_v20  ;;  %v4902_v15 = vadd.f32 %v6481_v32, %v4493_v18  ;;  %v4906_v2 = vadd.f32 %v6483_v21, %v4495_v40  ;;  %v4908_v28 = vpop.f32.mrf.mxu0  ;;  %v6487_v20 = vld [vmem:[#allocation57_spill] sm:$0xff]  ;;  %v1263_v17 = vpop.f32.mrf.mxu1 }
 0x1ad   :  { %6478 = vst [vmem:[#allocation53_spill] sm:$0xff] %v4894_v35  ;;  %6480 = vst [vmem:[#allocation54_spill] sm:$0xff] %v4898_v24  ;;  %v4914_v29 = vadd.f32 %v6487_v20, %v4485_v41  ;;  %v6489_v35 = vld [vmem:[#allocation58_spill] sm:$0xff]  ;;  %v6491_v24 = vld [vmem:[#allocation59_spill] sm:$0xff] }
 0x1ae   :  { %6482 = vst [vmem:[#allocation55_spill] sm:$0xff] %v4902_v15  ;;  %6484 = vst [vmem:[#allocation56_spill] sm:$0xff] %v4906_v2  ;;  %v4918_v4 = vadd.f32 %v6489_v35, %v4487_v14  ;;  %v4922_v32 = vadd.f32 %v6491_v24, %v4493_v18  ;;  %v6493_v15 = vld [vmem:[#allocation60_spill] sm:$0xff]  ;;  %v1265_v57 = vpop.f32.mrf.mxu1 }
 0x1af   :  { %6485 = vst [vmem:[#allocation119_spill] sm:$0xff] %v4908_v28  ;;  %6486 = vst [vmem:[#allocation120_spill] sm:$0xff] %v4910_v23  ;;  %v4926_v21 = vadd.f32 %v6493_v15, %v4495_v40  ;;  %v6495_v28 = vld [vmem:[#allocation61_spill] sm:$0xff]  ;;  %v6497_v23 = vld [vmem:[#allocation62_spill] sm:$0xff] }
 0x1b0   :  { %6488 = vst [vmem:[#allocation57_spill] sm:$0xff] %v4914_v29  ;;  %6490 = vst [vmem:[#allocation58_spill] sm:$0xff] %v4918_v4  ;;  %v4930_v2 = vadd.f32 %v6495_v28, %v4485_v41  ;;  %v4934_v20 = vadd.f32 %v6497_v23, %v4487_v14  ;;  %v6499_v29 = vld [vmem:[#allocation63_spill] sm:$0xff]  ;;  %v6501_v4 = vld [vmem:[#allocation64_spill] sm:$0xff] }
 0x1b1   :  { %6492 = vst [vmem:[#allocation59_spill] sm:$0xff] %v4922_v32  ;;  %6494 = vst [vmem:[#allocation60_spill] sm:$0xff] %v4926_v21  ;;  %v4938_v35 = vadd.f32 %v6499_v29, %v4493_v18  ;;  %v4942_v24 = vadd.f32 %v6501_v4, %v4495_v40  ;;  %v1070_v32 = vpop.f32.mrf.mxu0  ;;  %v6503_v15 = vld [vmem:[#allocation65_spill] sm:$0xff]  ;;  %v6505_v28 = vld [vmem:[#allocation66_spill] sm:$0xff]  ;;  %v4956_v29 = vadd.f32 %v1263_v17, %v4518_v37 }
 0x1b2   :  { %6496 = vst [vmem:[#allocation61_spill] sm:$0xff] %v4930_v2  ;;  %6498 = vst [vmem:[#allocation62_spill] sm:$0xff] %v4934_v20  ;;  %v4946_v21 = vadd.f32 %v6503_v15, %v4485_v41  ;;  %v4950_v2 = vadd.f32 %v6505_v28, %v4487_v14  ;;  %v4953_v23 = vadd.f32 %v1070_v32, %v4516_v16  ;;  %v6511_v15 = vld [vmem:[#allocation71_spill] sm:$0xff]  ;;  %v6513_v28 = vld [vmem:[#allocation72_spill] sm:$0xff] }
 0x1b3   :  { %6500 = vst [vmem:[#allocation63_spill] sm:$0xff] %v4938_v35  ;;  %6502 = vst [vmem:[#allocation64_spill] sm:$0xff] %v4942_v24  ;;  %v6507_v35 = vld [vmem:[#allocation67_spill] sm:$0xff]  ;;  %v6509_v24 = vld [vmem:[#allocation68_spill] sm:$0xff]  ;;  %v1072_v32 = vpop.f32.mrf.mxu0 }
 0x1b4   :  { %6504 = vst [vmem:[#allocation65_spill] sm:$0xff] %v4946_v21  ;;  %6506 = vst [vmem:[#allocation66_spill] sm:$0xff] %v4950_v2  ;;  %v4960_v4 = vadd.f32 %v6507_v35, %v4493_v18  ;;  %v4964_v20 = vadd.f32 %v6509_v24, %v4495_v40  ;;  %v4968_v21 = vadd.f32 %v6511_v15, %v4485_v41  ;;  %v6515_v17 = vld [vmem:[#allocation75_spill] sm:$0xff]  ;;  %v1550_v24 = vmul.f32 0.70710677, %v4953_v23 }
 0x1b5   :  { %v4972_v2 = vadd.f32 %v6513_v28, %v4487_v14  ;;  %v4976_v59 = vadd.f32 %v6515_v17, %v4493_v18  ;;  %v4980_v35 = vadd.f32 %v4502_v38, %v4495_v40  ;;  %v4986_v15 = vadd.f32 %v4512_v6, %v4485_v41  ;;  %v1074_v38 = vpop.f32.mrf.mxu0 }
 0x1b6   :  { %6508 = vst [vmem:[#allocation67_spill] sm:$0xff] %v4960_v4  ;;  %6510 = vst [vmem:[#allocation68_spill] sm:$0xff] %v4964_v20  ;;  %v1552_v20 = vmul.f32 0.70710677, %v4956_v29  ;;  %v4990_v28 = vadd.f32 %v4514_v19, %v4487_v14  ;;  %v4993_v4 = vadd.f32 %v1072_v32, %v4528_v25  ;;  %v4996_v17 = vadd.f32 %v1265_v57, %v4530_v43 }
 0x1b7   :  { %6512 = vst [vmem:[#allocation71_spill] sm:$0xff] %v4968_v21  ;;  %6514 = vst [vmem:[#allocation72_spill] sm:$0xff] %v4972_v2  ;;  %3669 = verf.f32 %v1550_v24  ;;  %v5003_v6 = vadd.f32 %v1074_v38, %v4516_v16  ;;  %v5010_v19 = vadd.f32 %v4550_v10, %v4495_v40  ;;  %v5014_v57 = vadd.f32 %v4584_v26, %v4485_v41 }
 0x1b8   :  { %6516 = vst [vmem:[#allocation75_spill] sm:$0xff] %v4976_v59  ;;  %6517 = vst [vmem:[#allocation121_spill] sm:$0xff] %v4980_v35  ;;  %v1267_v35 = vpop.f32.mrf.mxu1  ;;  %v5000_v59 = vadd.f32 %v4548_v39, %v4493_v18  ;;  %3671 = verf.f32 %v1552_v20  ;;  %v1551_v32 = vmul.f32 0.70710677, %v4993_v4  ;;  %v1076_v39 = vpop.f32.mrf.mxu0  ;;  %v5019_v24 = vadd.f32 %v4586_v53, %v4487_v14 }
 0x1b9   :  { %6518 = vst [vmem:[#allocation122_spill] sm:$0xff] %v4986_v15  ;;  %6519 = vst [vmem:[#allocation123_spill] sm:$0xff] %v4990_v28  ;;  %v5006_v15 = vadd.f32 %v1267_v35, %v4518_v37  ;;  %v5023_v35 = vadd.f32 %v4620_v56, %v4493_v18  ;;  %v1553_v10 = vmul.f32 0.70710677, %v4996_v17  ;;  %v1554_v38 = vmul.f32 0.70710677, %v5003_v6 }
 0x1ba   :  { %6520 = vst [vmem:[#allocation124_spill] sm:$0xff] %v5000_v59  ;;  %6521 = vst [vmem:[#allocation125_spill] sm:$0xff] %v5010_v19  ;;  %v1269_v59 = vpop.f32.mrf.mxu1  ;;  %3673 = verf.f32 %v1551_v32  ;;  %v1077_v20 = vadd.f32 %v1076_v39, %v4528_v25  ;;  %v5034_v53 = vadd.f32 %v4622_v61, %v4495_v40  ;;  %v5044_v32 = vadd.f32 %v4656_v1, %v4485_v41 }
 0x1bb   :  { %6522 = vst [vmem:[#allocation126_spill] sm:$0xff] %v5014_v57  ;;  %6523 = vst [vmem:[#allocation127_spill] sm:$0xff] %v5019_v24  ;;  %v1556_v26 = vmul.f32 0.70710677, %v5006_v15  ;;  %v5030_v19 = vadd.f32 %v1269_v59, %v4530_v43  ;;  %v1080_v57 = vpop.f32.mrf.mxu0  ;;  %3675 = verf.f32 %v1553_v10  ;;  %v5048_v59 = vadd.f32 %v4658_v8, %v4487_v14 }
 0x1bc   :  { %6524 = vst [vmem:[#allocation128_spill] sm:$0xff] %v5023_v35  ;;  %v1273_v28 = vpop.f32.mrf.mxu1  ;;  %6525 = vst [vmem:[#allocation129_spill] sm:$0xff] %v5034_v53  ;;  %v5037_v56 = vadd.f32 %v1080_v57, %v4516_v16  ;;  %3677 = verf.f32 %v1554_v38  ;;  %v1555_v39 = vmul.f32 0.70710677, %v1077_v20  ;;  %v5052_v10 = vadd.f32 %v4692_v13, %v4493_v18 }
 0x1bd   :  { %v5040_v35 = vadd.f32 %v1273_v28, %v4518_v37  ;;  %6526 = vst [vmem:[#allocation130_spill] sm:$0xff] %v5044_v32  ;;  %6527 = vst [vmem:[#allocation131_spill] sm:$0xff] %v5048_v59  ;;  %v1082_v24 = vpop.f32.mrf.mxu0  ;;  %3679 = verf.f32 %v1556_v26  ;;  %v1557_v28 = vmul.f32 0.70710677, %v5030_v19  ;;  %v5058_v1 = vadd.f32 %v4694_v22, %v4495_v40 }
 0x1be   :  { %v1275_v61 = vpop.f32.mrf.mxu1  ;;  %6528 = vst [vmem:[#allocation132_spill] sm:$0xff] %v5052_v10  ;;  %v1558_v57 = vmul.f32 0.70710677, %v5037_v56  ;;  %3681 = verf.f32 %v1555_v39  ;;  %v1083_v38 = vadd.f32 %v1082_v24, %v4528_v25  ;;  %v5069_v32 = vadd.f32 %v4728_v27, %v4485_v41 }
 0x1bf   :  { %6529 = vst [vmem:[#allocation133_spill] sm:$0xff] %v5058_v1  ;;  %v1560_v8 = vmul.f32 0.70710677, %v5040_v35  ;;  %v1084_v59 = vpop.f32.mrf.mxu0  ;;  %3683 = verf.f32 %v1557_v28  ;;  %v1276_v13 = vadd.f32 %v1275_v61, %v4530_v43  ;;  %v5073_v22 = vadd.f32 %v4730_v33, %v4487_v14 }
 0x1c0   :  { %v1277_v53 = vpop.f32.mrf.mxu1  ;;  %v1085_v26 = vadd.f32 %v1084_v59, %v4516_v16  ;;  %6530 = vst [vmem:[#allocation134_spill] sm:$0xff] %v5069_v32  ;;  %3685 = verf.f32 %v1558_v57  ;;  %v1559_v24 = vmul.f32 0.70710677, %v1083_v38  ;;  %v5077_v61 = vadd.f32 %v4764_v36, %v4493_v18 }
 0x1c1   :  { %v5065_v10 = vadd.f32 %v1277_v53, %v4518_v37  ;;  %6531 = vst [vmem:[#allocation135_spill] sm:$0xff] %v5073_v22  ;;  %v1086_v39 = vpop.f32.mrf.mxu0  ;;  %v5081_v53 = vadd.f32 %v4766_v30, %v4495_v40  ;;  %3687 = verf.f32 %v1560_v8  ;;  %v1561_v59 = vmul.f32 0.70710677, %v1276_v13 }
 0x1c2   :  { %v1279_v1 = vpop.f32.mrf.mxu1  ;;  %6532 = vst [vmem:[#allocation136_spill] sm:$0xff] %v5077_v61  ;;  %v5085_v27 = vadd.f32 %v4800_v34, %v4485_v41  ;;  %3689 = verf.f32 %v1559_v24  ;;  %v1562_v33 = vmul.f32 0.70710677, %v1085_v26  ;;  %v1087_v36 = vadd.f32 %v1086_v39, %v4528_v25 }
 0x1c3   :  { %6533 = vst [vmem:[#allocation137_spill] sm:$0xff] %v5081_v53  ;;  %v1564_v28 = vmul.f32 0.70710677, %v5065_v10  ;;  %v1090_v57 = vpop.f32.mrf.mxu0  ;;  %3691 = verf.f32 %v1561_v59  ;;  %v1280_v61 = vadd.f32 %v1279_v1, %v4530_v43  ;;  %v1422_v8 = vmul.f32 0.5, %v4953_v23 }
 0x1c4   :  { %6534 = vst [vmem:[#allocation138_spill] sm:$0xff] %v5085_v27  ;;  %v1283_v14 = vpop.f32.mrf.mxu1  ;;  %v1091_v30 = vadd.f32 %v1090_v57, %v4516_v16  ;;  %v3670_v40 = vpop.eup %3669  ;;  %v1424_v53 = vmul.f32 0.5, %v4956_v29  ;;  %3693 = verf.f32 %v1562_v33  ;;  %v5097_v59 = vmul.f32 0.5, %v4993_v4 }
 0x1c5   :  { %v5094_v34 = vadd.f32 %v1283_v14, %v4518_v37  ;;  %v1092_v24 = vpop.f32.mrf.mxu0  ;;  %v3672_v41 = vpop.eup %3671  ;;  %v5100_v39 = vmul.f32 0.5, %v4996_v17  ;;  %v1426_v1 = vmul.f32 0.5, %v5003_v6  ;;  %v1563_v57 = vmul.f32 0.70710677, %v1087_v36 }
 0x1c6   :  { %v1285_v27 = vpop.f32.mrf.mxu1  ;;  %v1806_v18 = vadd.f32 1.0, %v3670_v40  ;;  %v1428_v23 = vmul.f32 0.5, %v5006_v15  ;;  %v5104_v29 = vmul.f32 0.5, %v1077_v20  ;;  %3695 = verf.f32 %v1564_v28 }
 0x1c7   :  { %v1094_v14 = vpop.f32.mrf.mxu0  ;;  %v3674_v22 = vpop.eup %3673  ;;  %v1808_v32 = vadd.f32 1.0, %v3672_v41  ;;  %v5107_v2 = vmul.f32 0.5, %v5030_v19  ;;  %v1565_v4 = vmul.f32 0.70710677, %v1280_v61  ;;  %v1566_v21 = vmul.f32 0.70710677, %v1091_v30 }
 0x1c8   :  { %v1287_v33 = vpop.f32.mrf.mxu1  ;;  %v3676_v17 = vpop.eup %3675  ;;  %v5110_v7 = vmul.f32 0.5, %v5037_v56  ;;  %v5113_v40 = vmul.f32 0.5, %v5040_v35  ;;  %3697 = verf.f32 %v1563_v57  ;;  %v1568_v15 = vmul.f32 0.70710677, %v5094_v34 }
 0x1c9   :  { %v5116_v6 = vpop.f32.mrf.mxu0  ;;  %v3678_v41 = vpop.eup %3677  ;;  %v5120_v28 = vmul.f32 0.5, %v1083_v38  ;;  %v5122_v19 = vmul.f32 0.5, %v1276_v13  ;;  %3699 = verf.f32 %v1566_v21  ;;  %v1093_v12 = vadd.f32 %v1092_v24, %v4528_v25 }
 0x1ca   :  { %v5118_v20 = vpop.f32.mrf.mxu1  ;;  %v3680_v56 = vpop.eup %3679  ;;  %v1934_v11 = vmul.f32 %v1806_v18, %v1422_v8  ;;  %v1810_v3 = vadd.f32 1.0, %v3678_v41  ;;  %v5125_v35 = vmul.f32 0.5, %v1085_v26  ;;  %3701 = verf.f32 %v1568_v15 }
 0x1cb   :  { %v1100_v57 = vpop.f32.mrf.mxu0  ;;  %v3682_v49 = vpop.eup %3681  ;;  %v1936_v51 = vmul.f32 %v1808_v32, %v1424_v53  ;;  %v1812_v48 = vadd.f32 1.0, %v3680_v56  ;;  %v5130_v38 = vmul.f32 0.5, %v5065_v10  ;;  %3703 = verf.f32 %v1565_v4  ;;  %v6535_v4 = vld [vmem:[#allocation76_spill] sm:$0xff] }
 0x1cc   :  { %v5127_v60 = vpop.f32.mrf.mxu1  ;;  %v3684_v13 = vpop.eup %3683  ;;  %v1938_v21 = vmul.f32 %v1810_v3, %v1426_v1  ;;  %v5132_v63 = vmul.f32 0.5, %v1087_v36  ;;  %v1567_v24 = vmul.f32 0.70710677, %v1093_v12  ;;  %v1286_v18 = vadd.f32 %v1285_v27, %v4530_v43 }
 0x1cd   :  { %v5135_v26 = vpop.f32.mrf.mxu0  ;;  %v3686_v15 = vpop.eup %3685  ;;  %v1807_v41 = vadd.f32 1.0, %v3674_v22  ;;  %v1940_v62 = vmul.f32 %v1812_v48, %v1428_v23  ;;  %v5139_v32 = vmul.f32 0.5, %v1280_v61  ;;  %v5141_v53 = vmul.f32 0.5, %v1091_v30  ;;  %v6538_v48 = vld [vmem:[#allocation77_spill] sm:$0xff] }
 0x1ce   :  { %v5137_v8 = vpop.f32.mrf.mxu1  ;;  %v3688_v10 = vpop.eup %3687  ;;  %v5144_v56 = vmul.f32 %v1934_v11, %v6535_v4  ;;  %v1809_v3 = vadd.f32 1.0, %v3676_v17  ;;  %v5147_v36 = vmul.f32 %v1938_v21, %v4534_v31  ;;  %v1095_v27 = vadd.f32 %v1094_v14, %v4516_v16 }
 0x1cf   :  { %v5150_v1 = vpop.f32.mrf.mxu0  ;;  %v3690_v22 = vpop.eup %3689  ;;  %v5155_v61 = vmul.f32 %v1936_v51, %v6538_v48  ;;  %v5158_v30 = vmul.f32 %v1940_v62, %v4538_v9  ;;  %v1814_v23 = vadd.f32 1.0, %v3686_v15  ;;  %v1816_v11 = vadd.f32 1.0, %v3688_v10 }
 0x1d0   :  { %6536 = vst [vmem:[#allocation76_spill] sm:$0xff] %v5144_v56  ;;  %6537 = vst [vmem:[#allocation139_spill] sm:$0xff] %v5147_v36  ;;  %v5152_v58 = vpop.f32.mrf.mxu1  ;;  %v3692_v4 = vpop.eup %3691  ;;  %3705 = verf.f32 %v1567_v24  ;;  %v1569_v17 = vmul.f32 0.70710677, %v1286_v18  ;;  %v1288_v14 = vadd.f32 %v1287_v33, %v4518_v37  ;;  %v5168_v51 = vmul.f32 %v1807_v41, %v5097_v59 }
 0x1d1   :  { %v5163_v21 = vpop.f32.mrf.mxu0  ;;  %v3694_v45 = vpop.eup %3693  ;;  %v1811_v62 = vadd.f32 1.0, %v3682_v49  ;;  %v1440_v15 = vmul.f32 0.5, %v5094_v34  ;;  %v5174_v10 = vmul.f32 %v1809_v3, %v5100_v39  ;;  %v1813_v24 = vadd.f32 1.0, %v3684_v13 }
 0x1d2   :  { %v5165_v52 = vpop.f32.mrf.mxu1  ;;  %v5176_v48 = vmul.f32 0.5, %v1093_v12  ;;  %v1570_v33 = vmul.f32 0.70710677, %v1095_v27  ;;  %v1942_v56 = vmul.f32 %v1814_v23, %v5110_v7  ;;  %v1944_v36 = vmul.f32 %v1816_v11, %v5113_v40 }
 0x1d3   :  { %v3696_v31 = vpop.eup %3695  ;;  %v1815_v59 = vadd.f32 1.0, %v3690_v22  ;;  %v1817_v41 = vadd.f32 1.0, %v3692_v4  ;;  %v1110_v42 = vpop.f32.mrf.mxu0  ;;  %v1818_v44 = vadd.f32 1.0, %v3694_v45  ;;  %3707 = verf.f32 %v1569_v17 }
 0x1d4   :  { %v1572_v49 = vmul.f32 0.70710677, %v1288_v14  ;;  %v1097_v34 = vadd.f32 %v5116_v6, %v4528_v25  ;;  %v5182_v39 = vpop.f32.mrf.mxu1  ;;  %v5185_v12 = vmul.f32 %v1811_v62, %v5104_v29  ;;  %3709 = verf.f32 %v1570_v33 }
 0x1d5   :  { %v3698_v13 = vpop.eup %3697  ;;  %v1290_v7 = vadd.f32 %v5118_v20, %v4530_v43  ;;  %v1101_v40 = vadd.f32 %v1100_v57, %v4516_v16  ;;  %v5191_v45 = vmul.f32 %v1813_v24, %v5107_v2  ;;  %v1820_v22 = vadd.f32 1.0, %v3696_v31  ;;  %v5203_v17 = vpop.f32.mrf.mxu0 }
 0x1d6   :  { %v3700_v3 = vpop.eup %3699  ;;  %v5193_v23 = vmul.f32 0.5, %v1286_v18  ;;  %3711 = verf.f32 %v1572_v49  ;;  %v5196_v11 = vmul.f32 %v1942_v56, %v4554_v46  ;;  %v5199_v29 = vmul.f32 %v1815_v59, %v5120_v28  ;;  %v5212_v46 = vpop.f32.mrf.mxu1 }
 0x1d7   :  { %v3702_v6 = vpop.eup %3701  ;;  %v5201_v4 = vmul.f32 0.5, %v1095_v27  ;;  %v1571_v20 = vmul.f32 0.70710677, %v1097_v34  ;;  %v5206_v2 = vmul.f32 %v1944_v36, %v4558_v47  ;;  %v5209_v18 = vmul.f32 %v1817_v41, %v5122_v19 }
 0x1d8   :  { %v3704_v57 = vpop.eup %3703  ;;  %v1946_v31 = vmul.f32 %v1818_v44, %v5125_v35  ;;  %v1573_v62 = vmul.f32 0.70710677, %v1290_v7  ;;  %v1822_v56 = vadd.f32 1.0, %v3700_v3  ;;  %v1824_v28 = vadd.f32 1.0, %v3702_v6  ;;  %v5223_v35 = vpop.f32.mrf.mxu0 }
 0x1d9   :  { %v5214_v24 = vmul.f32 0.5, %v1288_v14  ;;  %v1574_v27 = vmul.f32 0.70710677, %v1101_v40  ;;  %v1948_v33 = vmul.f32 %v1820_v22, %v5130_v38  ;;  %3713 = verf.f32 %v1571_v20  ;;  %v5230_v49 = vpop.f32.mrf.mxu1 }
 0x1da   :  { %v1294_v47 = vadd.f32 %v5127_v60, %v4518_v37  ;;  %v1103_v19 = vadd.f32 %v5135_v26, %v4528_v25  ;;  %v1819_v36 = vadd.f32 1.0, %v3698_v13  ;;  %v1821_v59 = vadd.f32 1.0, %v3704_v57  ;;  %v5251_v57 = vpop.f32.mrf.mxu0 }
 0x1db   :  { %3715 = verf.f32 %v1574_v27  ;;  %v1296_v44 = vadd.f32 %v5137_v8, %v4530_v43  ;;  %v5226_v14 = vmul.f32 %v1946_v31, %v4570_v0  ;;  %v5228_v41 = vmul.f32 0.5, %v1097_v34 }
 0x1dc   :  { %3717 = verf.f32 %v1573_v62  ;;  %v1576_v38 = vmul.f32 0.70710677, %v1294_v47  ;;  %v1950_v26 = vmul.f32 %v1822_v56, %v5141_v53  ;;  %v1952_v13 = vmul.f32 %v1824_v28, %v1440_v15 }
 0x1dd   :  { %v3706_v60 = vpop.eup %3705  ;;  %v1575_v3 = vmul.f32 0.70710677, %v1103_v19  ;;  %v1577_v22 = vmul.f32 0.70710677, %v1296_v44  ;;  %v1105_v8 = vadd.f32 %v5150_v1, %v4516_v16  ;;  %v1298_v0 = vadd.f32 %v5152_v58, %v4518_v37 }
 0x1de   :  { %3719 = verf.f32 %v1576_v38  ;;  %v1107_v34 = vadd.f32 %v5163_v21, %v4528_v25  ;;  %v5240_v6 = vmul.f32 %v1948_v33, %v4574_v50  ;;  %v5243_v20 = vmul.f32 %v1819_v36, %v5132_v63  ;;  %v5255_v21 = vpop.f32.mrf.mxu1 }
 0x1df   :  { %v5246_v53 = vmul.f32 %v1821_v59, %v5139_v32  ;;  %v5249_v15 = vadd.f32 %v1110_v42, %v4516_v16  ;;  %v1823_v1 = vadd.f32 1.0, %v3706_v60  ;;  %v5253_v31 = vmul.f32 0.5, %v1290_v7  ;;  %v5272_v59 = vpop.f32.mrf.mxu0 }
 0x1e0   :  { %3721 = verf.f32 %v1575_v3  ;;  %v1578_v58 = vmul.f32 0.70710677, %v1105_v8  ;;  %v3708_v50 = vpop.eup %3707  ;;  %v5257_v62 = vmul.f32 0.5, %v1101_v40  ;;  %v1580_v63 = vmul.f32 0.70710677, %v1298_v0 }
 0x1e1   :  { %3723 = verf.f32 %v1577_v22  ;;  %v1579_v56 = vmul.f32 0.70710677, %v1107_v34  ;;  %v3710_v32 = vpop.eup %3709  ;;  %v5260_v28 = vmul.f32 %v1950_v26, %v4590_v54  ;;  %v5263_v42 = vmul.f32 %v1952_v13, %v4594_v55  ;;  %v6539_v13 = vld [vmem:[#allocation79_spill] sm:$0xff]  ;;  %v5293_v9 = vpop.f32.mrf.mxu0 }
 0x1e2   :  { %3725 = verf.f32 %v1578_v58  ;;  %v1300_v7 = vadd.f32 %v5165_v52, %v4530_v43  ;;  %v5267_v33 = vmul.f32 0.5, %v1294_v47  ;;  %v1582_v40 = vmul.f32 0.70710677, %v5249_v15  ;;  %v5281_v52 = vpop.f32.mrf.mxu1 }
 0x1e3   :  { %v3712_v27 = vpop.eup %3711  ;;  %3727 = verf.f32 %v1580_v63  ;;  %v1304_v36 = vadd.f32 %v5182_v39, %v4518_v37  ;;  %v5275_v54 = vmul.f32 %v1823_v1, %v5176_v48  ;;  %v1825_v55 = vadd.f32 1.0, %v3708_v50  ;;  %v6541_v63 = vld [vmem:[#allocation80_spill] sm:$0xff] }
 0x1e4   :  { %v5277_v38 = vmul.f32 0.5, %v1103_v19  ;;  %v5279_v60 = vmul.f32 0.5, %v1296_v44  ;;  %3729 = verf.f32 %v1579_v56  ;;  %v2063_v26 = vmul.f32 %v5168_v51, %v4522_v5  ;;  %v6540_v44 = vld [vmem:[#allocation78_spill] sm:$0xff] }
 0x1e5   :  { %v1584_v47 = vmul.f32 0.70710677, %v1304_v36  ;;  %v2067_v39 = vmul.f32 %v5185_v12, %v6539_v13  ;;  %v1826_v3 = vadd.f32 1.0, %v3710_v32  ;;  %v1828_v22 = vadd.f32 1.0, %v3712_v27  ;;  %v5301_v32 = vpop.f32.mrf.mxu1  ;;  %v6543_v13 = vld [vmem:[#allocation76_spill] sm:$0xff] }
 0x1e6   :  { %v1581_v58 = vmul.f32 0.70710677, %v1300_v7  ;;  %3731 = verf.f32 %v1582_v40  ;;  %v3714_v48 = vpop.eup %3713  ;;  %v5287_v1 = vmul.f32 0.5, %v1105_v8  ;;  %v2065_v50 = vmul.f32 %v5174_v10, %v6540_v44 }
 0x1e7   :  { %v2191_v19 = vpack.c.bf16 %v2067_v39, %v2063_v26  ;;  %v2069_v56 = vmul.f32 %v5191_v45, %v6541_v63  ;;  %v5295_v51 = vmul.f32 0.5, %v1298_v0  ;;  %3733 = verf.f32 %v1584_v47 }
 0x1e8   :  { %v3716_v5 = vpop.eup %3715  ;;  %v1113_v12 = vadd.f32 %v5203_v17, %v4528_v25  ;;  %v1306_v8 = vadd.f32 %v5212_v46, %v4530_v43  ;;  %v5304_v10 = vmul.f32 %v1825_v55, %v5193_v23  ;;  %v5306_v40 = vmul.f32 0.5, %v1107_v34  ;;  %v6542_v46 = vld [vmem:[#allocation139_spill] sm:$0xff] }
 0x1e9   :  { %v3718_v27 = vpop.eup %3717  ;;  %2549 = vmatprep.mubr.bf16.mxu0 %v2191_v19  ;;  %v2193_v45 = vpack.c.bf16 %v2069_v56, %v2065_v50  ;;  %v1115_v0 = vadd.f32 %v5223_v35, %v4516_v16  ;;  %v1954_v47 = vmul.f32 %v1826_v3, %v5201_v4  ;;  %v1956_v17 = vmul.f32 %v1828_v22, %v5214_v24  ;;  %v5315_v50 = vpop.f32.mrf.mxu0 }
 0x1ea   :  { %3735 = verf.f32 %v1581_v58  ;;  %v1583_v26 = vmul.f32 0.70710677, %v1113_v12  ;;  %v6544_v39 = vpack.c.bf16 %v6542_v46, %v6543_v13  ;;  %v1827_v23 = vadd.f32 1.0, %v3714_v48  ;;  %v5324_v3 = vpop.f32.mrf.mxu1 }
 0x1eb   :  { %v3720_v44 = vpop.eup %3719  ;;  %v1830_v55 = vadd.f32 1.0, %v3716_v5  ;;  %2710 = vmatprep.mubr.bf16.mxu1 %v2193_v45  ;;  %v1585_v34 = vmul.f32 0.70710677, %v1306_v8  ;;  %v1586_v19 = vmul.f32 0.70710677, %v1115_v0  ;;  %v1829_v63 = vadd.f32 1.0, %v3718_v27 }
 0x1ec   :  { %2550 = vmatmul.mubr.bf16.vlgmr.msra.gmra.mxu0 %v6544_v39  ;;  %v1832_v35 = vadd.f32 1.0, %v3720_v44  ;;  %v5317_v56 = vmul.f32 0.5, %v1300_v7  ;;  %v6545_v4 = vpack.c.bf16 %v5158_v30, %v5155_v61  ;;  %v1308_v24 = vadd.f32 %v5230_v49, %v4518_v37  ;;  %v6546_v27 = vld [vmem:[#allocation87_spill] sm:$0xff]  ;;  %v6547_v61 = vld [vmem:[#allocation88_spill] sm:$0xff] }
 0x1ed   :  { %v3722_v22 = vpop.eup %3721  ;;  %v5327_v58 = vmul.f32 0.5, %v5249_v15  ;;  %v5329_v48 = vmul.f32 0.5, %v1304_v36  ;;  %3737 = verf.f32 %v1583_v26  ;;  %v1117_v7 = vadd.f32 %v5251_v57, %v4528_v25  ;;  %v5345_v57 = vpop.f32.mrf.mxu0 }
 0x1ee   :  { %2711 = vmatmul.mubr.bf16.vlgmr.msra.gmra.mxu1 %v6545_v4  ;;  %v3724_v5 = vpop.eup %3723  ;;  %v5334_v45 = vmul.f32 %v1954_v47, %v6546_v27  ;;  %v5337_v30 = vmul.f32 %v1956_v17, %v6547_v61  ;;  %3739 = verf.f32 %v1586_v19  ;;  %v1310_v49 = vadd.f32 %v5255_v21, %v4530_v43  ;;  %v5353_v21 = vpop.f32.mrf.mxu1 }
 0x1ef   :  { %v3726_v46 = vpop.eup %3725  ;;  %v5342_v15 = vmul.f32 %v1827_v23, %v5228_v41  ;;  %v1958_v36 = vmul.f32 %v1830_v55, %v5257_v62  ;;  %3741 = verf.f32 %v1585_v34  ;;  %v1588_v26 = vmul.f32 0.70710677, %v1308_v24  ;;  %v5370_v27 = vpop.f32.mrf.mxu0 }
 0x1f0   :  { %v3728_v13 = vpop.eup %3727  ;;  %v5348_v47 = vmul.f32 %v1829_v63, %v5253_v31  ;;  %v1960_v17 = vmul.f32 %v1832_v35, %v5267_v33  ;;  %v1831_v39 = vadd.f32 1.0, %v3722_v22  ;;  %v5351_v44 = vmul.f32 0.5, %v1113_v12  ;;  %v6548_v63 = vld [vmem:[#allocation91_spill] sm:$0xff] }
 0x1f1   :  { %v1833_v19 = vadd.f32 1.0, %v3724_v5  ;;  %v1834_v41 = vadd.f32 1.0, %v3726_v46  ;;  %v1587_v23 = vmul.f32 0.70710677, %v1117_v7  ;;  %v1121_v62 = vadd.f32 %v5272_v59, %v4516_v16  ;;  %v3730_v55 = vpop.eup %3729  ;;  %v6550_v59 = vld [vmem:[#allocation92_spill] sm:$0xff] }
 0x1f2   :  { %v1836_v34 = vadd.f32 1.0, %v3728_v13  ;;  %3743 = verf.f32 %v1588_v26  ;;  %v1589_v4 = vmul.f32 0.70710677, %v1310_v49  ;;  %v5359_v31 = vadd.f32 %v5281_v52, %v4518_v37  ;;  %v5380_v13 = vpop.f32.mrf.mxu1 }
 0x1f3   :  { %v3732_v33 = vpop.eup %3731  ;;  %v5362_v12 = vmul.f32 %v1958_v36, %v6548_v63  ;;  %v5364_v35 = vmul.f32 0.5, %v1306_v8  ;;  %v5366_v22 = vmul.f32 0.5, %v1115_v0  ;;  %v5368_v5 = vmul.f32 0.5, %v1308_v24 }
 0x1f4   :  { %v5373_v61 = vmul.f32 %v1960_v17, %v6550_v59  ;;  %v5376_v46 = vmul.f32 %v1831_v39, %v5277_v38  ;;  %v5378_v52 = vmul.f32 0.5, %v1117_v7  ;;  %v1590_v26 = vmul.f32 0.70710677, %v1121_v62  ;;  %v3734_v36 = vpop.eup %3733  ;;  %v6553_v7 = vld [vmem:[#allocation81_spill] sm:$0xff] }
 0x1f5   :  { %6549 = vst [vmem:[#allocation77_spill] sm:$0xff] %v5362_v12  ;;  %v5383_v8 = vmul.f32 %v1833_v19, %v5279_v60  ;;  %v1962_v0 = vmul.f32 %v1834_v41, %v5287_v1  ;;  %v1835_v24 = vadd.f32 1.0, %v3730_v55  ;;  %3745 = verf.f32 %v1587_v23  ;;  %v6556_v19 = vld [vmem:[#allocation84_spill] sm:$0xff]  ;;  %v5396_v41 = vpop.f32.mrf.mxu0 }
 0x1f6   :  { %6551 = vst [vmem:[#allocation79_spill] sm:$0xff] %v5373_v61  ;;  %6552 = vst [vmem:[#allocation78_spill] sm:$0xff] %v5376_v46  ;;  %v1964_v63 = vmul.f32 %v1836_v34, %v5295_v51  ;;  %v1838_v17 = vadd.f32 1.0, %v3732_v33  ;;  %3747 = verf.f32 %v1589_v4  ;;  %v1592_v38 = vmul.f32 0.70710677, %v5359_v31  ;;  %v6554_v61 = vld [vmem:[#allocation83_spill] sm:$0xff] }
 0x1f7   :  { %v3736_v39 = vpop.eup %3735  ;;  %v2071_v59 = vmul.f32 %v5199_v29, %v6553_v7  ;;  %v2075_v12 = vmul.f32 %v5243_v20, %v6554_v61  ;;  %v6555_v46 = vld [vmem:[#allocation82_spill] sm:$0xff]  ;;  %v2077_v1 = vmul.f32 %v5246_v53, %v6556_v19  ;;  %v1840_v51 = vadd.f32 1.0, %v3734_v36  ;;  %v5402_v29 = vpop.f32.mrf.mxu1 }
 0x1f8   :  { %v2073_v60 = vmul.f32 %v5209_v18, %v6555_v46  ;;  %3749 = verf.f32 %v1590_v26  ;;  %v1123_v23 = vadd.f32 %v5293_v9, %v4528_v25  ;;  %v1316_v55 = vadd.f32 %v5301_v32, %v4530_v43  ;;  %v6557_v9 = vld [vmem:[#allocation95_spill] sm:$0xff] }
 0x1f9   :  { %3751 = verf.f32 %v1592_v38  ;;  %v2195_v20 = vpack.c.bf16 %v2075_v12, %v2071_v59  ;;  %v2194_v18 = vpack.c.bf16 %v5226_v14, %v5196_v11  ;;  %v1837_v53 = vadd.f32 1.0, %v3736_v39  ;;  %v5417_v14 = vpop.f32.mrf.mxu0  ;;  %v5425_v7 = vpop.f32.mrf.mxu1  ;;  %v6558_v59 = vld [vmem:[#allocation96_spill] sm:$0xff] }
 0x1fa   :  { %v2197_v34 = vpack.c.bf16 %v2077_v1, %v2073_v60  ;;  %v3738_v4 = vpop.eup %3737  ;;  %v5406_v33 = vmul.f32 0.5, %v1310_v49  ;;  %v5408_v61 = vmul.f32 0.5, %v1121_v62  ;;  %v1591_v46 = vmul.f32 0.70710677, %v1123_v23 }
 0x1fb   :  { %v3740_v26 = vpop.eup %3739  ;;  %v5411_v36 = vmul.f32 %v1962_v0, %v6557_v9  ;;  %2557 = vmatprep.mubr.bf16.mxu0 %v2195_v20  ;;  %v1593_v32 = vmul.f32 0.70710677, %v1316_v55  ;;  %v2196_v12 = vpack.c.bf16 %v5240_v6, %v5206_v2  ;;  %v1125_v11 = vadd.f32 %v5315_v50, %v4516_v16  ;;  %v5438_v19 = vpop.f32.mrf.mxu0 }
 0x1fc   :  { %2718 = vmatprep.mubr.bf16.mxu1 %v2197_v34  ;;  %v3742_v49 = vpop.eup %3741  ;;  %v5420_v62 = vmul.f32 %v1835_v24, %v5306_v40  ;;  %v1966_v38 = vmul.f32 %v1838_v17, %v5327_v58  ;;  %v1842_v39 = vadd.f32 1.0, %v3740_v26  ;;  %2558 = vmatmul.mubr.bf16.gmra.mxu0 %v2194_v18  ;;  %v1318_v0 = vadd.f32 %v5324_v3, %v4518_v37 }
 0x1fd   :  { %v5428_v2 = vmul.f32 %v1964_v63, %v6558_v59  ;;  %v1968_v6 = vmul.f32 %v1840_v51, %v5329_v48  ;;  %3753 = verf.f32 %v1591_v46  ;;  %2719 = vmatmul.mubr.bf16.gmra.mxu1 %v2196_v12  ;;  %v1594_v50 = vmul.f32 0.70710677, %v1125_v11  ;;  %v6559_v48 = vld [vmem:[#allocation99_spill] sm:$0xff]  ;;  %v6563_v59 = vld [vmem:[#allocation89_spill] sm:$0xff] }
 0x1fe   :  { %v1839_v60 = vadd.f32 1.0, %v3738_v4  ;;  %3755 = verf.f32 %v1593_v32  ;;  %v1596_v40 = vmul.f32 0.70710677, %v1318_v0  ;;  %v1127_v58 = vadd.f32 %v5345_v57, %v4528_v25  ;;  %v5447_v57 = vpop.f32.mrf.mxu1 }
 0x1ff   :  { %v3744_v24 = vpop.eup %3743  ;;  %v5434_v17 = vmul.f32 %v1837_v53, %v5317_v56  ;;  %v1841_v3 = vadd.f32 1.0, %v3742_v49  ;;  %3757 = verf.f32 %v1594_v50  ;;  %v1131_v63 = vadd.f32 %v5370_v27, %v4516_v16  ;;  %v6560_v56 = vld [vmem:[#allocation100_spill] sm:$0xff] }
 0x200   :  { %v5441_v1 = vmul.f32 %v1966_v38, %v6559_v48  ;;  %v1970_v51 = vmul.f32 %v1842_v39, %v5366_v22  ;;  %v5445_v20 = vmul.f32 0.5, %v5359_v31  ;;  %3759 = verf.f32 %v1596_v40  ;;  %v6561_v38 = vld [vmem:[#allocation103_spill] sm:$0xff] }
 0x201   :  { %v5450_v34 = vmul.f32 %v1968_v6, %v6560_v56  ;;  %v5452_v18 = vmul.f32 0.5, %v1123_v23  ;;  %v1595_v4 = vmul.f32 0.70710677, %v1127_v58  ;;  %v1320_v27 = vadd.f32 %v5353_v21, %v4530_v43  ;;  %v5470_v21 = vpop.f32.mrf.mxu0  ;;  %v5479_v6 = vpop.f32.mrf.mxu1 }
 0x202   :  { %v3746_v53 = vpop.eup %3745  ;;  %v5457_v46 = vmul.f32 %v1839_v60, %v5351_v44  ;;  %v1844_v22 = vadd.f32 1.0, %v3744_v24  ;;  %v5459_v26 = vmul.f32 0.5, %v1316_v55  ;;  %v1598_v31 = vmul.f32 0.70710677, %v1131_v63  ;;  %v6562_v55 = vld [vmem:[#allocation85_spill] sm:$0xff] }
 0x203   :  { %v3748_v9 = vpop.eup %3747  ;;  %v5462_v32 = vmul.f32 %v1841_v3, %v5364_v35  ;;  %v5464_v12 = vmul.f32 0.5, %v1125_v11  ;;  %v5466_v23 = vmul.f32 0.5, %v1318_v0  ;;  %v1324_v49 = vadd.f32 %v5380_v13, %v4518_v37  ;;  %v6564_v3 = vld [vmem:[#allocation86_spill] sm:$0xff] }
 0x204   :  { %v5473_v44 = vmul.f32 %v1970_v51, %v6561_v38  ;;  %3761 = verf.f32 %v1595_v4  ;;  %v2079_v39 = vmul.f32 %v5275_v54, %v6562_v55  ;;  %v2083_v35 = vmul.f32 %v5342_v15, %v6563_v59  ;;  %v6565_v51 = vld [vmem:[#allocation90_spill] sm:$0xff] }
 0x205   :  { %v3750_v11 = vpop.eup %3749  ;;  %v1843_v0 = vadd.f32 1.0, %v3746_v53  ;;  %v1597_v50 = vmul.f32 0.70710677, %v1320_v27  ;;  %3763 = verf.f32 %v1598_v31  ;;  %v1600_v60 = vmul.f32 0.70710677, %v1324_v49  ;;  %v5492_v53 = vpop.f32.mrf.mxu0 }
 0x206   :  { %v3752_v13 = vpop.eup %3751  ;;  %v1972_v40 = vmul.f32 %v1844_v22, %v5368_v5  ;;  %v2199_v24 = vpack.c.bf16 %v2083_v35, %v2079_v39  ;;  %v2081_v48 = vmul.f32 %v5304_v10, %v6564_v3  ;;  %v2085_v54 = vmul.f32 %v5348_v47, %v6565_v51  ;;  %v5496_v47 = vpop.f32.mrf.mxu1 }
 0x207   :  { %3765 = verf.f32 %v1600_v60  ;;  %v1133_v15 = vadd.f32 %v5396_v41, %v4528_v25  ;;  %v1326_v56 = vadd.f32 %v5402_v29, %v4530_v43  ;;  %v2198_v4 = vpack.c.bf16 %v5334_v45, %v5260_v28 }
 0x208   :  { %v1845_v5 = vadd.f32 1.0, %v3748_v9  ;;  %v1846_v22 = vadd.f32 1.0, %v3750_v11  ;;  %2565 = vmatprep.mubr.bf16.mxu0 %v2199_v24  ;;  %v2201_v31 = vpack.c.bf16 %v2085_v54, %v2081_v48  ;;  %v2200_v10 = vpack.c.bf16 %v5337_v30, %v5263_v42  ;;  %v6566_v30 = vld [vmem:[#allocation104_spill] sm:$0xff]  ;;  %v6567_v54 = vld [vmem:[#allocation107_spill] sm:$0xff] }
 0x209   :  { %v1848_v38 = vadd.f32 1.0, %v3752_v13  ;;  %3767 = verf.f32 %v1597_v50  ;;  %v1599_v41 = vmul.f32 0.70710677, %v1133_v15  ;;  %v1601_v55 = vmul.f32 0.70710677, %v1326_v56  ;;  %2566 = vmatmul.mubr.bf16.gmra.mxu0 %v2198_v4  ;;  %v5522_v13 = vpop.f32.mrf.mxu1 }
 0x20a   :  { %v3754_v29 = vpop.eup %3753  ;;  %v5498_v39 = vmul.f32 0.5, %v1127_v58  ;;  %v5500_v28 = vmul.f32 0.5, %v1320_v27  ;;  %2726 = vmatprep.mubr.bf16.mxu1 %v2201_v31  ;;  %v1135_v45 = vadd.f32 %v5417_v14, %v4516_v16  ;;  %v1328_v9 = vadd.f32 %v5425_v7, %v4518_v37  ;;  %v5516_v27 = vpop.f32.mrf.mxu0 }
 0x20b   :  { %v3756_v42 = vpop.eup %3755  ;;  %v5507_v59 = vmul.f32 %v1972_v40, %v6566_v30  ;;  %v5510_v35 = vmul.f32 %v1843_v0, %v5378_v52  ;;  %v5512_v11 = vmul.f32 0.5, %v1131_v63  ;;  %2727 = vmatmul.mubr.bf16.gmra.mxu1 %v2200_v10  ;;  %v1137_v58 = vadd.f32 %v5438_v19, %v4528_v25  ;;  %v6568_v10 = vld [vmem:[#allocation108_spill] sm:$0xff] }
 0x20c   :  { %v3758_v50 = vpop.eup %3757  ;;  %v5519_v14 = vmul.f32 %v1845_v5, %v5406_v33  ;;  %v1974_v7 = vmul.f32 %v1846_v22, %v5408_v61  ;;  %3769 = verf.f32 %v1599_v41  ;;  %v1602_v60 = vmul.f32 0.70710677, %v1135_v45  ;;  %v1146_v51 = vpop.f32.mrf.mxu0 }
 0x20d   :  { %v3760_v52 = vpop.eup %3759  ;;  %v1976_v63 = vmul.f32 %v1848_v38, %v5445_v20  ;;  %v1847_v0 = vadd.f32 1.0, %v3754_v29  ;;  %3771 = verf.f32 %v1601_v55  ;;  %v1604_v40 = vmul.f32 0.70710677, %v1328_v9  ;;  %v5540_v22 = vpop.f32.mrf.mxu1 }
 0x20e   :  { %v1849_v24 = vadd.f32 1.0, %v3756_v42  ;;  %v5525_v19 = vmul.f32 0.5, %v1324_v49  ;;  %3773 = verf.f32 %v1602_v60  ;;  %v1603_v3 = vmul.f32 0.70710677, %v1137_v58  ;;  %v6569_v60 = vld [vmem:[#allocation93_spill] sm:$0xff] }
 0x20f   :  { %v1850_v48 = vadd.f32 1.0, %v3758_v50  ;;  %v1852_v33 = vadd.f32 1.0, %v3760_v52  ;;  %3775 = verf.f32 %v1604_v40  ;;  %v1330_v61 = vadd.f32 %v5447_v57, %v4530_v43  ;;  %v6570_v52 = vld [vmem:[#allocation78_spill] sm:$0xff] }
 0x210   :  { %v5530_v4 = vmul.f32 %v1974_v7, %v6567_v54  ;;  %v5532_v5 = vmul.f32 0.5, %v1133_v15  ;;  %v1141_v20 = vadd.f32 %v5470_v21, %v4516_v16  ;;  %v5538_v49 = vadd.f32 %v5479_v6, %v4518_v37  ;;  %v5560_v7 = vpop.f32.mrf.mxu0 }
 0x211   :  { %v3762_v31 = vpop.eup %3761  ;;  %v5543_v38 = vmul.f32 %v1976_v63, %v6568_v10  ;;  %v5546_v57 = vmul.f32 %v1847_v0, %v5452_v18  ;;  %v5548_v41 = vmul.f32 0.5, %v1326_v56  ;;  %v5550_v15 = vmul.f32 0.5, %v1135_v45  ;;  %v6571_v63 = vld [vmem:[#allocation97_spill] sm:$0xff]  ;;  %v5566_v0 = vpop.f32.mrf.mxu1 }
 0x212   :  { %v3764_v55 = vpop.eup %3763  ;;  %v5553_v21 = vmul.f32 %v1849_v24, %v5459_v26  ;;  %v5555_v29 = vmul.f32 0.5, %v1328_v9  ;;  %3777 = verf.f32 %v1603_v3  ;;  %v1606_v6 = vmul.f32 0.70710677, %v1141_v20  ;;  %v6573_v24 = vld [vmem:[#allocation98_spill] sm:$0xff]  ;;  %v6574_v10 = vld [vmem:[#allocation77_spill] sm:$0xff] }
 0x213   :  { %v1978_v42 = vmul.f32 %v1850_v48, %v5464_v12  ;;  %v1980_v30 = vmul.f32 %v1852_v33, %v5466_v23  ;;  %v1605_v50 = vmul.f32 0.70710677, %v1330_v61  ;;  %v1608_v18 = vmul.f32 0.70710677, %v5538_v49  ;;  %v6572_v12 = vld [vmem:[#allocation94_spill] sm:$0xff] }
 0x214   :  { %v3766_v56 = vpop.eup %3765  ;;  %v1851_v45 = vadd.f32 1.0, %v3762_v31  ;;  %3779 = verf.f32 %v1606_v6  ;;  %v2087_v26 = vmul.f32 %v6570_v52, %v6569_v60  ;;  %v2091_v9 = vmul.f32 %v5420_v62, %v6571_v63  ;;  %v5580_v60 = vpop.f32.mrf.mxu0 }
 0x215   :  { %v1854_v40 = vadd.f32 1.0, %v3764_v55  ;;  %3781 = verf.f32 %v1608_v18  ;;  %v2089_v23 = vmul.f32 %v5383_v8, %v6572_v12  ;;  %v2093_v3 = vmul.f32 %v5434_v17, %v6573_v24  ;;  %v6575_v18 = vld [vmem:[#allocation79_spill] sm:$0xff]  ;;  %v5586_v63 = vpop.f32.mrf.mxu1 }
 0x216   :  { %v3768_v48 = vpop.eup %3767  ;;  %v2203_v33 = vpack.c.bf16 %v2091_v9, %v2087_v26  ;;  %v1143_v54 = vadd.f32 %v5492_v53, %v4528_v25  ;;  %v1336_v31 = vadd.f32 %v5496_v47, %v4530_v43  ;;  %v2202_v62 = vpack.c.bf16 %v5411_v36, %v6574_v10  ;;  %v6576_v9 = vld [vmem:[#allocation111_spill] sm:$0xff] }
 0x217   :  { %v1856_v6 = vadd.f32 1.0, %v3766_v56  ;;  %3783 = verf.f32 %v1605_v50  ;;  %v2205_v55 = vpack.c.bf16 %v2093_v3, %v2089_v23  ;;  %v2204_v8 = vpack.c.bf16 %v5428_v2, %v6575_v18  ;;  %v6577_v56 = vld [vmem:[#allocation112_spill] sm:$0xff]  ;;  %v6579_v18 = vld [vmem:[#allocation18_spill] sm:$0xff] }
 0x218   :  { %v5582_v17 = vmul.f32 0.5, %v1137_v58  ;;  %v5584_v52 = vmul.f32 0.5, %v1330_v61  ;;  %2573 = vmatprep.mubr.bf16.mxu0 %v2203_v33  ;;  %v1607_v53 = vmul.f32 0.70710677, %v1143_v54  ;;  %v1609_v26 = vmul.f32 0.70710677, %v1336_v31 }
 0x219   :  { %v3770_v47 = vpop.eup %3769  ;;  %v5589_v36 = vmul.f32 %v1978_v42, %v6576_v9  ;;  %v1853_v50 = vadd.f32 1.0, %v3768_v48  ;;  %2734 = vmatprep.mubr.bf16.mxu1 %v2205_v55  ;;  %2574 = vmatmul.mubr.bf16.gmra.mxu0 %v2202_v62  ;;  %v1145_v2 = vadd.f32 %v5516_v27, %v4516_v16  ;;  %v1338_v58 = vadd.f32 %v5522_v13, %v4518_v37  ;;  %v5606_v13 = vpop.f32.mrf.mxu0 }
 0x21a   :  { %v3772_v61 = vpop.eup %3771  ;;  %v5596_v12 = vmul.f32 %v1980_v30, %v6577_v56  ;;  %v1982_v23 = vmul.f32 %v1854_v40, %v5512_v11  ;;  %v5599_v24 = vmul.f32 0.5, %v1141_v20  ;;  %2735 = vmatmul.mubr.bf16.gmra.mxu1 %v2204_v8  ;;  %v1147_v42 = vadd.f32 %v1146_v51, %v4528_v25  ;;  %v5611_v20 = vpop.f32.mrf.mxu1 }
 0x21b   :  { %v3774_v3 = vpop.eup %3773  ;;  %v5603_v48 = vmul.f32 %v1851_v45, %v5498_v39  ;;  %v1984_v27 = vmul.f32 %v1856_v6, %v5525_v19  ;;  %3785 = verf.f32 %v1607_v53  ;;  %v1610_v33 = vmul.f32 0.70710677, %v1145_v2  ;;  %v6578_v19 = vld [vmem:[#allocation17_spill] sm:$0xff] }
 0x21c   :  { %v3776_v10 = vpop.eup %3775  ;;  %v1855_v30 = vadd.f32 1.0, %v3770_v47  ;;  %v5609_v62 = vmul.f32 0.5, %v5538_v49  ;;  %3787 = verf.f32 %v1609_v26  ;;  %v1612_v11 = vmul.f32 0.70710677, %v1338_v58  ;;  %v1156_v47 = vpop.f32.mrf.mxu0 }
 0x21d   :  { %v5614_v51 = vmul.f32 %v1853_v50, %v5500_v28  ;;  %v1857_v39 = vadd.f32 1.0, %v3772_v61  ;;  %3789 = verf.f32 %v1610_v33  ;;  %v1611_v45 = vmul.f32 0.70710677, %v1147_v42  ;;  %v5639_v56 = vpop.f32.mrf.mxu1 }
 0x21e   :  { %v5617_v40 = vmul.f32 %v1982_v23, %v6578_v19  ;;  %v1858_v6 = vadd.f32 1.0, %v3774_v3  ;;  %3791 = verf.f32 %v1612_v11  ;;  %v1340_v55 = vadd.f32 %v5540_v22, %v4530_v43 }
 0x21f   :  { %v3778_v49 = vpop.eup %3777  ;;  %v5622_v8 = vmul.f32 %v1984_v27, %v6579_v18  ;;  %v1860_v53 = vadd.f32 1.0, %v3776_v10  ;;  %v5624_v26 = vmul.f32 0.5, %v1143_v54  ;;  %v5626_v28 = vmul.f32 0.5, %v1336_v31 }
 0x220   :  { %v5629_v9 = vmul.f32 %v1855_v30, %v5532_v5  ;;  %v5631_v50 = vmul.f32 0.5, %v1145_v2  ;;  %v1151_v61 = vadd.f32 %v5560_v7, %v4516_v16  ;;  %v5637_v22 = vadd.f32 %v5566_v0, %v4518_v37  ;;  %v6581_v30 = vld [vmem:[#allocation101_spill] sm:$0xff] }
 0x221   :  { %6580 = vst [vmem:[#allocation80_spill] sm:$0xff] %v5622_v8  ;;  %v3780_v23 = vpop.eup %3779  ;;  %v5642_v54 = vmul.f32 %v1857_v39, %v5548_v41  ;;  %v5644_v31 = vmul.f32 0.5, %v1338_v58  ;;  %v5646_v3 = vmul.f32 0.5, %v1147_v42  ;;  %3793 = verf.f32 %v1611_v45  ;;  %v6582_v41 = vld [vmem:[#allocation105_spill] sm:$0xff]  ;;  %v1160_v39 = vpop.f32.mrf.mxu0  ;;  %v6583_v45 = vld [vmem:[#allocation102_spill] sm:$0xff] }
 0x222   :  { %v3782_v5 = vpop.eup %3781  ;;  %v1986_v2 = vmul.f32 %v1858_v6, %v5550_v15  ;;  %v1859_v27 = vadd.f32 1.0, %v3778_v49  ;;  %v1613_v7 = vmul.f32 0.70710677, %v1340_v55  ;;  %v1614_v33 = vmul.f32 0.70710677, %v1151_v61  ;;  %v6584_v15 = vld [vmem:[#allocation106_spill] sm:$0xff]  ;;  %v1353_v49 = vpop.f32.mrf.mxu1 }
 0x223   :  { %v1988_v0 = vmul.f32 %v1860_v53, %v5555_v29  ;;  %v1616_v10 = vmul.f32 0.70710677, %v5637_v22  ;;  %v2095_v11 = vmul.f32 %v5457_v46, %v6581_v30  ;;  %v2099_v58 = vmul.f32 %v5510_v35, %v6582_v41 }
 0x224   :  { %v3784_v42 = vpop.eup %3783  ;;  %3795 = verf.f32 %v1614_v33  ;;  %v2097_v19 = vmul.f32 %v5462_v32, %v6583_v45  ;;  %v2101_v6 = vmul.f32 %v5519_v14, %v6584_v15  ;;  %v1153_v29 = vadd.f32 %v5580_v60, %v4528_v25  ;;  %v5667_v60 = vpop.f32.mrf.mxu0 }
 0x225   :  { %v1862_v18 = vadd.f32 1.0, %v3780_v23  ;;  %3797 = verf.f32 %v1616_v10  ;;  %v2207_v53 = vpack.c.bf16 %v2099_v58, %v2095_v11  ;;  %v1346_v46 = vadd.f32 %v5586_v63, %v4530_v43  ;;  %v6585_v10 = vld [vmem:[#allocation21_spill] sm:$0xff] }
 0x226   :  { %v1864_v35 = vadd.f32 1.0, %v3782_v5  ;;  %3799 = verf.f32 %v1613_v7  ;;  %v2209_v30 = vpack.c.bf16 %v2101_v6, %v2097_v19  ;;  %v1615_v33 = vmul.f32 0.70710677, %v1153_v29  ;;  %v1355_v7 = vpop.f32.mrf.mxu1 }
 0x227   :  { %v1861_v41 = vadd.f32 1.0, %v3784_v42  ;;  %v5663_v8 = vmul.f32 0.5, %v1340_v55  ;;  %2581 = vmatprep.mubr.bf16.mxu0 %v2207_v53  ;;  %v1617_v32 = vmul.f32 0.70710677, %v1346_v46  ;;  %v2206_v14 = vpack.c.bf16 %v5473_v44, %v5441_v1 }
 0x228   :  { %v3786_v23 = vpop.eup %3785  ;;  %v5670_v11 = vmul.f32 %v1986_v2, %v6585_v10  ;;  %v5673_v63 = vmul.f32 %v1859_v27, %v5582_v17  ;;  %2742 = vmatprep.mubr.bf16.mxu1 %v2209_v30  ;;  %v2208_v5 = vpack.c.bf16 %v5507_v59, %v5450_v34  ;;  %v1155_v55 = vadd.f32 %v5606_v13, %v4516_v16  ;;  %v6586_v27 = vld [vmem:[#allocation22_spill] sm:$0xff] }
 0x229   :  { %v3788_v58 = vpop.eup %3787  ;;  %v1990_v1 = vmul.f32 %v1862_v18, %v5599_v24  ;;  %3801 = verf.f32 %v1615_v33  ;;  %2582 = vmatmul.mubr.bf16.gmra.mxu0 %v2206_v14  ;;  %v1348_v44 = vadd.f32 %v5611_v20, %v4518_v37  ;;  %v1157_v2 = vadd.f32 %v1156_v47, %v4528_v25  ;;  %v5692_v20 = vpop.f32.mrf.mxu0  ;;  %v6587_v18 = vld [vmem:[#allocation25_spill] sm:$0xff] }
 0x22a   :  { %v3790_v17 = vpop.eup %3789  ;;  %v5684_v42 = vmul.f32 %v1988_v0, %v6586_v27  ;;  %v1992_v34 = vmul.f32 %v1864_v35, %v5609_v62  ;;  %3803 = verf.f32 %v1617_v32  ;;  %2743 = vmatmul.mubr.bf16.gmra.mxu1 %v2208_v5  ;;  %v1618_v59 = vmul.f32 0.70710677, %v1155_v55  ;;  %v1357_v62 = vpop.f32.mrf.mxu1 }
 0x22b   :  { %v3792_v13 = vpop.eup %3791  ;;  %v5688_v45 = vmul.f32 %v1861_v41, %v5584_v52  ;;  %v1863_v24 = vadd.f32 1.0, %v3786_v23  ;;  %v5690_v19 = vmul.f32 0.5, %v1151_v61  ;;  %v1620_v15 = vmul.f32 0.70710677, %v1348_v44  ;;  %v6588_v61 = vld [vmem:[#allocation26_spill] sm:$0xff]  ;;  %v1166_v5 = vpop.f32.mrf.mxu0 }
 0x22c   :  { %v1865_v47 = vadd.f32 1.0, %v3788_v58  ;;  %v1866_v6 = vadd.f32 1.0, %v3790_v17  ;;  %v5695_v0 = vmul.f32 0.5, %v5637_v22  ;;  %3805 = verf.f32 %v1618_v59  ;;  %v5722_v27 = vpop.f32.mrf.mxu1 }
 0x22d   :  { %v5698_v53 = vmul.f32 %v1990_v1, %v6587_v18  ;;  %v1868_v35 = vadd.f32 1.0, %v3792_v13  ;;  %v5700_v30 = vmul.f32 0.5, %v1153_v29  ;;  %v1619_v52 = vmul.f32 0.70710677, %v1157_v2  ;;  %v6590_v13 = vld [vmem:[#allocation113_spill] sm:$0xff]  ;;  %v1170_v18 = vpop.f32.mrf.mxu0 }
 0x22e   :  { %v3794_v33 = vpop.eup %3793  ;;  %v5703_v41 = vmul.f32 %v1992_v34, %v6588_v61  ;;  %3807 = verf.f32 %v1620_v15  ;;  %v1350_v32 = vadd.f32 %v5639_v56, %v4530_v43  ;;  %v1161_v22 = vadd.f32 %v1160_v39, %v4516_v16 }
 0x22f   :  { %v5709_v14 = vmul.f32 %v1863_v24, %v5624_v26  ;;  %v5711_v23 = vmul.f32 0.5, %v1346_v46  ;;  %v5713_v10 = vmul.f32 0.5, %v1155_v55  ;;  %v1354_v29 = vadd.f32 %v1353_v49, %v4518_v37  ;;  %v6589_v49 = vld [vmem:[#allocation109_spill] sm:$0xff]  ;;  %v6591_v24 = vld [vmem:[#allocation110_spill] sm:$0xff] }
 0x230   :  { %v5717_v58 = vmul.f32 %v1865_v47, %v5626_v28  ;;  %v1994_v1 = vmul.f32 %v1866_v6, %v5631_v50  ;;  %v5720_v17 = vmul.f32 0.5, %v1348_v44  ;;  %v1622_v56 = vmul.f32 0.70710677, %v1161_v22  ;;  %v6592_v47 = vld [vmem:[#allocation16_spill] sm:$0xff] }
 0x231   :  { %v3796_v39 = vpop.eup %3795  ;;  %v1996_v26 = vmul.f32 %v1868_v35, %v5644_v31  ;;  %v1867_v46 = vadd.f32 1.0, %v3794_v33  ;;  %3809 = verf.f32 %v1619_v52  ;;  %v1624_v55 = vmul.f32 0.70710677, %v1354_v29 }
 0x232   :  { %v3798_v34 = vpop.eup %3797  ;;  %v1621_v59 = vmul.f32 0.70710677, %v1350_v32  ;;  %3811 = verf.f32 %v1622_v56  ;;  %v2103_v28 = vmul.f32 %v5546_v57, %v6589_v49  ;;  %v2107_v50 = vmul.f32 %v5603_v48, %v6590_v13  ;;  %v1363_v48 = vpop.f32.mrf.mxu1  ;;  %v6593_v13 = vld [vmem:[#allocation29_spill] sm:$0xff] }
 0x233   :  { %v3800_v44 = vpop.eup %3799  ;;  %3813 = verf.f32 %v1624_v55  ;;  %v2105_v15 = vmul.f32 %v5553_v21, %v6591_v24  ;;  %v2109_v31 = vmul.f32 %v5614_v51, %v6592_v47  ;;  %v1163_v6 = vadd.f32 %v5667_v60, %v4528_v25 }
 0x234   :  { %v1870_v35 = vadd.f32 1.0, %v3796_v39  ;;  %v2211_v52 = vpack.c.bf16 %v2107_v50, %v2103_v28  ;;  %v1356_v33 = vadd.f32 %v1355_v7, %v4530_v43  ;;  %v2210_v57 = vpack.c.bf16 %v5589_v36, %v5530_v4  ;;  %v6594_v28 = vld [vmem:[#allocation30_spill] sm:$0xff]  ;;  %v1365_v50 = vpop.f32.mrf.mxu1 }
 0x235   :  { %v1872_v61 = vadd.f32 1.0, %v3798_v34  ;;  %v5738_v56 = vmul.f32 0.5, %v1157_v2  ;;  %v2213_v55 = vpack.c.bf16 %v2109_v31, %v2105_v15  ;;  %v1623_v21 = vmul.f32 0.70710677, %v1163_v6 }
 0x236   :  { %v3802_v49 = vpop.eup %3801  ;;  %v5741_v51 = vmul.f32 %v1994_v1, %v6593_v13  ;;  %v1869_v24 = vadd.f32 1.0, %v3800_v44  ;;  %3815 = verf.f32 %v1621_v59  ;;  %2589 = vmatprep.mubr.bf16.mxu0 %v2211_v52  ;;  %v1625_v60 = vmul.f32 0.70710677, %v1356_v33  ;;  %v1172_v1 = vpop.f32.mrf.mxu0  ;;  %v6595_v52 = vld [vmem:[#allocation33_spill] sm:$0xff] }
 0x237   :  { %v3804_v39 = vpop.eup %3803  ;;  %v5744_v7 = vmul.f32 %v1996_v26, %v6594_v28  ;;  %v5747_v4 = vmul.f32 %v1867_v46, %v5646_v3  ;;  %v5749_v36 = vmul.f32 0.5, %v1350_v32  ;;  %2750 = vmatprep.mubr.bf16.mxu1 %v2213_v55  ;;  %2590 = vmatmul.mubr.bf16.gmra.mxu0 %v2210_v57  ;;  %v2212_v2 = vpack.c.bf16 %v5596_v12, %v5543_v38  ;;  %v6596_v55 = vld [vmem:[#allocation34_spill] sm:$0xff] }
 0x238   :  { %v1998_v34 = vmul.f32 %v1870_v35, %v5690_v19  ;;  %3817 = verf.f32 %v1623_v21  ;;  %v1165_v59 = vadd.f32 %v5692_v20, %v4516_v16  ;;  %v1358_v26 = vadd.f32 %v1357_v62, %v4518_v37  ;;  %v1174_v35 = vpop.f32.mrf.mxu0 }
 0x239   :  { %v3806_v44 = vpop.eup %3805  ;;  %v2000_v3 = vmul.f32 %v1872_v61, %v5695_v0  ;;  %v1871_v32 = vadd.f32 1.0, %v3802_v49  ;;  %3819 = verf.f32 %v1625_v60  ;;  %2751 = vmatmul.mubr.bf16.gmra.mxu1 %v2212_v2  ;;  %v1167_v46 = vadd.f32 %v1166_v5, %v4528_v25  ;;  %v1367_v61 = vpop.f32.mrf.mxu1 }
 0x23a   :  { %v5760_v38 = vmul.f32 %v1869_v24, %v5663_v8  ;;  %v1873_v12 = vadd.f32 1.0, %v3804_v39  ;;  %v5762_v19 = vmul.f32 0.5, %v1161_v22  ;;  %v1626_v15 = vmul.f32 0.70710677, %v1165_v59  ;;  %v1176_v2 = vpop.f32.mrf.mxu0 }
 0x23b   :  { %v3808_v47 = vpop.eup %3807  ;;  %v5764_v20 = vmul.f32 0.5, %v1354_v29  ;;  %v5766_v62 = vmul.f32 0.5, %v1163_v6  ;;  %v1628_v31 = vmul.f32 0.70710677, %v1358_v26  ;;  %v1171_v0 = vadd.f32 %v1170_v18, %v4516_v16 }
 0x23c   :  { %v5770_v57 = vmul.f32 %v1998_v34, %v6595_v52  ;;  %v1874_v5 = vadd.f32 1.0, %v3806_v44  ;;  %3821 = verf.f32 %v1626_v15  ;;  %v1627_v8 = vmul.f32 0.70710677, %v1167_v46  ;;  %v6597_v44 = vld [vmem:[#allocation19_spill] sm:$0xff]  ;;  %v6600_v52 = vld [vmem:[#allocation24_spill] sm:$0xff] }
 0x23d   :  { %v5773_v22 = vmul.f32 %v2000_v3, %v6596_v55  ;;  %v5776_v21 = vmul.f32 %v1871_v32, %v5700_v30  ;;  %v5778_v29 = vmul.f32 0.5, %v1356_v33  ;;  %v1360_v6 = vadd.f32 %v5722_v27, %v4530_v43  ;;  %v6598_v3 = vld [vmem:[#allocation23_spill] sm:$0xff] }
 0x23e   :  { %v3810_v18 = vpop.eup %3809  ;;  %v5783_v49 = vmul.f32 %v1873_v12, %v5711_v23  ;;  %v1876_v13 = vadd.f32 1.0, %v3808_v47  ;;  %v5785_v24 = vmul.f32 0.5, %v1165_v59  ;;  %v5787_v60 = vmul.f32 0.5, %v1358_v26  ;;  %v1369_v26 = vpop.f32.mrf.mxu1 }
 0x23f   :  { %v3812_v39 = vpop.eup %3811  ;;  %3823 = verf.f32 %v1628_v31  ;;  %v5789_v28 = vmul.f32 0.5, %v1167_v46  ;;  %v1630_v30 = vmul.f32 0.70710677, %v1171_v0  ;;  %v1364_v33 = vadd.f32 %v1363_v48, %v4518_v37  ;;  %v6599_v48 = vld [vmem:[#allocation20_spill] sm:$0xff] }
 0x240   :  { %v3814_v34 = vpop.eup %3813  ;;  %v2002_v27 = vmul.f32 %v1874_v5, %v5713_v10  ;;  %3825 = verf.f32 %v1627_v8  ;;  %v2111_v23 = vmul.f32 %v5629_v9, %v6597_v44  ;;  %v2115_v59 = vmul.f32 %v5673_v63, %v6598_v3  ;;  %v1373_v44 = vpop.f32.mrf.mxu1 }
 0x241   :  { %v1875_v32 = vadd.f32 1.0, %v3810_v18  ;;  %v1629_v12 = vmul.f32 0.70710677, %v1360_v6  ;;  %3827 = verf.f32 %v1630_v30  ;;  %v1632_v46 = vmul.f32 0.70710677, %v1364_v33  ;;  %v1180_v18 = vpop.f32.mrf.mxu0 }
 0x242   :  { %v2004_v15 = vmul.f32 %v1876_v13, %v5720_v17  ;;  %v2215_v47 = vpack.c.bf16 %v2115_v59, %v2111_v23  ;;  %v2113_v31 = vmul.f32 %v5642_v54, %v6599_v48  ;;  %v2117_v10 = vmul.f32 %v5688_v45, %v6600_v52  ;;  %v6601_v13 = vld [vmem:[#allocation80_spill] sm:$0xff]  ;;  %v1375_v52 = vpop.f32.mrf.mxu1 }
 0x243   :  { %v3816_v5 = vpop.eup %3815  ;;  %v1878_v8 = vadd.f32 1.0, %v3812_v39  ;;  %v1880_v9 = vadd.f32 1.0, %v3814_v34  ;;  %v1173_v55 = vadd.f32 %v1172_v1, %v4528_v25  ;;  %v1366_v63 = vadd.f32 %v1365_v50, %v4530_v43  ;;  %v6602_v50 = vld [vmem:[#allocation37_spill] sm:$0xff] }
 0x244   :  { %3829 = verf.f32 %v1632_v46  ;;  %2597 = vmatprep.mubr.bf16.mxu0 %v2215_v47  ;;  %v2217_v30 = vpack.c.bf16 %v2117_v10, %v2113_v31  ;;  %v2214_v17 = vpack.c.bf16 %v5670_v11, %v5617_v40  ;;  %v2216_v54 = vpack.c.bf16 %v5684_v42, %v6601_v13  ;;  %v6603_v47 = vld [vmem:[#allocation38_spill] sm:$0xff] }
 0x245   :  { %v3818_v23 = vpop.eup %3817  ;;  %v5808_v45 = vmul.f32 0.5, %v1360_v6  ;;  %3831 = verf.f32 %v1629_v12  ;;  %v5810_v39 = vmul.f32 0.5, %v1171_v0  ;;  %v1631_v1 = vmul.f32 0.70710677, %v1173_v55  ;;  %v1182_v12 = vpop.f32.mrf.mxu0  ;;  %v6605_v13 = vld [vmem:[#allocation42_spill] sm:$0xff] }
 0x246   :  { %v3820_v34 = vpop.eup %3819  ;;  %v5813_v3 = vmul.f32 %v2002_v27, %v6602_v50  ;;  %v1877_v59 = vadd.f32 1.0, %v3816_v5  ;;  %2758 = vmatprep.mubr.bf16.mxu1 %v2217_v30  ;;  %v1633_v46 = vmul.f32 0.70710677, %v1366_v63  ;;  %2598 = vmatmul.mubr.bf16.gmra.mxu0 %v2214_v17  ;;  %v1175_v40 = vadd.f32 %v1174_v35, %v4516_v16 }
 0x247   :  { %v5817_v11 = vmul.f32 %v1875_v32, %v5738_v56  ;;  %v2006_v42 = vmul.f32 %v1878_v8, %v5762_v19  ;;  %2759 = vmatmul.mubr.bf16.gmra.mxu1 %v2216_v54  ;;  %v1368_v0 = vadd.f32 %v1367_v61, %v4518_v37  ;;  %v1177_v6 = vadd.f32 %v1176_v2, %v4528_v25  ;;  %v1184_v30 = vpop.f32.mrf.mxu0 }
 0x248   :  { %v5823_v27 = vmul.f32 %v2004_v15, %v6603_v47  ;;  %v2008_v48 = vmul.f32 %v1880_v9, %v5764_v20  ;;  %3833 = verf.f32 %v1631_v1  ;;  %v1634_v31 = vmul.f32 0.70710677, %v1175_v40  ;;  %v6604_v15 = vld [vmem:[#allocation41_spill] sm:$0xff]  ;;  %v1377_v1 = vpop.f32.mrf.mxu1 }
 0x249   :  { %v3822_v35 = vpop.eup %3821  ;;  %v1879_v10 = vadd.f32 1.0, %v3818_v23  ;;  %v1881_v56 = vadd.f32 1.0, %v3820_v34  ;;  %3835 = verf.f32 %v1633_v46  ;;  %v1636_v32 = vmul.f32 0.70710677, %v1368_v0 }
 0x24a   :  { %v5827_v19 = vmul.f32 %v1877_v59, %v5749_v36  ;;  %3837 = verf.f32 %v1634_v31  ;;  %v1370_v61 = vadd.f32 %v1369_v26, %v4530_v43  ;;  %v1181_v2 = vadd.f32 %v1180_v18, %v4516_v16  ;;  %v1186_v31 = vpop.f32.mrf.mxu0 }
 0x24b   :  { %v5832_v5 = vmul.f32 %v2006_v42, %v6604_v15  ;;  %v1882_v20 = vadd.f32 1.0, %v3822_v35  ;;  %v5834_v8 = vmul.f32 0.5, %v1364_v33  ;;  %v1635_v9 = vmul.f32 0.70710677, %v1177_v6  ;;  %v6607_v35 = vld [vmem:[#allocation31_spill] sm:$0xff] }
 0x24c   :  { %v3824_v17 = vpop.eup %3823  ;;  %v5837_v54 = vmul.f32 %v2008_v48, %v6605_v13  ;;  %v5839_v23 = vmul.f32 0.5, %v1173_v55  ;;  %v5841_v36 = vmul.f32 0.5, %v1366_v63  ;;  %v1374_v26 = vadd.f32 %v1373_v44, %v4518_v37  ;;  %v6606_v48 = vld [vmem:[#allocation27_spill] sm:$0xff]  ;;  %v6609_v13 = vld [vmem:[#allocation32_spill] sm:$0xff] }
 0x24d   :  { %v3826_v18 = vpop.eup %3825  ;;  %v5845_v34 = vmul.f32 %v1879_v10, %v5766_v62  ;;  %v5848_v33 = vmul.f32 %v1881_v56, %v5778_v29  ;;  %v5850_v50 = vmul.f32 0.5, %v1175_v40  ;;  %3839 = verf.f32 %v1636_v32  ;;  %v6608_v32 = vld [vmem:[#allocation28_spill] sm:$0xff] }
 0x24e   :  { %v3828_v59 = vpop.eup %3827  ;;  %v5852_v46 = vmul.f32 0.5, %v1368_v0  ;;  %v5854_v55 = vmul.f32 0.5, %v1177_v6  ;;  %v1637_v63 = vmul.f32 0.70710677, %v1370_v61  ;;  %v1638_v42 = vmul.f32 0.70710677, %v1181_v2  ;;  %v1379_v0 = vpop.f32.mrf.mxu1 }
 0x24f   :  { %v2010_v44 = vmul.f32 %v1882_v20, %v5785_v24  ;;  %v1884_v47 = vadd.f32 1.0, %v3824_v17  ;;  %3841 = verf.f32 %v1635_v9  ;;  %v2119_v62 = vmul.f32 %v5709_v14, %v6606_v48 }
 0x250   :  { %v1883_v29 = vadd.f32 1.0, %v3826_v18  ;;  %3843 = verf.f32 %v1638_v42  ;;  %v1640_v40 = vmul.f32 0.70710677, %v1374_v26  ;;  %v2123_v10 = vmul.f32 %v5747_v4, %v6607_v35 }
 0x251   :  { %v3830_v56 = vpop.eup %3829  ;;  %v1886_v6 = vadd.f32 1.0, %v3828_v59  ;;  %v2121_v15 = vmul.f32 %v5717_v58, %v6608_v32  ;;  %v2125_v24 = vmul.f32 %v5760_v38, %v6609_v13  ;;  %v1183_v20 = vadd.f32 %v1182_v12, %v4528_v25  ;;  %v1190_v58 = vpop.f32.mrf.mxu0 }
 0x252   :  { %v3832_v9 = vpop.eup %3831  ;;  %3845 = verf.f32 %v1637_v63  ;;  %v2219_v14 = vpack.c.bf16 %v2123_v10, %v2119_v62  ;;  %v1376_v17 = vadd.f32 %v1375_v52, %v4530_v43  ;;  %v2218_v18 = vpack.c.bf16 %v5741_v51, %v5698_v53  ;;  %v1383_v63 = vpop.f32.mrf.mxu1 }
 0x253   :  { %v2012_v4 = vmul.f32 %v1884_v47, %v5787_v60  ;;  %v5870_v42 = vmul.f32 0.5, %v1370_v61  ;;  %3847 = verf.f32 %v1640_v40  ;;  %v2221_v59 = vpack.c.bf16 %v2125_v24, %v2121_v15  ;;  %v6610_v61 = vld [vmem:[#allocation45_spill] sm:$0xff] }
 0x254   :  { %v1888_v48 = vadd.f32 1.0, %v3830_v56  ;;  %2605 = vmatprep.mubr.bf16.mxu0 %v2219_v14  ;;  %v1639_v38 = vmul.f32 0.70710677, %v1183_v20  ;;  %v1641_v35 = vmul.f32 0.70710677, %v1376_v17  ;;  %v2220_v12 = vpack.c.bf16 %v5744_v7, %v5703_v41 }
 0x255   :  { %v3834_v62 = vpop.eup %3833  ;;  %v1885_v52 = vadd.f32 1.0, %v3832_v9  ;;  %v5874_v10 = vmul.f32 0.5, %v1181_v2  ;;  %2766 = vmatprep.mubr.bf16.mxu1 %v2221_v59  ;;  %2606 = vmatmul.mubr.bf16.gmra.mxu0 %v2218_v18  ;;  %v1185_v53 = vadd.f32 %v1184_v30, %v4516_v16  ;;  %v1378_v51 = vadd.f32 %v1377_v1, %v4518_v37  ;;  %v1192_v1 = vpop.f32.mrf.mxu0  ;;  %v6612_v9 = vld [vmem:[#allocation49_spill] sm:$0xff] }
 0x256   :  { %v3836_v60 = vpop.eup %3835  ;;  %v5879_v47 = vmul.f32 %v2010_v44, %v6610_v61  ;;  %v5882_v40 = vmul.f32 %v1883_v29, %v5789_v28  ;;  %v2014_v41 = vmul.f32 %v1886_v6, %v5810_v39  ;;  %2767 = vmatmul.mubr.bf16.gmra.mxu1 %v2220_v12  ;;  %v1187_v7 = vadd.f32 %v1186_v31, %v4528_v25  ;;  %v1385_v28 = vpop.f32.mrf.mxu1  ;;  %v6611_v29 = vld [vmem:[#allocation46_spill] sm:$0xff] }
 0x257   :  { %v3838_v2 = vpop.eup %3837  ;;  %v5886_v56 = vmul.f32 0.5, %v1374_v26  ;;  %3849 = verf.f32 %v1639_v38  ;;  %v1642_v32 = vmul.f32 0.70710677, %v1185_v53  ;;  %v1380_v30 = vadd.f32 %v1379_v0, %v4530_v43 }
 0x258   :  { %v2016_v15 = vmul.f32 %v1888_v48, %v5834_v8  ;;  %v1887_v44 = vadd.f32 1.0, %v3834_v62  ;;  %3851 = verf.f32 %v1641_v35  ;;  %v1644_v13 = vmul.f32 0.70710677, %v1378_v51  ;;  %v1194_v48 = vpop.f32.mrf.mxu0  ;;  %v6613_v35 = vld [vmem:[#allocation50_spill] sm:$0xff] }
 0x259   :  { %v5891_v24 = vmul.f32 %v2012_v4, %v6611_v29  ;;  %v1889_v39 = vadd.f32 1.0, %v3836_v60  ;;  %3853 = verf.f32 %v1642_v32  ;;  %v1643_v31 = vmul.f32 0.70710677, %v1187_v7  ;;  %v1387_v60 = vpop.f32.mrf.mxu1  ;;  %v6617_v29 = vld [vmem:[#allocation40_spill] sm:$0xff] }
 0x25a   :  { %v3840_v6 = vpop.eup %3839  ;;  %v5894_v26 = vmul.f32 %v1885_v52, %v5808_v45  ;;  %v5897_v14 = vmul.f32 %v2014_v41, %v6612_v9  ;;  %v1890_v0 = vadd.f32 1.0, %v3838_v2  ;;  %3855 = verf.f32 %v1644_v13  ;;  %v6616_v13 = vld [vmem:[#allocation36_spill] sm:$0xff] }
 0x25b   :  { %v5899_v8 = vmul.f32 0.5, %v1183_v20  ;;  %v5901_v18 = vmul.f32 0.5, %v1376_v17  ;;  %v1645_v59 = vmul.f32 0.70710677, %v1380_v30  ;;  %v1191_v4 = vadd.f32 %v1190_v58, %v4516_v16 }
 0x25c   :  { %v3842_v38 = vpop.eup %3841  ;;  %v5905_v12 = vmul.f32 %v2016_v15, %v6613_v35  ;;  %v5908_v45 = vmul.f32 %v1887_v44, %v5839_v23  ;;  %v5910_v62 = vmul.f32 0.5, %v1185_v53  ;;  %v1384_v52 = vadd.f32 %v1383_v63, %v4518_v37  ;;  %v6614_v15 = vld [vmem:[#allocation35_spill] sm:$0xff] }
 0x25d   :  { %v3844_v20 = vpop.eup %3843  ;;  %v5914_v17 = vmul.f32 %v1889_v39, %v5841_v36  ;;  %v1892_v61 = vadd.f32 1.0, %v3840_v6  ;;  %v5916_v41 = vmul.f32 0.5, %v1378_v51  ;;  %3857 = verf.f32 %v1643_v31  ;;  %v6615_v44 = vld [vmem:[#allocation39_spill] sm:$0xff]  ;;  %v1196_v39 = vpop.f32.mrf.mxu0 }
 0x25e   :  { %v2018_v58 = vmul.f32 %v1890_v0, %v5850_v50  ;;  %v1646_v2 = vmul.f32 0.70710677, %v1191_v4  ;;  %v1648_v32 = vmul.f32 0.70710677, %v1384_v52  ;;  %v2127_v23 = vmul.f32 %v5776_v21, %v6614_v15  ;;  %v1389_v0 = vpop.f32.mrf.mxu1 }
 0x25f   :  { %v3846_v53 = vpop.eup %3845  ;;  %3859 = verf.f32 %v1645_v59  ;;  %v2131_v63 = vmul.f32 %v5817_v11, %v6615_v44  ;;  %v2129_v36 = vmul.f32 %v5783_v49, %v6616_v13  ;;  %v2133_v51 = vmul.f32 %v5827_v19, %v6617_v29 }
 0x260   :  { %v3848_v31 = vpop.eup %3847  ;;  %v1891_v6 = vadd.f32 1.0, %v3842_v38  ;;  %v1894_v50 = vadd.f32 1.0, %v3844_v20  ;;  %3861 = verf.f32 %v1646_v2  ;;  %v1193_v9 = vadd.f32 %v1192_v1, %v4528_v25  ;;  %v1200_v2 = vpop.f32.mrf.mxu0 }
 0x261   :  { %3863 = verf.f32 %v1648_v32  ;;  %v2223_v21 = vpack.c.bf16 %v2131_v63, %v2127_v23  ;;  %v2225_v59 = vpack.c.bf16 %v2133_v51, %v2129_v36  ;;  %v1386_v35 = vadd.f32 %v1385_v28, %v4530_v43  ;;  %v6618_v28 = vld [vmem:[#allocation53_spill] sm:$0xff] }
 0x262   :  { %v2020_v11 = vmul.f32 %v1892_v61, %v5852_v46  ;;  %v5930_v15 = vmul.f32 0.5, %v1187_v7  ;;  %v5932_v49 = vmul.f32 0.5, %v1380_v30  ;;  %v1647_v19 = vmul.f32 0.70710677, %v1193_v9  ;;  %v1393_v61 = vpop.f32.mrf.mxu1 }
 0x263   :  { %v1896_v44 = vadd.f32 1.0, %v3848_v31  ;;  %2613 = vmatprep.mubr.bf16.mxu0 %v2223_v21  ;;  %2774 = vmatprep.mubr.bf16.mxu1 %v2225_v59  ;;  %v1649_v38 = vmul.f32 0.70710677, %v1386_v35  ;;  %v2222_v1 = vpack.c.bf16 %v5813_v3, %v5770_v57  ;;  %v2224_v20 = vpack.c.bf16 %v5823_v27, %v5773_v22  ;;  %v6619_v27 = vld [vmem:[#allocation54_spill] sm:$0xff]  ;;  %v1202_v31 = vpop.f32.mrf.mxu0  ;;  %v6620_v21 = vld [vmem:[#allocation57_spill] sm:$0xff] }
 0x264   :  { %v3850_v32 = vpop.eup %3849  ;;  %v5939_v23 = vmul.f32 %v2018_v58, %v6618_v28  ;;  %v5942_v46 = vmul.f32 %v1891_v6, %v5854_v55  ;;  %v1893_v7 = vadd.f32 1.0, %v3846_v53  ;;  %v1195_v30 = vadd.f32 %v1194_v48, %v4516_v16 }
 0x265   :  { %v3852_v63 = vpop.eup %3851  ;;  %v2022_v13 = vmul.f32 %v1894_v50, %v5874_v10  ;;  %3865 = verf.f32 %v1647_v19  ;;  %2614 = vmatmul.mubr.bf16.gmra.mxu0 %v2222_v1  ;;  %2775 = vmatmul.mubr.bf16.gmra.mxu1 %v2224_v20  ;;  %v1388_v57 = vadd.f32 %v1387_v60, %v4518_v37  ;;  %v5948_v22 = vadd.f32 %v1196_v39, %v4528_v25  ;;  %v1395_v50 = vpop.f32.mrf.mxu1 }
 0x266   :  { %v3854_v3 = vpop.eup %3853  ;;  %v5951_v58 = vmul.f32 %v2020_v11, %v6619_v27  ;;  %v5953_v55 = vmul.f32 0.5, %v1191_v4  ;;  %3867 = verf.f32 %v1649_v38  ;;  %v1650_v48 = vmul.f32 0.70710677, %v1195_v30  ;;  %v6621_v38 = vld [vmem:[#allocation58_spill] sm:$0xff] }
 0x267   :  { %v3856_v53 = vpop.eup %3855  ;;  %v2024_v36 = vmul.f32 %v1896_v44, %v5886_v56  ;;  %v1895_v10 = vadd.f32 1.0, %v3850_v32  ;;  %v5956_v29 = vmul.f32 0.5, %v1384_v52  ;;  %v1652_v51 = vmul.f32 0.70710677, %v1388_v57 }
 0x268   :  { %v5959_v60 = vmul.f32 %v1893_v7, %v5870_v42  ;;  %v1897_v39 = vadd.f32 1.0, %v3852_v63  ;;  %v1898_v6 = vadd.f32 1.0, %v3854_v3  ;;  %3869 = verf.f32 %v1650_v48  ;;  %v1204_v7 = vpop.f32.mrf.mxu0 }
 0x269   :  { %v5962_v4 = vmul.f32 %v2022_v13, %v6620_v21  ;;  %v1900_v59 = vadd.f32 1.0, %v3856_v53  ;;  %3871 = verf.f32 %v1652_v51  ;;  %v1651_v11 = vmul.f32 0.70710677, %v5948_v22  ;;  %v1397_v13 = vpop.f32.mrf.mxu1 }
 0x26a   :  { %v3858_v56 = vpop.eup %3857  ;;  %v5965_v19 = vmul.f32 0.5, %v1193_v9  ;;  %v5967_v52 = vmul.f32 0.5, %v1386_v35  ;;  %v1390_v44 = vadd.f32 %v1389_v0, %v4530_v43  ;;  %v1201_v42 = vadd.f32 %v1200_v2, %v4516_v16  ;;  %v1206_v21 = vpop.f32.mrf.mxu0 }
 0x26b   :  { %v5972_v1 = vmul.f32 %v2024_v36, %v6621_v38  ;;  %v5975_v20 = vmul.f32 %v1895_v10, %v5899_v8  ;;  %v5977_v32 = vmul.f32 0.5, %v1195_v30  ;;  %v1394_v28 = vadd.f32 %v1393_v61, %v4518_v37  ;;  %v6622_v36 = vld [vmem:[#allocation43_spill] sm:$0xff] }
 0x26c   :  { %v3860_v63 = vpop.eup %3859  ;;  %v5981_v9 = vmul.f32 %v1897_v39, %v5901_v18  ;;  %v2026_v35 = vmul.f32 %v1898_v6, %v5910_v62  ;;  %v5984_v0 = vmul.f32 0.5, %v1388_v57  ;;  %v1654_v2 = vmul.f32 0.70710677, %v1201_v42  ;;  %v6623_v18 = vld [vmem:[#allocation47_spill] sm:$0xff]  ;;  %v6624_v62 = vld [vmem:[#allocation44_spill] sm:$0xff] }
 0x26d   :  { %v3862_v3 = vpop.eup %3861  ;;  %v2028_v27 = vmul.f32 %v1900_v59, %v5916_v41  ;;  %v1899_v8 = vadd.f32 1.0, %v3858_v56  ;;  %3873 = verf.f32 %v1651_v11  ;;  %v1656_v30 = vmul.f32 0.70710677, %v1394_v28  ;;  %v6625_v39 = vld [vmem:[#allocation48_spill] sm:$0xff]  ;;  %v1399_v56 = vpop.f32.mrf.mxu1 }
 0x26e   :  { %v3864_v48 = vpop.eup %3863  ;;  %v1902_v53 = vadd.f32 1.0, %v3862_v3  ;;  %v1653_v61 = vmul.f32 0.70710677, %v1390_v44  ;;  %v2135_v10 = vmul.f32 %v5845_v34, %v6622_v36  ;;  %v2139_v51 = vmul.f32 %v5882_v40, %v6623_v18 }
 0x26f   :  { %3875 = verf.f32 %v1654_v2  ;;  %v2137_v57 = vmul.f32 %v5848_v33, %v6624_v62  ;;  %v2141_v6 = vmul.f32 %v5894_v26, %v6625_v39  ;;  %v1203_v41 = vadd.f32 %v1202_v31, %v4528_v25  ;;  %v6626_v33 = vld [vmem:[#allocation61_spill] sm:$0xff] }
 0x270   :  { %3877 = verf.f32 %v1656_v30  ;;  %v2227_v59 = vpack.c.bf16 %v2139_v51, %v2135_v10  ;;  %v1396_v11 = vadd.f32 %v1395_v50, %v4530_v43  ;;  %v2226_v34 = vpack.c.bf16 %v5879_v47, %v5832_v5  ;;  %v6627_v10 = vld [vmem:[#allocation62_spill] sm:$0xff]  ;;  %v6628_v39 = vld [vmem:[#allocation65_spill] sm:$0xff] }
 0x271   :  { %v1901_v38 = vadd.f32 1.0, %v3860_v63  ;;  %v1904_v40 = vadd.f32 1.0, %v3864_v48  ;;  %v2229_v2 = vpack.c.bf16 %v2141_v6, %v2137_v57  ;;  %v1655_v3 = vmul.f32 0.70710677, %v1203_v41  ;;  %v1210_v63 = vpop.f32.mrf.mxu0 }
 0x272   :  { %v3866_v36 = vpop.eup %3865  ;;  %v6000_v18 = vmul.f32 %v2026_v35, %v6626_v33  ;;  %v6003_v26 = vmul.f32 0.5, %v5948_v22  ;;  %v6005_v31 = vmul.f32 0.5, %v1390_v44  ;;  %2621 = vmatprep.mubr.bf16.mxu0 %v2227_v59  ;;  %v1657_v30 = vmul.f32 0.70710677, %v1396_v11 }
 0x273   :  { %v3868_v50 = vpop.eup %3867  ;;  %v6008_v51 = vmul.f32 %v2028_v27, %v6627_v10  ;;  %v6011_v5 = vmul.f32 %v1899_v8, %v5930_v15  ;;  %3879 = verf.f32 %v1653_v61  ;;  %2782 = vmatprep.mubr.bf16.mxu1 %v2229_v2  ;;  %2622 = vmatmul.mubr.bf16.gmra.mxu0 %v2226_v34  ;;  %v2228_v47 = vpack.c.bf16 %v5891_v24, %v5837_v54  ;;  %v1403_v27 = vpop.f32.mrf.mxu1  ;;  %v6629_v34 = vld [vmem:[#allocation66_spill] sm:$0xff] }
 0x274   :  { %v2030_v22 = vmul.f32 %v1902_v53, %v5953_v55  ;;  %v6016_v44 = vmul.f32 0.5, %v1201_v42  ;;  %v1205_v35 = vadd.f32 %v1204_v7, %v4516_v16  ;;  %v1398_v48 = vadd.f32 %v1397_v13, %v4518_v37 }
 0x275   :  { %v3870_v62 = vpop.eup %3869  ;;  %v6021_v15 = vmul.f32 %v1901_v38, %v5932_v49  ;;  %v2032_v8 = vmul.f32 %v1904_v40, %v5956_v29  ;;  %3881 = verf.f32 %v1655_v3  ;;  %2783 = vmatmul.mubr.bf16.gmra.mxu1 %v2228_v47  ;;  %v1207_v54 = vadd.f32 %v1206_v21, %v4528_v25  ;;  %v1212_v49 = vpop.f32.mrf.mxu0 }
 0x276   :  { %v3872_v24 = vpop.eup %3871  ;;  %v1903_v61 = vadd.f32 1.0, %v3866_v36  ;;  %v1905_v55 = vadd.f32 1.0, %v3868_v50  ;;  %3883 = verf.f32 %v1657_v30  ;;  %v1658_v42 = vmul.f32 0.70710677, %v1205_v35  ;;  %v1405_v59 = vpop.f32.mrf.mxu1 }
 0x277   :  { %v6025_v53 = vmul.f32 0.5, %v1394_v28  ;;  %v1660_v7 = vmul.f32 0.70710677, %v1398_v48  ;;  %v1400_v13 = vadd.f32 %v1399_v56, %v4530_v43  ;;  %v1211_v57 = vadd.f32 %v1210_v63, %v4516_v16  ;;  %v1214_v47 = vpop.f32.mrf.mxu0 }
 0x278   :  { %v6030_v6 = vmul.f32 %v2030_v22, %v6628_v39  ;;  %v6032_v29 = vmul.f32 0.5, %v1203_v41  ;;  %3885 = verf.f32 %v1658_v42  ;;  %v1659_v21 = vmul.f32 0.70710677, %v1207_v54  ;;  %v6630_v22 = vld [vmem:[#allocation51_spill] sm:$0xff]  ;;  %v6632_v42 = vld [vmem:[#allocation52_spill] sm:$0xff] }
 0x279   :  { %v6035_v38 = vmul.f32 %v2032_v8, %v6629_v34  ;;  %v1906_v40 = vadd.f32 1.0, %v3870_v62  ;;  %v1908_v28 = vadd.f32 1.0, %v3872_v24  ;;  %v6037_v2 = vmul.f32 0.5, %v1396_v11  ;;  %v6631_v62 = vld [vmem:[#allocation55_spill] sm:$0xff]  ;;  %v1216_v34 = vpop.f32.mrf.mxu0 }
 0x27a   :  { %v3874_v3 = vpop.eup %3873  ;;  %v6040_v56 = vmul.f32 %v1903_v61, %v5965_v19  ;;  %v6043_v36 = vmul.f32 %v1905_v55, %v5967_v52  ;;  %v6045_v33 = vmul.f32 0.5, %v1205_v35  ;;  %v6047_v41 = vmul.f32 0.5, %v1398_v48  ;;  %v1407_v35 = vpop.f32.mrf.mxu1 }
 0x27b   :  { %3887 = verf.f32 %v1660_v7  ;;  %v1661_v30 = vmul.f32 0.70710677, %v1400_v13  ;;  %v1662_v50 = vmul.f32 0.70710677, %v1211_v57  ;;  %v1404_v10 = vadd.f32 %v1403_v27, %v4518_v37  ;;  %v6633_v7 = vld [vmem:[#allocation56_spill] sm:$0xff] }
 0x27c   :  { %v3876_v63 = vpop.eup %3875  ;;  %v6050_v11 = vmul.f32 0.5, %v1207_v54  ;;  %3889 = verf.f32 %v1659_v21  ;;  %v2143_v19 = vmul.f32 %v5908_v45, %v6630_v22  ;;  %v2147_v52 = vmul.f32 %v5942_v46, %v6631_v62  ;;  %v6635_v62 = vld [vmem:[#allocation72_spill] sm:$0xff] }
 0x27d   :  { %v3878_v8 = vpop.eup %3877  ;;  %v2034_v48 = vmul.f32 %v1906_v40, %v5977_v32  ;;  %v2036_v24 = vmul.f32 %v1908_v28, %v5984_v0  ;;  %v1907_v61 = vadd.f32 1.0, %v3874_v3  ;;  %3891 = verf.f32 %v1662_v50  ;;  %v1409_v3 = vpop.f32.mrf.mxu1  ;;  %v6634_v50 = vld [vmem:[#allocation71_spill] sm:$0xff] }
 0x27e   :  { %v1664_v27 = vmul.f32 0.70710677, %v1404_v10  ;;  %v2231_v55 = vpack.c.bf16 %v2147_v52, %v2143_v19  ;;  %v2145_v54 = vmul.f32 %v5914_v17, %v6632_v42  ;;  %v2149_v39 = vmul.f32 %v5959_v60, %v6633_v7 }
 0x27f   :  { %v1910_v45 = vadd.f32 1.0, %v3876_v63  ;;  %3893 = verf.f32 %v1661_v30  ;;  %v1213_v46 = vadd.f32 %v1212_v49, %v4528_v25  ;;  %v1406_v21 = vadd.f32 %v1405_v59, %v4530_v43 }
 0x280   :  { %v3880_v32 = vpop.eup %3879  ;;  %v1912_v40 = vadd.f32 1.0, %v3878_v8  ;;  %2629 = vmatprep.mubr.bf16.mxu0 %v2231_v55  ;;  %v2233_v0 = vpack.c.bf16 %v2149_v39, %v2145_v54  ;;  %v2230_v28 = vpack.c.bf16 %v5939_v23, %v5897_v14  ;;  %v2232_v17 = vpack.c.bf16 %v5951_v58, %v5905_v12 }
 0x281   :  { %v6069_v60 = vmul.f32 %v2034_v48, %v6634_v50  ;;  %v6071_v30 = vmul.f32 0.5, %v1400_v13  ;;  %v6073_v49 = vmul.f32 0.5, %v1211_v57  ;;  %v1663_v59 = vmul.f32 0.70710677, %v1213_v46  ;;  %v1220_v57 = vpop.f32.mrf.mxu0 }
 0x282   :  { %v3882_v63 = vpop.eup %3881  ;;  %v6076_v22 = vmul.f32 %v1907_v61, %v6003_v26  ;;  %3895 = verf.f32 %v1664_v27  ;;  %2790 = vmatprep.mubr.bf16.mxu1 %v2233_v0  ;;  %v1665_v19 = vmul.f32 0.70710677, %v1406_v21  ;;  %2630 = vmatmul.mubr.bf16.gmra.mxu0 %v2230_v28  ;;  %v1215_v14 = vadd.f32 %v1214_v47, %v4516_v16  ;;  %v1413_v61 = vpop.f32.mrf.mxu1 }
 0x283   :  { %v3884_v12 = vpop.eup %3883  ;;  %v1909_v23 = vadd.f32 1.0, %v3880_v32  ;;  %3897 = verf.f32 %v1663_v59  ;;  %2791 = vmatmul.mubr.bf16.gmra.mxu1 %v2232_v17  ;;  %v1408_v58 = vadd.f32 %v1407_v35, %v4518_v37  ;;  %v1217_v13 = vadd.f32 %v1216_v34, %v4528_v25  ;;  %v6636_v34 = vld [vmem:[#allocation122_spill] sm:$0xff] }
 0x284   :  { %v6082_v52 = vmul.f32 %v2036_v24, %v6635_v62  ;;  %v2038_v26 = vmul.f32 %v1910_v45, %v6016_v44  ;;  %v2040_v8 = vmul.f32 %v1912_v40, %v6025_v53  ;;  %v1666_v48 = vmul.f32 0.70710677, %v1215_v14  ;;  %v1222_v53 = vpop.f32.mrf.mxu0  ;;  %v6637_v40 = vld [vmem:[#allocation123_spill] sm:$0xff]  ;;  %v1415_v17 = vpop.f32.mrf.mxu1 }
 0x285   :  { %v3886_v27 = vpop.eup %3885  ;;  %v1911_v47 = vadd.f32 1.0, %v3882_v63  ;;  %3899 = verf.f32 %v1665_v19  ;;  %v1668_v55 = vmul.f32 0.70710677, %v1408_v58  ;;  %v1667_v42 = vmul.f32 0.70710677, %v1217_v13 }
 0x286   :  { %v1913_v54 = vadd.f32 1.0, %v3884_v12  ;;  %3901 = verf.f32 %v1666_v48  ;;  %v1410_v35 = vadd.f32 %v1409_v3, %v4530_v43  ;;  %v6088_v7 = vadd.f32 %v1220_v57, %v4516_v16 }
 0x287   :  { %v6091_v24 = vmul.f32 %v1909_v23, %v6005_v31  ;;  %v1914_v44 = vadd.f32 1.0, %v3886_v27  ;;  %v6093_v39 = vmul.f32 0.5, %v1404_v10  ;;  %3903 = verf.f32 %v1668_v55  ;;  %v1417_v27 = vpop.f32.mrf.mxu1  ;;  %v6640_v55 = vld [vmem:[#allocation60_spill] sm:$0xff] }
 0x288   :  { %v3888_v45 = vpop.eup %3887  ;;  %v6096_v32 = vmul.f32 %v2038_v26, %v6636_v34  ;;  %v6099_v0 = vmul.f32 %v2040_v8, %v6637_v40  ;;  %3905 = verf.f32 %v1667_v42  ;;  %v6102_v28 = vadd.f32 %v1413_v61, %v4518_v37  ;;  %v6638_v61 = vld [vmem:[#allocation59_spill] sm:$0xff]  ;;  %v6641_v42 = vld [vmem:[#allocation64_spill] sm:$0xff]  ;;  %v6642_v34 = vld [vmem:[#allocation126_spill] sm:$0xff] }
 0x289   :  { %v3890_v3 = vpop.eup %3889  ;;  %v6105_v31 = vmul.f32 %v1911_v47, %v6032_v29  ;;  %v6107_v10 = vmul.f32 0.5, %v1213_v46  ;;  %v6109_v50 = vmul.f32 0.5, %v1406_v21  ;;  %v1669_v59 = vmul.f32 0.70710677, %v1410_v35  ;;  %v1224_v46 = vpop.f32.mrf.mxu0 }
 0x28a   :  { %v3892_v63 = vpop.eup %3891  ;;  %v6112_v19 = vmul.f32 %v1913_v54, %v6037_v2  ;;  %v6114_v12 = vmul.f32 0.5, %v1215_v14  ;;  %v6116_v23 = vmul.f32 0.5, %v1408_v58  ;;  %v1670_v57 = vmul.f32 0.70710677, %v6088_v7  ;;  %v6639_v14 = vld [vmem:[#allocation63_spill] sm:$0xff] }
 0x28b   :  { %v2042_v62 = vmul.f32 %v1914_v44, %v6045_v33  ;;  %v1916_v26 = vadd.f32 1.0, %v3888_v45  ;;  %v6120_v29 = vmul.f32 0.5, %v1217_v13  ;;  %3907 = verf.f32 %v1669_v59 }
 0x28c   :  { %v3894_v21 = vpop.eup %3893  ;;  %v1915_v8 = vadd.f32 1.0, %v3890_v3  ;;  %v1672_v48 = vmul.f32 0.70710677, %v6102_v28  ;;  %v2151_v2 = vmul.f32 %v5975_v20, %v6638_v61  ;;  %v2155_v58 = vmul.f32 %v6011_v5, %v6639_v14 }
 0x28d   :  { %v1918_v47 = vadd.f32 1.0, %v3892_v63  ;;  %v2153_v33 = vmul.f32 %v5981_v9, %v6640_v55  ;;  %v2157_v13 = vmul.f32 %v6021_v15, %v6641_v42  ;;  %v6132_v54 = vadd.f32 %v1222_v53, %v4528_v25  ;;  %v1226_v15 = vpop.f32.mrf.mxu0 }
 0x28e   :  { %3909 = verf.f32 %v1670_v57  ;;  %v2235_v44 = vpack.c.bf16 %v2155_v58, %v2151_v2  ;;  %v6135_v45 = vadd.f32 %v1415_v17, %v4530_v43  ;;  %v2234_v20 = vpack.c.bf16 %v6000_v18, %v5962_v4  ;;  %v1419_v4 = vpop.f32.mrf.mxu1 }
 0x28f   :  { %v3896_v5 = vpop.eup %3895  ;;  %v6140_v40 = vmul.f32 %v2042_v62, %v6642_v34  ;;  %v2044_v9 = vmul.f32 %v1916_v26, %v6047_v41  ;;  %v1917_v3 = vadd.f32 1.0, %v3894_v21  ;;  %v2237_v59 = vpack.c.bf16 %v2157_v13, %v2153_v33 }
 0x290   :  { %v3898_v63 = vpop.eup %3897  ;;  %3911 = verf.f32 %v1672_v48  ;;  %2637 = vmatprep.mubr.bf16.mxu0 %v2235_v44  ;;  %v1671_v53 = vmul.f32 0.70710677, %v6132_v54  ;;  %v1673_v17 = vmul.f32 0.70710677, %v6135_v45  ;;  %v2236_v57 = vpack.c.bf16 %v6008_v51, %v5972_v1 }
 0x291   :  { %v2046_v18 = vmul.f32 %v1918_v47, %v6073_v49  ;;  %v1541_v62 = vmul.f32 0.5, %v1410_v35  ;;  %2798 = vmatprep.mubr.bf16.mxu1 %v2237_v59  ;;  %2638 = vmatmul.mubr.bf16.gmra.mxu0 %v2234_v20  ;;  %v6149_v41 = vadd.f32 %v1224_v46, %v4516_v16  ;;  %v6152_v26 = vadd.f32 %v1417_v27, %v4518_v37  ;;  %v6643_v37 = vld [vmem:[#allocation127_spill] sm:$0xff] }
 0x292   :  { %v3900_v21 = vpop.eup %3899  ;;  %v2043_v48 = vmul.f32 %v1915_v8, %v6050_v11  ;;  %v1920_v61 = vadd.f32 1.0, %v3896_v5  ;;  %3913 = verf.f32 %v1671_v53  ;;  %2799 = vmatmul.mubr.bf16.gmra.mxu1 %v2236_v57  ;;  %v6156_v1 = vadd.f32 %v1226_v15, %v4528_v25  ;;  %v6644_v25 = vld [vmem:[#allocation130_spill] sm:$0xff]  ;;  %v6649_v53 = vld [vmem:[#allocation121_spill] sm:$0xff] }
 0x293   :  { %v3902_v51 = vpop.eup %3901  ;;  %v1919_v49 = vadd.f32 1.0, %v3898_v63  ;;  %3915 = verf.f32 %v1673_v17  ;;  %v1674_v35 = vmul.f32 0.70710677, %v6149_v41  ;;  %v6160_v16 = vadd.f32 %v1419_v4, %v4530_v43  ;;  %v6645_v5 = vld [vmem:[#allocation134_spill] sm:$0xff]  ;;  %v6648_v63 = vld [vmem:[#allocation68_spill] sm:$0xff] }
 0x294   :  { %v3904_v46 = vpop.eup %3903  ;;  %v6163_v2 = vmul.f32 %v2044_v9, %v6643_v37  ;;  %v2045_v11 = vmul.f32 %v1917_v3, %v6071_v30  ;;  %v1922_v8 = vadd.f32 1.0, %v3902_v51  ;;  %v1676_v14 = vmul.f32 0.70710677, %v6152_v26  ;;  %v6646_v3 = vld [vmem:[#allocation67_spill] sm:$0xff] }
 0x295   :  { %v3906_v58 = vpop.eup %3905  ;;  %v6168_v27 = vmul.f32 %v2046_v18, %v6644_v25  ;;  %v1924_v47 = vadd.f32 1.0, %v3904_v46  ;;  %3917 = verf.f32 %v1674_v35  ;;  %v1675_v55 = vmul.f32 0.70710677, %v6156_v1 }
 0x296   :  { %v2048_v43 = vmul.f32 %v1920_v61, %v6093_v39  ;;  %v2050_v33 = vmul.f32 %v1922_v8, %v6114_v12  ;;  %v1923_v42 = vadd.f32 1.0, %v3906_v58  ;;  %3919 = verf.f32 %v1676_v14  ;;  %v6647_v39 = vld [vmem:[#allocation75_spill] sm:$0xff]  ;;  %v6650_v61 = vld [vmem:[#allocation124_spill] sm:$0xff] }
 0x297   :  { %v2047_v13 = vmul.f32 %v1919_v49, %v6107_v10  ;;  %v1921_v30 = vadd.f32 1.0, %v3900_v21  ;;  %3921 = verf.f32 %v1675_v55  ;;  %v1677_v44 = vmul.f32 0.70710677, %v6160_v16  ;;  %v6651_v49 = vld [vmem:[#allocation128_spill] sm:$0xff]  ;;  %v6657_v14 = vld [vmem:[#allocation131_spill] sm:$0xff] }
 0x298   :  { %v3908_v20 = vpop.eup %3907  ;;  %v6176_v34 = vmul.f32 %v2050_v33, %v6645_v5  ;;  %v2052_v9 = vmul.f32 %v1924_v47, %v6116_v23  ;;  %v2159_v59 = vmul.f32 %v6040_v56, %v6646_v3  ;;  %v2163_v12 = vmul.f32 %v6076_v22, %v6647_v39  ;;  %v6658_v47 = vld [vmem:[#allocation73_spill] sm:$0xff]  ;;  %v6659_v55 = vld [vmem:[#allocation115_spill] sm:$0xff] }
 0x299   :  { %v1925_v15 = vadd.f32 1.0, %v3908_v20  ;;  %3923 = verf.f32 %v1677_v44  ;;  %v2161_v10 = vmul.f32 %v6043_v36, %v6648_v63  ;;  %v2165_v17 = vmul.f32 %v6091_v24, %v6649_v53  ;;  %v6652_v24 = vld [vmem:[#allocation135_spill] sm:$0xff]  ;;  %v6662_v20 = vld [vmem:[#allocation132_spill] sm:$0xff]  ;;  %v6663_v3 = vld [vmem:[#allocation69_spill] sm:$0xff] }
 0x29a   :  { %v2051_v57 = vmul.f32 %v1923_v42, %v6120_v29  ;;  %v2239_v4 = vpack.c.bf16 %v2163_v12, %v2159_v59  ;;  %v2238_v23 = vpack.c.bf16 %v6069_v60, %v6030_v6  ;;  %v2240_v56 = vpack.c.bf16 %v6082_v52, %v6035_v38  ;;  %v6653_v29 = vld [vmem:[#allocation125_spill] sm:$0xff]  ;;  %v6660_v42 = vld [vmem:[#allocation136_spill] sm:$0xff]  ;;  %v6665_v12 = vld [vmem:[#allocation118_spill] sm:$0xff] }
 0x29b   :  { %v3910_v18 = vpop.eup %3909  ;;  %v2053_v21 = vmul.f32 %v1925_v15, %v1541_v62  ;;  %v2241_v22 = vpack.c.bf16 %v2165_v17, %v2161_v10  ;;  %v2167_v51 = vmul.f32 %v6105_v31, %v6650_v61  ;;  %v2171_v36 = vmul.f32 %v2043_v48, %v6651_v49  ;;  %v6654_v60 = vld [vmem:[#allocation129_spill] sm:$0xff]  ;;  %v6656_v48 = vld [vmem:[#allocation114_spill] sm:$0xff] }
 0x29c   :  { %v2049_v35 = vmul.f32 %v1921_v30, %v6109_v50  ;;  %v6197_v46 = vmul.f32 %v2052_v9, %v6652_v24  ;;  %2645 = vmatprep.mubr.bf16.mxu0 %v2239_v4  ;;  %v2169_v6 = vmul.f32 %v6112_v19, %v6653_v29  ;;  %v2173_v37 = vmul.f32 %v2045_v11, %v6654_v60  ;;  %v6655_v50 = vld [vmem:[#allocation70_spill] sm:$0xff]  ;;  %v6664_v59 = vld [vmem:[#allocation117_spill] sm:$0xff] }
 0x29d   :  { %v3912_v38 = vpop.eup %3911  ;;  %2806 = vmatprep.mubr.bf16.mxu1 %v2241_v22  ;;  %2646 = vmatmul.mubr.bf16.gmra.mxu0 %v2238_v23  ;;  %v2243_v52 = vpack.c.bf16 %v2171_v36, %v2167_v51  ;;  %v2242_v31 = vpack.c.bf16 %v6140_v40, %v6096_v32  ;;  %v2244_v62 = vpack.c.bf16 %v6163_v2, %v6099_v0  ;;  %v1926_v25 = vadd.f32 1.0, %v3910_v18  ;;  %v6661_v32 = vld [vmem:[#allocation137_spill] sm:$0xff] }
 0x29e   :  { %v814_v8 = vadd.f32 %v6656_v48, %v6655_v50  ;;  %v6209_v58 = vmul.f32 %v2048_v43, %v6657_v14  ;;  %2807 = vmatmul.mubr.bf16.gmra.mxu1 %v2240_v56  ;;  %v2245_v19 = vpack.c.bf16 %v2173_v37, %v2169_v6  ;;  %v623_v33 = vadd.f32 %v6659_v55, %v6658_v47  ;;  %v6666_v10 = vld [vmem:[#allocation133_spill] sm:$0xff] }
 0x29f   :  { %v3914_v11 = vpop.eup %3913  ;;  %2653 = vmatprep.mubr.bf16.mxu0 %v2243_v52  ;;  %v2179_v30 = vmul.f32 %v2051_v57, %v6660_v42  ;;  %v2181_v40 = vmul.f32 %v2053_v21, %v6661_v32  ;;  %v2246_v0 = vpack.c.bf16 %v6176_v34, %v6168_v27  ;;  %v1542_v44 = vmul.f32 0.5, %v6088_v7 }
 0x2a0   :  { %v3916_v2 = vpop.eup %3915  ;;  %v1928_v43 = vadd.f32 1.0, %v3912_v38  ;;  %2814 = vmatprep.mubr.bf16.mxu1 %v2245_v19  ;;  %v2175_v5 = vmul.f32 %v2047_v13, %v6662_v20  ;;  %v2248_v9 = vpack.c.bf16 %v6197_v46, %v6209_v58  ;;  %v625_v39 = vadd.f32 %v6664_v59, %v6663_v3  ;;  %v6667_v46 = vld [vmem:[#allocation119_spill] sm:$0xff] }
 0x2a1   :  { %v818_v15 = vadd.f32 %v6665_v12, %v6655_v50  ;;  %v1927_v63 = vadd.f32 1.0, %v3914_v11  ;;  %v2177_v53 = vmul.f32 %v2049_v35, %v6666_v10  ;;  %v2054_v34 = vmul.f32 %v1926_v25, %v1542_v44  ;;  %v6669_v50 = vld [vmem:[#allocation74_spill] sm:$0xff] }
 0x2a2   :  { %v3918_v27 = vpop.eup %3917  ;;  %v1544_v7 = vmul.f32 0.5, %v6102_v28  ;;  %v1543_v17 = vmul.f32 0.5, %v6132_v54  ;;  %v2247_v57 = vpack.c.bf16 %v2179_v30, %v2175_v5  ;;  %v1929_v4 = vadd.f32 1.0, %v3916_v2 }
 0x2a3   :  { %v3920_v13 = vpop.eup %3919  ;;  %v1546_v23 = vmul.f32 0.5, %v6149_v41  ;;  %v1930_v56 = vadd.f32 1.0, %v3918_v27  ;;  %v2249_v18 = vpack.c.bf16 %v2181_v40, %v2177_v53  ;;  %v1545_v61 = vmul.f32 0.5, %v6135_v45  ;;  %v6668_v41 = vld [vmem:[#allocation138_spill] sm:$0xff] }
 0x2a4   :  { %v3922_v21 = vpop.eup %3921  ;;  %v2056_v22 = vmul.f32 %v1928_v43, %v1544_v7  ;;  %v1548_v51 = vmul.f32 0.5, %v6152_v26  ;;  %v1932_v49 = vadd.f32 1.0, %v3920_v13  ;;  %v2055_v36 = vmul.f32 %v1927_v63, %v1543_v17 }
 0x2a5   :  { %v2058_v35 = vmul.f32 %v1930_v56, %v1546_v23  ;;  %v1547_v28 = vmul.f32 0.5, %v6156_v1  ;;  %v1931_v24 = vadd.f32 1.0, %v3922_v21  ;;  %2654 = vmatmul.mubr.bf16.gmra.mxu0 %v2242_v31  ;;  %v627_v29 = vadd.f32 %v6667_v46, %v6658_v47  ;;  %v6670_v1 = vld [vmem:[#allocation116_spill] sm:$0xff] }
 0x2a6   :  { %v3924_v54 = vpop.eup %3923  ;;  %v2182_v6 = vmul.f32 %v2054_v34, %v6668_v41  ;;  %v2060_v60 = vmul.f32 %v1932_v49, %v1548_v51  ;;  %v1549_v37 = vmul.f32 0.5, %v6160_v16  ;;  %2815 = vmatmul.mubr.bf16.gmra.mxu1 %v2244_v62  ;;  %2661 = vmatprep.mubr.bf16.mxu0 %v2247_v57  ;;  %v2057_v45 = vmul.f32 %v1929_v4, %v1545_v61  ;;  %v6671_v31 = vld [vmem:[#allocation120_spill] sm:$0xff] }
 0x2a7   :  { %v2186_v26 = vmul.f32 %v2058_v35, %v625_v39  ;;  %v2059_v38 = vmul.f32 %v1931_v24, %v1547_v28  ;;  %v1933_v52 = vadd.f32 1.0, %v3924_v54  ;;  %2822 = vmatprep.mubr.bf16.mxu1 %v2249_v18  ;;  %v816_v48 = vadd.f32 %v6670_v1, %v6669_v50 }
 0x2a8   :  { %v820_v14 = vadd.f32 %v6671_v31, %v6669_v50  ;;  %v2184_v58 = vmul.f32 %v2056_v22, %v814_v8  ;;  %v2188_v25 = vmul.f32 %v2060_v60, %v818_v15  ;;  %v2183_v11 = vmul.f32 %v2055_v36, %v623_v33  ;;  %v6243_v8 = vld [vmem:[%s6289_s6] ss:$0 sm:$0xff]  ;;  %s4063_s6 = smov [#allocation11]  }
 0x2a9   :  { %v2061_v19 = vmul.f32 %v1933_v52, %v1549_v37  ;;  %v2187_v47 = vmul.f32 %v2059_v38, %v627_v29  ;;  %v2250_v55 = vpack.c.bf16 %v2186_v26, %v2182_v6  ;;  %v2185_v30 = vmul.f32 %v2057_v45, %v816_v48  ;;  %s3004_s28 = sshll.u32 %s4063_s6, 4  ;;  %s3005_s28 = int_to_ptr.vmem [resolvable:$true] %s3004_s28 }
 0x2aa   :  { %v2252_v16 = vpack.c.bf16 %v2188_v25, %v2184_v58  ;;  %s4025_s29 = scalar_lea.vmem %s3005_s28, 2048  ;;  %p4030_p12 = scmp.lt.s32.totalorder %s3005_s28, %s3005_s28 }
 0x2ab   :  { %v2251_v42 = vpack.c.bf16 %v2187_v47, %v2183_v11  ;;  %v2189_v32 = vmul.f32 %v2061_v19, %v820_v14  ;;  %p4026_p11 = scmp.ne.s32.totalorder %s3005_s28, %s4025_s29  ;;  %p4031_p13 = scmp.lt.s32.totalorder %s4025_s29, %s4025_s29 }
 0x2ac   :  { %v3306_v62 = vpop.f32.mrf.mxu0 }
 0x2ad   :  { %2662 = vmatmul.mubr.bf16.gmra.mxu0 %v2246_v0  ;;  %v2253_v44 = vpack.c.bf16 %v2189_v32, %v2185_v30  ;;  %p4032_p0 = por %p4031_p13, %p4030_p12 }
 0x2ae   :  { %v3418_v40 = vpop.f32.mrf.mxu1  ;;  %v3307_v2 = vpop.f32.mrf.mxu0  ;;  %2823 = vmatmul.mubr.bf16.gmra.mxu1 %v2248_v9  ;;  %2669 = vmatprep.mubr.bf16.mxu0 %v2251_v42 }
 0x2af   :  { %v3308_v43 = vadd.f32 %v3307_v2, %v3306_v62  ;;  %2830 = vmatprep.mubr.bf16.mxu1 %v2253_v44  ;;  %p4033_p1 = pnand %p4032_p0, %p4026_p11 }
 0x2b0   :  { %v3419_v33 = vpop.f32.mrf.mxu1  ;;  %v3309_v20 = vpop.f32.mrf.mxu0 }
 0x2b1   :  { %v2552_v59 = vadd.f32 %v3308_v43, %v6243_v8  ;;  %v3420_v15 = vadd.f32 %v3419_v33, %v3418_v40 }
 0x2b2   :  { %v3421_v5 = vpop.f32.mrf.mxu1  ;;  %v3310_v3 = vpop.f32.mrf.mxu0 }
 0x2b3   :  { %v3311_v39 = vadd.f32 %v3310_v3, %v3309_v20  ;;  %v2713_v9 = vadd.f32 %v3420_v15, %v2552_v59 }
 0x2b4   :  { %v3422_v12 = vpop.f32.mrf.mxu1 }
 0x2b5   :  { %v2555_v0 = vadd.f32 %v3311_v39, %v6243_v8  ;;  %v3423_v63 = vadd.f32 %v3422_v12, %v3421_v5  ;;  %2670 = vmatmul.mubr.bf16.gmra.mxu0 %v2250_v55 }
 0x2b6   :  { %2831 = vmatmul.mubr.bf16.gmra.mxu1 %v2252_v16 }
 0x2b7   :  { %v2716_v10 = vadd.f32 %v3423_v63, %v2555_v0 }
 0x2b9   :  { %v3198_v53 = vpack.c.bf16 %v2716_v10, %v2713_v9 }
 0x2bb   :  { %3199 = vst [vmem:[#allocation11] sm:$0xff] %v3198_v53  }
 0x2bc   :  { %v3312_v27 = vpop.f32.mrf.mxu0 }
 0x2bd   :  { %v3424_v34 = vpop.f32.mrf.mxu1 }
 0x2be   :  { %v3313_v7 = vpop.f32.mrf.mxu0 }
 0x2bf   :  { %v3314_v17 = vadd.f32 %v3313_v7, %v3312_v27  ;;  %v3425_v57 = vpop.f32.mrf.mxu1 }
 0x2c0   :  { %v3315_v13 = vpop.f32.mrf.mxu0  ;;  %v3426_v22 = vadd.f32 %v3425_v57, %v3424_v34 }
 0x2c1   :  { %v3427_v4 = vpop.f32.mrf.mxu1  ;;  %v2560_v56 = vadd.f32 %v3314_v17, %v6243_v8 }
 0x2c2   :  { %v3316_v23 = vpop.f32.mrf.mxu0 }
 0x2c3   :  { %v3317_v18 = vadd.f32 %v3316_v23, %v3315_v13  ;;  %v3428_v21 = vpop.f32.mrf.mxu1  ;;  %v2721_v49 = vadd.f32 %v3426_v22, %v2560_v56 }
 0x2c4   :  { %v3429_v51 = vadd.f32 %v3428_v21, %v3427_v4 }
 0x2c5   :  { %v2563_v61 = vadd.f32 %v3317_v18, %v6243_v8 }
 0x2c7   :  { %v2724_v36 = vadd.f32 %v3429_v51, %v2563_v61 }
 0x2c9   :  { %v3203_v35 = vpack.c.bf16 %v2724_v36, %v2721_v49  ;;  %v3318_v28 = vpop.f32.mrf.mxu0 }
 0x2cb   :  { %3275 = vst [vmem:[#allocation11 + $0x8] sm:$0xff] %v3203_v35   ;;  %v3430_v24 = vpop.f32.mrf.mxu1  ;;  %v3319_v54 = vpop.f32.mrf.mxu0 }
 0x2cc   :  { %v3320_v46 = vadd.f32 %v3319_v54, %v3318_v28 }
 0x2cd   :  { %v3431_v29 = vpop.f32.mrf.mxu1  ;;  %v3321_v41 = vpop.f32.mrf.mxu0 }
 0x2ce   :  { %v2568_v37 = vadd.f32 %v3320_v46, %v6243_v8  ;;  %v3432_v38 = vadd.f32 %v3431_v29, %v3430_v24 }
 0x2cf   :  { %v3433_v6 = vpop.f32.mrf.mxu1  ;;  %v3322_v60 = vpop.f32.mrf.mxu0 }
 0x2d0   :  { %v3323_v45 = vadd.f32 %v3322_v60, %v3321_v41  ;;  %v2729_v1 = vadd.f32 %v3432_v38, %v2568_v37 }
 0x2d1   :  { %v3434_v26 = vpop.f32.mrf.mxu1 }
 0x2d2   :  { %v2571_v52 = vadd.f32 %v3323_v45, %v6243_v8  ;;  %v3435_v50 = vadd.f32 %v3434_v26, %v3433_v6 }
 0x2d4   :  { %v2732_v48 = vadd.f32 %v3435_v50, %v2571_v52 }
 0x2d6   :  { %v3208_v31 = vpack.c.bf16 %v2732_v48, %v2729_v1 }
 0x2d8   :  { %3276 = vst [vmem:[#allocation11 + $0x10] sm:$0xff] %v3208_v31  }
 0x2d9   :  { %v3324_v14 = vpop.f32.mrf.mxu0 }
 0x2da   :  { %v3436_v58 = vpop.f32.mrf.mxu1 }
 0x2db   :  { %v3325_v25 = vpop.f32.mrf.mxu0 }
 0x2dc   :  { %v3326_v19 = vadd.f32 %v3325_v25, %v3324_v14  ;;  %v3437_v11 = vpop.f32.mrf.mxu1 }
 0x2dd   :  { %v3327_v47 = vpop.f32.mrf.mxu0  ;;  %v3438_v32 = vadd.f32 %v3437_v11, %v3436_v58 }
 0x2de   :  { %v3439_v55 = vpop.f32.mrf.mxu1  ;;  %v2576_v62 = vadd.f32 %v3326_v19, %v6243_v8 }
 0x2df   :  { %v3328_v16 = vpop.f32.mrf.mxu0 }
 0x2e0   :  { %v3329_v42 = vadd.f32 %v3328_v16, %v3327_v47  ;;  %v3440_v30 = vpop.f32.mrf.mxu1  ;;  %v2737_v44 = vadd.f32 %v3438_v32, %v2576_v62 }
 0x2e1   :  { %v3441_v2 = vadd.f32 %v3440_v30, %v3439_v55 }
 0x2e2   :  { %v2579_v40 = vadd.f32 %v3329_v42, %v6243_v8 }
 0x2e4   :  { %v2740_v43 = vadd.f32 %v3441_v2, %v2579_v40 }
 0x2e6   :  { %v3213_v33 = vpack.c.bf16 %v2740_v43, %v2737_v44 }
 0x2e8   :  { %3277 = vst [vmem:[#allocation11 + $0x18] sm:$0xff] %v3213_v33  }
 0x2e9   :  { %v3330_v20 = vpop.f32.mrf.mxu0 }
 0x2ea   :  { %v3442_v5 = vpop.f32.mrf.mxu1 }
 0x2eb   :  { %v3331_v3 = vpop.f32.mrf.mxu0 }
 0x2ec   :  { %v3332_v59 = vadd.f32 %v3331_v3, %v3330_v20  ;;  %v3443_v39 = vpop.f32.mrf.mxu1 }
 0x2ed   :  { %v3333_v12 = vpop.f32.mrf.mxu0  ;;  %v3444_v53 = vadd.f32 %v3443_v39, %v3442_v5 }
 0x2ee   :  { %v3445_v15 = vpop.f32.mrf.mxu1  ;;  %v2584_v63 = vadd.f32 %v3332_v59, %v6243_v8 }
 0x2ef   :  { %v3334_v0 = vpop.f32.mrf.mxu0 }
 0x2f0   :  { %v3335_v9 = vadd.f32 %v3334_v0, %v3333_v12  ;;  %v3446_v10 = vpop.f32.mrf.mxu1  ;;  %v2745_v7 = vadd.f32 %v3444_v53, %v2584_v63 }
 0x2f1   :  { %v3447_v34 = vadd.f32 %v3446_v10, %v3445_v15 }
 0x2f2   :  { %v2587_v27 = vadd.f32 %v3335_v9, %v6243_v8 }
 0x2f4   :  { %v2748_v17 = vadd.f32 %v3447_v34, %v2587_v27 }
 0x2f6   :  { %v3218_v57 = vpack.c.bf16 %v2748_v17, %v2745_v7 }
 0x2f7   :  { %v3336_v13 = vpop.f32.mrf.mxu0 }
 0x2f8   :  { %3278 = vst [vmem:[#allocation11 + $0x20] sm:$0xff] %v3218_v57  }
 0x2f9   :  { %v3448_v4 = vpop.f32.mrf.mxu1  ;;  %v3337_v23 = vpop.f32.mrf.mxu0 }
 0x2fa   :  { %v3338_v56 = vadd.f32 %v3337_v23, %v3336_v13 }
 0x2fb   :  { %v3449_v18 = vpop.f32.mrf.mxu1  ;;  %v3339_v21 = vpop.f32.mrf.mxu0 }
 0x2fc   :  { %v2592_v51 = vadd.f32 %v3338_v56, %v6243_v8  ;;  %v3450_v35 = vadd.f32 %v3449_v18, %v3448_v4 }
 0x2fd   :  { %v3451_v22 = vpop.f32.mrf.mxu1  ;;  %v3340_v61 = vpop.f32.mrf.mxu0 }
 0x2fe   :  { %v3341_v49 = vadd.f32 %v3340_v61, %v3339_v21  ;;  %v2753_v54 = vadd.f32 %v3450_v35, %v2592_v51 }
 0x2ff   :  { %v3452_v36 = vpop.f32.mrf.mxu1 }
 0x300   :  { %v2595_v28 = vadd.f32 %v3341_v49, %v6243_v8  ;;  %v3453_v24 = vadd.f32 %v3452_v36, %v3451_v22 }
 0x302   :  { %v2756_v46 = vadd.f32 %v3453_v24, %v2595_v28 }
 0x304   :  { %v3223_v29 = vpack.c.bf16 %v2756_v46, %v2753_v54 }
 0x306   :  { %3279 = vst [vmem:[#allocation11 + $0x28] sm:$0xff] %v3223_v29   ;;  %v3342_v41 = vpop.f32.mrf.mxu0 }
 0x307   :  { %v3454_v6 = vpop.f32.mrf.mxu1 }
 0x308   :  { %v3343_v60 = vpop.f32.mrf.mxu0 }
 0x309   :  { %v3344_v37 = vadd.f32 %v3343_v60, %v3342_v41  ;;  %v3455_v45 = vpop.f32.mrf.mxu1 }
 0x30a   :  { %v3345_v26 = vpop.f32.mrf.mxu0  ;;  %v3456_v31 = vadd.f32 %v3455_v45, %v3454_v6 }
 0x30b   :  { %v3457_v38 = vpop.f32.mrf.mxu1  ;;  %v2600_v50 = vadd.f32 %v3344_v37, %v6243_v8 }
 0x30c   :  { %v3346_v52 = vpop.f32.mrf.mxu0 }
 0x30d   :  { %v3347_v1 = vadd.f32 %v3346_v52, %v3345_v26  ;;  %v3458_v48 = vpop.f32.mrf.mxu1  ;;  %v2761_v25 = vadd.f32 %v3456_v31, %v2600_v50 }
 0x30e   :  { %v3459_v58 = vadd.f32 %v3458_v48, %v3457_v38 }
 0x30f   :  { %v2603_v14 = vadd.f32 %v3347_v1, %v6243_v8 }
 0x311   :  { %v2764_v19 = vadd.f32 %v3459_v58, %v2603_v14 }
 0x313   :  { %v3228_v11 = vpack.c.bf16 %v2764_v19, %v2761_v25 }
 0x315   :  { %3280 = vst [vmem:[#allocation11 + $0x30] sm:$0xff] %v3228_v11   ;;  %v3348_v47 = vpop.f32.mrf.mxu0 }
 0x316   :  { %v3460_v55 = vpop.f32.mrf.mxu1 }
 0x317   :  { %v3349_v16 = vpop.f32.mrf.mxu0 }
 0x318   :  { %v3350_v62 = vadd.f32 %v3349_v16, %v3348_v47  ;;  %v3461_v42 = vpop.f32.mrf.mxu1 }
 0x319   :  { %v3351_v30 = vpop.f32.mrf.mxu0  ;;  %v3462_v33 = vadd.f32 %v3461_v42, %v3460_v55 }
 0x31a   :  { %v3463_v32 = vpop.f32.mrf.mxu1  ;;  %v2608_v2 = vadd.f32 %v3350_v62, %v6243_v8 }
 0x31b   :  { %v3352_v40 = vpop.f32.mrf.mxu0 }
 0x31c   :  { %v3353_v44 = vadd.f32 %v3352_v40, %v3351_v30  ;;  %v3464_v43 = vpop.f32.mrf.mxu1  ;;  %v2769_v3 = vadd.f32 %v3462_v33, %v2608_v2 }
 0x31d   :  { %v3465_v5 = vadd.f32 %v3464_v43, %v3463_v32 }
 0x31e   :  { %v2611_v20 = vadd.f32 %v3353_v44, %v6243_v8 }
 0x320   :  { %v2772_v59 = vadd.f32 %v3465_v5, %v2611_v20 }
 0x322   :  { %v3233_v39 = vpack.c.bf16 %v2772_v59, %v2769_v3 }
 0x324   :  { %3281 = vst [vmem:[#allocation11 + $0x38] sm:$0xff] %v3233_v39  }
 0x325   :  { %v3354_v12 = vpop.f32.mrf.mxu0  ;;  %v3466_v15 = vpop.f32.mrf.mxu1 }
 0x327   :  { %v3355_v0 = vpop.f32.mrf.mxu0  ;;  %v3467_v63 = vpop.f32.mrf.mxu1 }
 0x328   :  { %v3356_v9 = vadd.f32 %v3355_v0, %v3354_v12  ;;  %v3468_v57 = vadd.f32 %v3467_v63, %v3466_v15 }
 0x329   :  { %v3357_v10 = vpop.f32.mrf.mxu0  ;;  %v3469_v53 = vpop.f32.mrf.mxu1 }
 0x32a   :  { %v2616_v7 = vadd.f32 %v3356_v9, %v6243_v8 }
 0x32b   :  { %v3358_v27 = vpop.f32.mrf.mxu0  ;;  %v3470_v34 = vpop.f32.mrf.mxu1 }
 0x32c   :  { %v3359_v17 = vadd.f32 %v3358_v27, %v3357_v10  ;;  %v3471_v4 = vadd.f32 %v3470_v34, %v3469_v53  ;;  %v2777_v23 = vadd.f32 %v3468_v57, %v2616_v7 }
 0x32e   :  { %v2619_v13 = vadd.f32 %v3359_v17, %v6243_v8 }
 0x330   :  { %v2780_v56 = vadd.f32 %v3471_v4, %v2619_v13 }
 0x332   :  { %v3238_v18 = vpack.c.bf16 %v2780_v56, %v2777_v23 }
 0x333   :  { %v3360_v21 = vpop.f32.mrf.mxu0 }
 0x334   :  { %3282 = vst [vmem:[#allocation11 + $0x40] sm:$0xff] %v3238_v18  }
 0x335   :  { %v3472_v22 = vpop.f32.mrf.mxu1  ;;  %v3361_v61 = vpop.f32.mrf.mxu0 }
 0x336   :  { %v3362_v51 = vadd.f32 %v3361_v61, %v3360_v21 }
 0x337   :  { %v3473_v49 = vpop.f32.mrf.mxu1  ;;  %v3363_v36 = vpop.f32.mrf.mxu0 }
 0x338   :  { %v2624_v24 = vadd.f32 %v3362_v51, %v6243_v8  ;;  %v3474_v29 = vadd.f32 %v3473_v49, %v3472_v22 }
 0x339   :  { %v3475_v35 = vpop.f32.mrf.mxu1  ;;  %v3364_v28 = vpop.f32.mrf.mxu0 }
 0x33a   :  { %v3365_v54 = vadd.f32 %v3364_v28, %v3363_v36  ;;  %v2785_v60 = vadd.f32 %v3474_v29, %v2624_v24 }
 0x33b   :  { %v3476_v46 = vpop.f32.mrf.mxu1 }
 0x33c   :  { %v2627_v41 = vadd.f32 %v3365_v54, %v6243_v8  ;;  %v3477_v6 = vadd.f32 %v3476_v46, %v3475_v35 }
 0x33e   :  { %v2788_v37 = vadd.f32 %v3477_v6, %v2627_v41 }
 0x340   :  { %v3243_v45 = vpack.c.bf16 %v2788_v37, %v2785_v60 }
 0x342   :  { %3283 = vst [vmem:[#allocation11 + $0x48] sm:$0xff] %v3243_v45   ;;  %v3366_v26 = vpop.f32.mrf.mxu0 }
 0x343   :  { %v3478_v38 = vpop.f32.mrf.mxu1 }
 0x344   :  { %v3367_v52 = vpop.f32.mrf.mxu0 }
 0x345   :  { %v3368_v50 = vadd.f32 %v3367_v52, %v3366_v26  ;;  %v3479_v1 = vpop.f32.mrf.mxu1 }
 0x346   :  { %v3369_v48 = vpop.f32.mrf.mxu0  ;;  %v3480_v11 = vadd.f32 %v3479_v1, %v3478_v38 }
 0x347   :  { %v3481_v31 = vpop.f32.mrf.mxu1  ;;  %v2632_v58 = vadd.f32 %v3368_v50, %v6243_v8 }
 0x348   :  { %v3370_v14 = vpop.f32.mrf.mxu0 }
 0x349   :  { %v3371_v25 = vadd.f32 %v3370_v14, %v3369_v48  ;;  %v3482_v19 = vpop.f32.mrf.mxu1  ;;  %v2793_v16 = vadd.f32 %v3480_v11, %v2632_v58 }
 0x34a   :  { %v3483_v55 = vadd.f32 %v3482_v19, %v3481_v31 }
 0x34b   :  { %v2635_v47 = vadd.f32 %v3371_v25, %v6243_v8 }
 0x34d   :  { %v2796_v62 = vadd.f32 %v3483_v55, %v2635_v47 }
 0x34f   :  { %v3248_v42 = vpack.c.bf16 %v2796_v62, %v2793_v16 }
 0x351   :  { %3284 = vst [vmem:[#allocation11 + $0x50] sm:$0xff] %v3248_v42   ;;  %v3372_v30 = vpop.f32.mrf.mxu0 }
 0x352   :  { %v3484_v32 = vpop.f32.mrf.mxu1 }
 0x353   :  { %v3373_v40 = vpop.f32.mrf.mxu0 }
 0x354   :  { %v3374_v2 = vadd.f32 %v3373_v40, %v3372_v30  ;;  %v3485_v44 = vpop.f32.mrf.mxu1 }
 0x355   :  { %v3375_v43 = vpop.f32.mrf.mxu0  ;;  %v3486_v39 = vadd.f32 %v3485_v44, %v3484_v32 }
 0x356   :  { %v3487_v33 = vpop.f32.mrf.mxu1  ;;  %v2640_v5 = vadd.f32 %v3374_v2, %v6243_v8 }
 0x357   :  { %v3376_v20 = vpop.f32.mrf.mxu0 }
 0x358   :  { %v3377_v3 = vadd.f32 %v3376_v20, %v3375_v43  ;;  %v3488_v59 = vpop.f32.mrf.mxu1  ;;  %v2801_v0 = vadd.f32 %v3486_v39, %v2640_v5 }
 0x359   :  { %v3489_v15 = vadd.f32 %v3488_v59, %v3487_v33 }
 0x35a   :  { %v2643_v12 = vadd.f32 %v3377_v3, %v6243_v8 }
 0x35c   :  { %v2804_v63 = vadd.f32 %v3489_v15, %v2643_v12 }
 0x35d   :  { %v3378_v9 = vpop.f32.mrf.mxu0 }
 0x35e   :  { %v3253_v10 = vpack.c.bf16 %v2804_v63, %v2801_v0  ;;  %v3490_v53 = vpop.f32.mrf.mxu1 }
 0x35f   :  { %v3379_v27 = vpop.f32.mrf.mxu0 }
 0x360   :  { %3285 = vst [vmem:[#allocation11 + $0x58] sm:$0xff] %v3253_v10   ;;  %v3380_v34 = vadd.f32 %v3379_v27, %v3378_v9  ;;  %v3491_v7 = vpop.f32.mrf.mxu1 }
 0x361   :  { %v3381_v17 = vpop.f32.mrf.mxu0  ;;  %v3492_v21 = vadd.f32 %v3491_v7, %v3490_v53 }
 0x362   :  { %v3493_v57 = vpop.f32.mrf.mxu1  ;;  %v2648_v4 = vadd.f32 %v3380_v34, %v6243_v8 }
 0x363   :  { %v3382_v13 = vpop.f32.mrf.mxu0 }
 0x364   :  { %v3383_v23 = vadd.f32 %v3382_v13, %v3381_v17  ;;  %v3494_v56 = vpop.f32.mrf.mxu1  ;;  %v2809_v36 = vadd.f32 %v3492_v21, %v2648_v4 }
 0x365   :  { %v3384_v18 = vpop.f32.mrf.mxu0  ;;  %v3495_v61 = vadd.f32 %v3494_v56, %v3493_v57 }
 0x366   :  { %v2651_v22 = vadd.f32 %v3383_v23, %v6243_v8  ;;  %v3496_v51 = vpop.f32.mrf.mxu1 }
 0x367   :  { %v3385_v49 = vpop.f32.mrf.mxu0 }
 0x368   :  { %v2812_v35 = vadd.f32 %v3495_v61, %v2651_v22  ;;  %v3386_v28 = vadd.f32 %v3385_v49, %v3384_v18  ;;  %v3497_v24 = vpop.f32.mrf.mxu1 }
 0x369   :  { %v3387_v54 = vpop.f32.mrf.mxu0  ;;  %v3498_v26 = vadd.f32 %v3497_v24, %v3496_v51 }
 0x36a   :  { %v3258_v46 = vpack.c.bf16 %v2812_v35, %v2809_v36  ;;  %v3499_v29 = vpop.f32.mrf.mxu1  ;;  %v2656_v6 = vadd.f32 %v3386_v28, %v6243_v8 }
 0x36b   :  { %v3388_v41 = vpop.f32.mrf.mxu0 }
 0x36c   :  { %3286 = vst [vmem:[#allocation11 + $0x60] sm:$0xff] %v3258_v46   ;;  %v3389_v60 = vadd.f32 %v3388_v41, %v3387_v54  ;;  %v3500_v37 = vpop.f32.mrf.mxu1  ;;  %v2817_v48 = vadd.f32 %v3498_v26, %v2656_v6 }
 0x36d   :  { %v3390_v45 = vpop.f32.mrf.mxu0  ;;  %v3501_v52 = vadd.f32 %v3500_v37, %v3499_v29 }
 0x36e   :  { %v2659_v38 = vadd.f32 %v3389_v60, %v6243_v8  ;;  %v3502_v50 = vpop.f32.mrf.mxu1 }
 0x36f   :  { %v3391_v1 = vpop.f32.mrf.mxu0 }
 0x370   :  { %v2820_v31 = vadd.f32 %v3501_v52, %v2659_v38  ;;  %v3392_v14 = vadd.f32 %v3391_v1, %v3390_v45  ;;  %v3503_v58 = vpop.f32.mrf.mxu1 }
 0x371   :  { %v3393_v25 = vpop.f32.mrf.mxu0  ;;  %v3504_v30 = vadd.f32 %v3503_v58, %v3502_v50 }
 0x372   :  { %v3263_v19 = vpack.c.bf16 %v2820_v31, %v2817_v48  ;;  %v3505_v11 = vpop.f32.mrf.mxu1  ;;  %v2664_v55 = vadd.f32 %v3392_v14, %v6243_v8 }
 0x373   :  { %v3394_v47 = vpop.f32.mrf.mxu0 }
 0x374   :  { %3287 = vst [vmem:[#allocation11 + $0x68] sm:$0xff] %v3263_v19   ;;  %v3395_v16 = vadd.f32 %v3394_v47, %v3393_v25  ;;  %v3506_v62 = vpop.f32.mrf.mxu1  ;;  %v2825_v43 = vadd.f32 %v3504_v30, %v2664_v55 }
 0x375   :  { %v3396_v42 = vpop.f32.mrf.mxu0  ;;  %v3507_v40 = vadd.f32 %v3506_v62, %v3505_v11 }
 0x376   :  { %v2667_v32 = vadd.f32 %v3395_v16, %v6243_v8  ;;  %v3508_v2 = vpop.f32.mrf.mxu1 }
 0x377   :  { %v3397_v44 = vpop.f32.mrf.mxu0 }
 0x378   :  { %v2828_v33 = vadd.f32 %v3507_v40, %v2667_v32  ;;  %v3398_v20 = vadd.f32 %v3397_v44, %v3396_v42  ;;  %v3509_v5 = vpop.f32.mrf.mxu1 }
 0x379   :  { %v3399_v3 = vpop.f32.mrf.mxu0  ;;  %v3510_v9 = vadd.f32 %v3509_v5, %v3508_v2 }
 0x37a   :  { %v3268_v59 = vpack.c.bf16 %v2828_v33, %v2825_v43  ;;  %v3511_v39 = vpop.f32.mrf.mxu1  ;;  %v2672_v15 = vadd.f32 %v3398_v20, %v6243_v8 }
 0x37b   :  { %v3400_v12 = vpop.f32.mrf.mxu0 }
 0x37c   :  { %3288 = vst [vmem:[#allocation11 + $0x70] sm:$0xff] %v3268_v59   ;;  %v3401_v0 = vadd.f32 %v3400_v12, %v3399_v3  ;;  %v3512_v63 = vpop.f32.mrf.mxu1  ;;  %v2833_v27 = vadd.f32 %v3510_v9, %v2672_v15 }
 0x37d   :  { %v3513_v53 = vadd.f32 %v3512_v63, %v3511_v39 }
 0x37e   :  { %v2675_v10 = vadd.f32 %v3401_v0, %v6243_v8 }
 0x380   :  { %v2836_v34 = vadd.f32 %v3513_v53, %v2675_v10 }
 0x382   :  { %v3273_v7 = vpack.c.bf16 %v2836_v34, %v2833_v27 }
 0x384   :  { %3289 = vst [vmem:[#allocation11 + $0x78] sm:$0xff] %v3273_v7  }
 0x385   :  { %4036 = shalt.err (!%p4033_p1)
}
 0x386   :  { %3010 = dma.vmem_to_hbm [thread:$0]  %s3005_s28, 2048, %s6290_s7, [#allocation4], %s4058_s1, %s4058_s1, %s4059_s16  }
 0x387   :  { %4051 = dma.done.wait [#allocation4], 2048  }
 0x388   :  { %4052 = vsyncadd [#allocation4], 4294965248 }
 0x389   :  { %3014 = vsyncpa [#allocation3], 1 }
 0x38a   :  { %3015 = vsyncpa [#allocation6], 1 }
 0x38b   :  { %3016 = vsyncpa [#allocation9], 1 }
 0x38c   :  { %3017 = vsyncpa [#allocation4], 1 }

</bundles_post_ra>
